<compile_context>
chip_gen: v7x
topology: tpu7x:2x2x1
jax: 0.10.0
libtpu: 0.0.40
codegen_flags: <defaults>
</compile_context>

<pallas_src>
import functools

import jax
import jax.numpy as jnp
from jax import lax
from jax.experimental import pallas as pl
from jax.experimental.pallas import tpu as pltpu

HIDDEN = 32      # hidden_dim (module default 512, shrunk for the synthetic test)
INPUT_DIM = 32   # input_dim  (module default 2304, shrunk)
KSIZE = 3
EPS = 1e-5       # nn.GroupNorm default eps

_VMEM_LIMIT = 32 * 1024 * 1024          # explicit scoped-VMEM budget (<= 64MiB v7x)
_VMEM_SPEC = pl.BlockSpec(memory_space=pltpu.MemorySpace.VMEM)


def _round_up(x, m):
    return (x + m - 1) // m * m


# --------------------------- tiled bf16 MXU matmul ---------------------------

def _matmul_kernel(x_ref, w_ref, o_ref, acc_ref, *, relu):
    @pl.when(pl.program_id(2) == 0)
    def _init():
        acc_ref[...] = jnp.zeros_like(acc_ref)

    acc_ref[...] += jnp.dot(x_ref[...], w_ref[...],
                            preferred_element_type=jnp.float32)

    @pl.when(pl.program_id(2) == pl.num_programs(2) - 1)
    def _finalize():
        out = acc_ref[...]
        if relu:
            out = jnp.maximum(out, 0.0)
        o_ref[...] = out.astype(o_ref.dtype)


def pallas_matmul(x, w, relu=False, out_dtype=jnp.float32,
                  tm=256, tk=256, tn=256):
    """relu(x @ w) with a gridded, double-buffered, bf16-operand MXU kernel."""
    m, k = x.shape
    k2, n = w.shape
    assert k == k2
    tm = min(tm, _round_up(m, 8))
    tk = min(tk, _round_up(k, 128))
    tn = min(tn, _round_up(n, 128))
    mp, kp, np_ = _round_up(m, tm), _round_up(k, tk), _round_up(n, tn)
    xb = jnp.pad(x.astype(jnp.bfloat16), ((0, mp - m), (0, kp - k)))
    wb = jnp.pad(w.astype(jnp.bfloat16), ((0, kp - k), (0, np_ - n)))
    out = pl.pallas_call(
        functools.partial(_matmul_kernel, relu=relu),
        out_shape=jax.ShapeDtypeStruct((mp, np_), out_dtype),
        grid_spec=pltpu.PrefetchScalarGridSpec(
            num_scalar_prefetch=0,
            grid=(mp // tm, np_ // tn, kp // tk),
            in_specs=[pl.BlockSpec((tm, tk), lambda i, j, kk: (i, kk)),
                      pl.BlockSpec((tk, tn), lambda i, j, kk: (kk, j))],
            out_specs=pl.BlockSpec((tm, tn), lambda i, j, kk: (i, j)),
            scratch_shapes=[pltpu.VMEM((tm, tn), jnp.float32)]),
        compiler_params=pltpu.CompilerParams(
            dimension_semantics=("parallel", "parallel", "arbitrary"),
            vmem_limit_bytes=_VMEM_LIMIT),
    )(xb, wb)
    return out[:m, :n]


# ------------------- im2col-free conv (row-shifted matmuls) -------------------

def _conv_taps_kernel(x_ref, w_ref, o_ref, *, row_offsets, r):
    # x_ref: (Lp, Cin) bf16 flattened, spatially padded sample
    # w_ref: (kh*kw, Cin, Cout) bf16; o_ref: (R, Cout)
    # kh*kw MXU matmuls over row-shifted views of the same activation
    # (activation read once -> no 9x im2col HBM blow-up).
    acc = jnp.zeros(o_ref.shape, jnp.float32)
    for t, off in enumerate(row_offsets):
        acc = acc + jnp.dot(x_ref[off:off + r, :], w_ref[t],
                            preferred_element_type=jnp.float32)
    o_ref[...] = acc.astype(o_ref.dtype)


def pallas_conv2d(x, w_oihw, padding, out_dtype=jnp.float32):
    """Conv2d (stride 1, bias=False). x: (N,H,W,Cin); w: (Cout,Cin,kh,kw)."""
    cout, cin, kh, kw = w_oihw.shape
    n, h, w_, _ = x.shape
    if padding > 0:
        x = jnp.pad(x, ((0, 0), (padding, padding), (padding, padding), (0, 0)))
    hp, wp = h + 2 * padding, w_ + 2 * padding
    ho, wo = hp - kh + 1, wp - kw + 1
    r = ho * wp                          # rows per sample incl. wrap columns
    lp = hp * wp + (kw - 1)              # pad so every tap slice stays in-bounds
    x_flat = jnp.pad(x.reshape(n, hp * wp, cin).astype(jnp.bfloat16),
                     ((0, 0), (0, kw - 1), (0, 0)))
    w_mat = jnp.transpose(w_oihw, (2, 3, 1, 0)).reshape(kh * kw, cin, cout)
    w_mat = w_mat.astype(jnp.bfloat16)
    row_offsets = tuple(di * wp + dj for di in range(kh) for dj in range(kw))
    out = pl.pallas_call(
        functools.partial(_conv_taps_kernel, row_offsets=row_offsets, r=r),
        out_shape=jax.ShapeDtypeStruct((n, r, cout), out_dtype),
        grid_spec=pltpu.PrefetchScalarGridSpec(
            num_scalar_prefetch=0,
            grid=(n,),
            in_specs=[pl.BlockSpec((None, lp, cin), lambda i: (i, 0, 0)),
                      pl.BlockSpec((kh * kw, cin, cout), lambda i: (0, 0, 0))],
            out_specs=pl.BlockSpec((None, r, cout), lambda i: (i, 0, 0))),
        compiler_params=pltpu.CompilerParams(
            dimension_semantics=("parallel",),
            vmem_limit_bytes=_VMEM_LIMIT),
    )(x_flat, w_mat)
    # drop the kw-1 "wrap" columns, back to NHWC
    return out.reshape(n, ho, wp, cout)[:, :, :wo, :]


# ------------------------- vectorized MaxPool2d(3,2,1) ------------------------

def _maxpool_kernel(ee_ref, eo_ref, oe_ref, oo_ref, o_ref):
    ho, wo = o_ref.shape[1], o_ref.shape[2]
    m = ee_ref[:, :ho, :wo, :]
    m = jnp.maximum(m, ee_ref[:, :ho, 1:wo + 1, :])
    m = jnp.maximum(m, ee_ref[:, 1:ho + 1, :wo, :])
    m = jnp.maximum(m, ee_ref[:, 1:ho + 1, 1:wo + 1, :])
    m = jnp.maximum(m, eo_ref[:, :ho, :, :])
    m = jnp.maximum(m, eo_ref[:, 1:ho + 1, :, :])
    m = jnp.maximum(m, oe_ref[:, :, :wo, :])
    m = jnp.maximum(m, oe_ref[:, :, 1:wo + 1, :])
    m = jnp.maximum(m, oo_ref[...])
    o_ref[...] = m


def pallas_maxpool_3x3_s2_p1(x):
    # x: (N, H, W, C) f32 -> (N, Ho, Wo, C); even/odd phase split in XLA glue,
    # kernel does only whole-slab contiguous maxes (no loops, no transposes).
    n, h, w, c = x.shape
    ho = (h + 2 - 3) // 2 + 1
    wo = (w + 2 - 3) // 2 + 1
    xp = jnp.pad(x, ((0, 0), (1, 1), (1, 1), (0, 0)), constant_values=-jnp.inf)
    ee = xp[:, 0:2 * ho + 1:2, 0:2 * wo + 1:2, :]
    eo = xp[:, 0:2 * ho + 1:2, 1:2 * wo:2, :]
    oe = xp[:, 1:2 * ho:2, 0:2 * wo + 1:2, :]
    oo = xp[:, 1:2 * ho:2, 1:2 * wo:2, :]
    return pl.pallas_call(
        _maxpool_kernel,
        out_shape=jax.ShapeDtypeStruct((n, ho, wo, c), x.dtype),
        grid_spec=pltpu.PrefetchScalarGridSpec(
            num_scalar_prefetch=0,
            grid=(n,),
            in_specs=[
                pl.BlockSpec((1, ho + 1, wo + 1, c), lambda i: (i, 0, 0, 0)),
                pl.BlockSpec((1, ho + 1, wo, c), lambda i: (i, 0, 0, 0)),
                pl.BlockSpec((1, ho, wo + 1, c), lambda i: (i, 0, 0, 0)),
                pl.BlockSpec((1, ho, wo, c), lambda i: (i, 0, 0, 0)),
            ],
            out_specs=pl.BlockSpec((1, ho, wo, c), lambda i: (i, 0, 0, 0))),
        compiler_params=pltpu.CompilerParams(
            dimension_semantics=("parallel",),
            vmem_limit_bytes=_VMEM_LIMIT),
    )(ee, eo, oe, oo)


# --------------- masked attention + GroupNorm + ReLU (MXU einsums) ------------

def _attn_norm_kernel(q_ref, k_ref, v_ref, bias_ref, g_ref, b_ref, o_ref,
                      *, hidden_dim, eps):
    # q/k/v: (S, N, C) bf16 ; bias: (N, N) f32 (0 same group, -1e30 otherwise)
    q = q_ref[...]
    k = k_ref[...]
    v = v_ref[...]
    scale = 1.0 / float(hidden_dim) ** 0.5
    # Batched MXU matmuls; batch axis = spatial position s (flash-attn layout).
    att = jnp.einsum('snc,smc->snm', q, k,
                     preferred_element_type=jnp.float32) * scale
    att = att + bias_ref[...]                       # roi-group mask
    att = att - jnp.max(att, axis=-1, keepdims=True)
    p = jnp.exp(att)
    p = p * pl.reciprocal(jnp.sum(p, axis=-1, keepdims=True), approx=True)
    virt = jnp.einsum('snm,smc->snc', p.astype(jnp.bfloat16), v,
                      preferred_element_type=jnp.float32)       # (S, N, C) f32
    # GroupNorm(1, C): per-roi stats over (S, C) = axes (0, 2), f32 throughout.
    cnt = float(virt.shape[0] * virt.shape[2])
    mean = jnp.sum(jnp.sum(virt, axis=2, keepdims=True), axis=0,
                   keepdims=True) / cnt
    diff = virt - mean
    var = jnp.sum(jnp.sum(diff * diff, axis=2, keepdims=True), axis=0,
                  keepdims=True) / cnt
    xn = diff * lax.rsqrt(var + eps)
    xn = xn * g_ref[...] + b_ref[...]               # (1,1,C) affine
    o_ref[...] = jnp.maximum(xn, 0.0).astype(o_ref.dtype)


def pallas_attention_block(q, k, v, bias, gamma, beta, hidden_dim):
    s, n, c = q.shape
    return pl.pallas_call(
        functools.partial(_attn_norm_kernel, hidden_dim=hidden_dim, eps=EPS),
        out_shape=jax.ShapeDtypeStruct((s, n, c), jnp.float32),
        in_specs=[_VMEM_SPEC] * 6,
        out_specs=_VMEM_SPEC,
        compiler_params=pltpu.CompilerParams(vmem_limit_bytes=_VMEM_LIMIT),
    )(q, k, v, bias, gamma, beta)


# ---------------------- residual + GAP and bbox GAP + FC ----------------------

def _residual_gap_kernel(a_ref, b_ref, o_ref):
    s = a_ref[...].astype(jnp.float32) + b_ref[...].astype(jnp.float32)
    o_ref[...] = jnp.mean(s, axis=1).astype(o_ref.dtype)   # AdaptiveAvgPool2d(1)


def pallas_residual_gap(a, b, bn=8):
    n, s, c = a.shape
    np_ = _round_up(n, bn)
    a = jnp.pad(a, ((0, np_ - n), (0, 0), (0, 0)))
    b = jnp.pad(b, ((0, np_ - n), (0, 0), (0, 0)))
    out = pl.pallas_call(
        _residual_gap_kernel,
        out_shape=jax.ShapeDtypeStruct((np_, c), jnp.float32),
        grid_spec=pltpu.PrefetchScalarGridSpec(
            num_scalar_prefetch=0,
            grid=(np_ // bn,),
            in_specs=[pl.BlockSpec((bn, s, c), lambda i: (i, 0, 0)),
                      pl.BlockSpec((bn, s, c), lambda i: (i, 0, 0))],
            out_specs=pl.BlockSpec((bn, c), lambda i: (i, 0))),
        compiler_params=pltpu.CompilerParams(
            dimension_semantics=("parallel",),
            vmem_limit_bytes=_VMEM_LIMIT),
    )(a, b)
    return out[:n]


def _gap_fc_relu_kernel(x_ref, w_ref, o_ref):
    g = jnp.mean(x_ref[...].astype(jnp.float32), axis=1)    # AdaptiveAvgPool3d(1)
    o = jnp.dot(g.astype(jnp.bfloat16), w_ref[...],
                preferred_element_type=jnp.float32)
    o_ref[...] = jnp.maximum(o, 0.0)                        # fc1 + ReLU


def pallas_gap_fc_relu(x, w, bn=8):
    n, p, c2 = x.shape
    cout = w.shape[1]
    np_ = _round_up(n, bn)
    x = jnp.pad(x, ((0, np_ - n), (0, 0), (0, 0)))
    wb = w.astype(jnp.bfloat16)
    out = pl.pallas_call(
        _gap_fc_relu_kernel,
        out_shape=jax.ShapeDtypeStruct((np_, cout), jnp.float32),
        grid_spec=pltpu.PrefetchScalarGridSpec(
            num_scalar_prefetch=0,
            grid=(np_ // bn,),
            in_specs=[pl.BlockSpec((bn, p, c2), lambda i: (i, 0, 0)),
                      pl.BlockSpec((c2, cout), lambda i: (0, 0))],
            out_specs=pl.BlockSpec((bn, cout), lambda i: (i, 0))),
        compiler_params=pltpu.CompilerParams(
            dimension_semantics=("parallel",),
            vmem_limit_bytes=_VMEM_LIMIT),
    )(x, wb)
    return out[:n]


# ------------------------------ params & forward ------------------------------

def init_params(key, input_dim, hidden_dim, ksize):
    keys = jax.random.split(key, 7)

    def w(k, shape, scale=0.05):
        return scale * jax.random.normal(k, shape, dtype=jnp.float32)

    return dict(
        conv_reduce=w(keys[0], (hidden_dim, input_dim, 1, 1)),
        conv_reduce_size=w(keys[1], (hidden_dim, hidden_dim, ksize, ksize)),
        conv_q1=w(keys[2], (hidden_dim, hidden_dim, ksize, ksize)),
        conv_k1=w(keys[3], (hidden_dim, hidden_dim, ksize, ksize)),
        conv_v1=w(keys[4], (hidden_dim, hidden_dim, ksize, ksize)),
        conv1=w(keys[5], (hidden_dim, hidden_dim, ksize, ksize)),
        norm_gamma=jnp.ones((1, hidden_dim), jnp.float32),   # GroupNorm defaults
        norm_beta=jnp.zeros((1, hidden_dim), jnp.float32),
        fc1=w(keys[6], (hidden_dim, 2 * hidden_dim)),        # nn.Linear (out, in)
    )


def monkey_acar_qkv_forward(params, rois, interact_feat, bbox_feat,
                            hidden_dim=HIDDEN, ksize=KSIZE):
    # interact_feat: (N, input_dim, 1, H, W); bbox_feat: (N, 2*hidden, T, Hb, Wb)
    pad = ksize // 2

    x = jnp.squeeze(interact_feat, axis=2)                 # (N, Cin, H, W)
    x = jnp.transpose(x, (0, 2, 3, 1))                     # NHWC
    n, h, w, cin = x.shape

    # conv_reduce (1x1) + ReLU : tiled bf16 MXU matmul.
    w_red = jnp.transpose(params['conv_reduce'][:, :, 0, 0], (1, 0))
    x = pallas_matmul(x.reshape(n * h * w, cin), w_red, relu=True,
                      out_dtype=jnp.bfloat16).reshape(n, h, w, hidden_dim)

    # conv_reduce_size : 3x3, no padding (im2col-free).
    x = pallas_conv2d(x, params['conv_reduce_size'], padding=0)

    # MaxPool2d(3, stride=2, padding=1).
    x = pallas_maxpool_3x3_s2_p1(x)
    n, h2, w2, c = x.shape
    s = h2 * w2

    # Fused Q/K/V conv over ALL rois (weights concatenated on output channels,
    # hoisted out of the per-group loop).
    w_qkv = jnp.concatenate(
        [params['conv_q1'], params['conv_k1'], params['conv_v1']], axis=0)
    qkv = pallas_conv2d(x, w_qkv, padding=pad, out_dtype=jnp.bfloat16)
    qkv = jnp.transpose(qkv.reshape(n, s, 3 * c), (1, 0, 2))   # (S, N, 3C)
    q, k, v = qkv[..., :c], qkv[..., c:2 * c], qkv[..., 2 * c:]

    # ROI batch grouping as an additive attention bias (replaces the host-side
    # python loop; cross-group pairs get -1e30 -> zero softmax weight).
    bid = rois[:, 0].astype(jnp.int32)
    bias = jnp.where(bid[:, None] == bid[None, :], 0.0, -1e30)
    bias = bias.astype(jnp.float32)

    gamma = params['norm_gamma'].reshape(1, 1, c)
    beta = params['norm_beta'].reshape(1, 1, c)
    virt = pallas_attention_block(q, k, v, bias, gamma, beta, hidden_dim)
    virt = jnp.transpose(virt, (1, 0, 2)).reshape(n, h2, w2, c)

    # conv1 (3x3, same padding).
    virt = pallas_conv2d(virt, params['conv1'], padding=pad)
    # TODO(synk): nn.Dropout(0.2) is identity in eval mode; not applied here.

    # Residual add + AdaptiveAvgPool2d(1), fused.
    hof = pallas_residual_gap(x.reshape(n, s, c), virt.reshape(n, s, c))  # (N, C)

    # bbox path: AdaptiveAvgPool3d(1) + fc1 + ReLU fused.
    nb, c2, t, hb, wb = bbox_feat.shape
    bb = jnp.transpose(bbox_feat, (0, 2, 3, 4, 1)).reshape(nb, t * hb * wb, c2)
    out_feats = pallas_gap_fc_relu(bb, jnp.transpose(params['fc1'], (1, 0)))

    return jnp.concatenate([hof, out_feats], axis=1)        # (N, 2*hidden)


# ------------------------------------ main ------------------------------------

if __name__ == "__main__":
    key = jax.random.PRNGKey(0)
    kp, k1, k2 = jax.random.split(key, 3)
    params = init_params(kp, INPUT_DIM, HIDDEN, KSIZE)

    n_rois_total = 4
    h, w = 9, 9
    rois = jnp.array([[0, 0.0, 0.0, 1.0, 1.0],
                      [0, 0.2, 0.2, 0.8, 0.8],
                      [1, 0.1, 0.1, 0.9, 0.9],
                      [1, 0.3, 0.3, 0.7, 0.7]], dtype=jnp.float32)
    interact_feat = jax.random.normal(k1, (n_rois_total, INPUT_DIM, 1, h, w),
                                      jnp.float32)
    bbox_feat = jax.random.normal(k2, (n_rois_total, 2 * HIDDEN, 2, 4, 4),
                                  jnp.float32)

    fwd = jax.jit(monkey_acar_qkv_forward)
    out = jax.block_until_ready(fwd(params, rois, interact_feat, bbox_feat))
    assert out.shape == (n_rois_total, 2 * HIDDEN), out.shape
    assert bool(jnp.all(jnp.isfinite(out))), "non-finite output"
    print("KERNEL_OK")
</pallas_src>

<mosaic_0001>
module attributes {stable_mosaic.version = 11 : i64} {
  func.func @_matmul_kernel(%arg0: i32, %arg1: i32, %arg2: i32, %arg3: memref<256x128xbf16, #tpu.memory_space<vmem>>, %arg4: memref<128x128xbf16, #tpu.memory_space<vmem>>, %arg5: memref<256x128xbf16, #tpu.memory_space<vmem>>, %arg6: memref<256x128xf32, #tpu.memory_space<vmem>>) attributes {dimension_semantics = [#tpu.dimension_semantics<parallel>, #tpu.dimension_semantics<parallel>, #tpu.dimension_semantics<arbitrary>], iteration_bounds = array<i64: 2, 1, 1>, scalar_prefetch = 0 : i64, scratch_operands = 1 : i64, tpu.core_type = #tpu.core_type<tc>, window_params = [{transform_indices = @transform_0, window_bounds = array<i64: 256, 128>}, {transform_indices = @transform_1, window_bounds = array<i64: 128, 128>}, {transform_indices = @transform_2, window_bounds = array<i64: 256, 128>}]} {
    %c0_i32 = arith.constant 0 : i32
    %0 = arith.cmpi eq, %arg2, %c0_i32 : i32
    %1 = arith.extui %0 : i1 to i32
    %c0_i32_0 = arith.constant 0 : i32
    %2 = arith.cmpi ne, %1, %c0_i32_0 : i32
    scf.if %2 {
      %cst_10 = arith.constant 0.000000e+00 : f32
      %12 = vector.broadcast %cst_10 : f32 to vector<256x128xf32>
      %c0_11 = arith.constant 0 : index
      %c0_12 = arith.constant 0 : index
      %13 = vector.load %arg6[%c0_11, %c0_12] : memref<256x128xf32, #tpu.memory_space<vmem>>, vector<256x128xf32>
      tpu.vector_store %arg6[%c0_11, %c0_12], %12 {strides = array<i32>} : memref<256x128xf32, #tpu.memory_space<vmem>>, vector<256x128xf32>,
    } else {
    }
    %c0 = arith.constant 0 : index
    %c0_1 = arith.constant 0 : index
    %3 = vector.load %arg6[%c0, %c0_1] : memref<256x128xf32, #tpu.memory_space<vmem>>, vector<256x128xf32>
    %c0_2 = arith.constant 0 : index
    %c0_3 = arith.constant 0 : index
    %4 = vector.load %arg3[%c0_2, %c0_3] : memref<256x128xbf16, #tpu.memory_space<vmem>>, vector<256x128xbf16>
    %c0_4 = arith.constant 0 : index
    %c0_5 = arith.constant 0 : index
    %5 = vector.load %arg4[%c0_4, %c0_5] : memref<128x128xbf16, #tpu.memory_space<vmem>>, vector<128x128xbf16>
    %cst = arith.constant dense<0.000000e+00> : vector<256x128xf32>
    %6 = tpu.matmul %4, %5, %cst {dimension_numbers = #tpu.dot_dimension_numbers<[1], [0], [0], [1], [0, 0, 1, 1], [], []>} : vector<256x128xbf16>, vector<128x128xbf16>, vector<256x128xf32> -> vector<256x128xf32>
    %7 = arith.addf %3, %6 : vector<256x128xf32>
    %c0_6 = arith.constant 0 : index
    %c0_7 = arith.constant 0 : index
    %8 = vector.load %arg6[%c0_6, %c0_7] : memref<256x128xf32, #tpu.memory_space<vmem>>, vector<256x128xf32>
    tpu.vector_store %arg6[%c0_6, %c0_7], %7 {strides = array<i32>} : memref<256x128xf32, #tpu.memory_space<vmem>>, vector<256x128xf32>,
    %c0_i32_8 = arith.constant 0 : i32
    %9 = arith.cmpi eq, %arg2, %c0_i32_8 : i32
    %10 = arith.extui %9 : i1 to i32
    %c0_i32_9 = arith.constant 0 : i32
    %11 = arith.cmpi ne, %10, %c0_i32_9 : i32
    scf.if %11 {
      %c0_10 = arith.constant 0 : index
      %c0_11 = arith.constant 0 : index
      %12 = vector.load %arg6[%c0_10, %c0_11] : memref<256x128xf32, #tpu.memory_space<vmem>>, vector<256x128xf32>
      %cst_12 = arith.constant 0.000000e+00 : f32
      %13 = vector.broadcast %cst_12 : f32 to vector<256x128xf32>
      %14 = arith.maximumf %12, %13 : vector<256x128xf32>
      %15 = arith.truncf %14 : vector<256x128xf32> to vector<256x128xbf16>
      %c0_13 = arith.constant 0 : index
      %c0_14 = arith.constant 0 : index
      %16 = vector.load %arg5[%c0_13, %c0_14] : memref<256x128xbf16, #tpu.memory_space<vmem>>, vector<256x128xbf16>
      tpu.vector_store %arg5[%c0_13, %c0_14], %15 {strides = array<i32>} : memref<256x128xbf16, #tpu.memory_space<vmem>>, vector<256x128xbf16>,
    } else {
    }
    return
  }
  func.func @transform_0(%arg0: i32, %arg1: i32, %arg2: i32) -> (i32, i32) {
    %c0_i32 = arith.constant 0 : i32
    return %arg0, %arg2 : i32, i32
  }
  func.func @transform_1(%arg0: i32, %arg1: i32, %arg2: i32) -> (i32, i32) {
    %c0_i32 = arith.constant 0 : i32
    return %arg2, %arg1 : i32, i32
  }
  func.func @transform_2(%arg0: i32, %arg1: i32, %arg2: i32) -> (i32, i32) {
    %c0_i32 = arith.constant 0 : i32
    return %arg0, %arg1 : i32, i32
  }
}

module attributes {stable_mosaic.version = 11 : i64} {
  func.func @_conv_taps_kernel(%arg0: i32, %arg1: memref<1x83x32xbf16, #tpu.memory_space<vmem>>, %arg2: memref<9x32x32xbf16, #tpu.memory_space<vmem>>, %arg3: memref<1x63x32xf32, #tpu.memory_space<vmem>>) attributes {dimension_semantics = [#tpu.dimension_semantics<parallel>], iteration_bounds = array<i64: 4>, scalar_prefetch = 0 : i64, scratch_operands = 0 : i64, tpu.core_type = #tpu.core_type<tc>, window_params = [{transform_indices = @transform_0, window_bounds = array<i64: 1, 83, 32>}, {pipeline_mode = #tpu.pipeline_mode<synchronous>, transform_indices = @transform_1, window_bounds = array<i64: 9, 32, 32>}, {transform_indices = @transform_2, window_bounds = array<i64: 1, 63, 32>}]} {
    %cst = arith.constant 0.000000e+00 : f32
    %0 = vector.broadcast %cst : f32 to vector<63x32xf32>
    %c0 = arith.constant 0 : index
    %c0_0 = arith.constant 0 : index
    %c0_1 = arith.constant 0 : index
    %1 = vector.load %arg1[%c0, %c0_0, %c0_1] : memref<1x83x32xbf16, #tpu.memory_space<vmem>>, vector<1x63x32xbf16>
    %2 = vector.shape_cast %1 : vector<1x63x32xbf16> to vector<63x32xbf16>
    %c0_2 = arith.constant 0 : index
    %c0_3 = arith.constant 0 : index
    %c0_4 = arith.constant 0 : index
    %3 = vector.load %arg2[%c0_2, %c0_3, %c0_4] : memref<9x32x32xbf16, #tpu.memory_space<vmem>>, vector<1x32x32xbf16>
    %4 = vector.shape_cast %3 : vector<1x32x32xbf16> to vector<32x32xbf16>
    %cst_5 = arith.constant dense<0.000000e+00> : vector<63x32xf32>
    %5 = tpu.matmul %2, %4, %cst_5 {dimension_numbers = #tpu.dot_dimension_numbers<[1], [0], [0], [1], [0, 0, 1, 1], [], []>} : vector<63x32xbf16>, vector<32x32xbf16>, vector<63x32xf32> -> vector<63x32xf32>
    %6 = arith.addf %0, %5 : vector<63x32xf32>
    %c0_6 = arith.constant 0 : index
    %c1 = arith.constant 1 : index
    %c0_7 = arith.constant 0 : index
    %7 = vector.load %arg1[%c0_6, %c1, %c0_7] : memref<1x83x32xbf16, #tpu.memory_space<vmem>>, vector<1x63x32xbf16>
    %8 = vector.shape_cast %7 : vector<1x63x32xbf16> to vector<63x32xbf16>
    %c1_8 = arith.constant 1 : index
    %c0_9 = arith.constant 0 : index
    %c0_10 = arith.constant 0 : index
    %9 = vector.load %arg2[%c1_8, %c0_9, %c0_10] : memref<9x32x32xbf16, #tpu.memory_space<vmem>>, vector<1x32x32xbf16>
    %10 = vector.shape_cast %9 : vector<1x32x32xbf16> to vector<32x32xbf16>
    %cst_11 = arith.constant dense<0.000000e+00> : vector<63x32xf32>
    %11 = tpu.matmul %8, %10, %cst_11 {dimension_numbers = #tpu.dot_dimension_numbers<[1], [0], [0], [1], [0, 0, 1, 1], [], []>} : vector<63x32xbf16>, vector<32x32xbf16>, vector<63x32xf32> -> vector<63x32xf32>
    %12 = arith.addf %6, %11 : vector<63x32xf32>
    %c0_12 = arith.constant 0 : index
    %c2 = arith.constant 2 : index
    %c0_13 = arith.constant 0 : index
    %13 = vector.load %arg1[%c0_12, %c2, %c0_13] : memref<1x83x32xbf16, #tpu.memory_space<vmem>>, vector<1x63x32xbf16>
    %14 = vector.shape_cast %13 : vector<1x63x32xbf16> to vector<63x32xbf16>
    %c2_14 = arith.constant 2 : index
    %c0_15 = arith.constant 0 : index
    %c0_16 = arith.constant 0 : index
    %15 = vector.load %arg2[%c2_14, %c0_15, %c0_16] : memref<9x32x32xbf16, #tpu.memory_space<vmem>>, vector<1x32x32xbf16>
    %16 = vector.shape_cast %15 : vector<1x32x32xbf16> to vector<32x32xbf16>
    %cst_17 = arith.constant dense<0.000000e+00> : vector<63x32xf32>
    %17 = tpu.matmul %14, %16, %cst_17 {dimension_numbers = #tpu.dot_dimension_numbers<[1], [0], [0], [1], [0, 0, 1, 1], [], []>} : vector<63x32xbf16>, vector<32x32xbf16>, vector<63x32xf32> -> vector<63x32xf32>
    %18 = arith.addf %12, %17 : vector<63x32xf32>
    %c0_18 = arith.constant 0 : index
    %c9 = arith.constant 9 : index
    %c0_19 = arith.constant 0 : index
    %19 = vector.load %arg1[%c0_18, %c9, %c0_19] : memref<1x83x32xbf16, #tpu.memory_space<vmem>>, vector<1x63x32xbf16>
    %20 = vector.shape_cast %19 : vector<1x63x32xbf16> to vector<63x32xbf16>
    %c3 = arith.constant 3 : index
    %c0_20 = arith.constant 0 : index
    %c0_21 = arith.constant 0 : index
    %21 = vector.load %arg2[%c3, %c0_20, %c0_21] : memref<9x32x32xbf16, #tpu.memory_space<vmem>>, vector<1x32x32xbf16>
    %22 = vector.shape_cast %21 : vector<1x32x32xbf16> to vector<32x32xbf16>
    %cst_22 = arith.constant dense<0.000000e+00> : vector<63x32xf32>
    %23 = tpu.matmul %20, %22, %cst_22 {dimension_numbers = #tpu.dot_dimension_numbers<[1], [0], [0], [1], [0, 0, 1, 1], [], []>} : vector<63x32xbf16>, vector<32x32xbf16>, vector<63x32xf32> -> vector<63x32xf32>
    %24 = arith.addf %18, %23 : vector<63x32xf32>
    %c0_23 = arith.constant 0 : index
    %c10 = arith.constant 10 : index
    %c0_24 = arith.constant 0 : index
    %25 = vector.load %arg1[%c0_23, %c10, %c0_24] : memref<1x83x32xbf16, #tpu.memory_space<vmem>>, vector<1x63x32xbf16>
    %26 = vector.shape_cast %25 : vector<1x63x32xbf16> to vector<63x32xbf16>
    %c4 = arith.constant 4 : index
    %c0_25 = arith.constant 0 : index
    %c0_26 = arith.constant 0 : index
    %27 = vector.load %arg2[%c4, %c0_25, %c0_26] : memref<9x32x32xbf16, #tpu.memory_space<vmem>>, vector<1x32x32xbf16>
    %28 = vector.shape_cast %27 : vector<1x32x32xbf16> to vector<32x32xbf16>
    %cst_27 = arith.constant dense<0.000000e+00> : vector<63x32xf32>
    %29 = tpu.matmul %26, %28, %cst_27 {dimension_numbers = #tpu.dot_dimension_numbers<[1], [0], [0], [1], [0, 0, 1, 1], [], []>} : vector<63x32xbf16>, vector<32x32xbf16>, vector<63x32xf32> -> vector<63x32xf32>
    %30 = arith.addf %24, %29 : vector<63x32xf32>
    %c0_28 = arith.constant 0 : index
    %c11 = arith.constant 11 : index
    %c0_29 = arith.constant 0 : index
    %31 = vector.load %arg1[%c0_28, %c11, %c0_29] : memref<1x83x32xbf16, #tpu.memory_space<vmem>>, vector<1x63x32xbf16>
    %32 = vector.shape_cast %31 : vector<1x63x32xbf16> to vector<63x32xbf16>
    %c5 = arith.constant 5 : index
    %c0_30 = arith.constant 0 : index
    %c0_31 = arith.constant 0 : index
    %33 = vector.load %arg2[%c5, %c0_30, %c0_31] : memref<9x32x32xbf16, #tpu.memory_space<vmem>>, vector<1x32x32xbf16>
    %34 = vector.shape_cast %33 : vector<1x32x32xbf16> to vector<32x32xbf16>
    %cst_32 = arith.constant dense<0.000000e+00> : vector<63x32xf32>
    %35 = tpu.matmul %32, %34, %cst_32 {dimension_numbers = #tpu.dot_dimension_numbers<[1], [0], [0], [1], [0, 0, 1, 1], [], []>} : vector<63x32xbf16>, vector<32x32xbf16>, vector<63x32xf32> -> vector<63x32xf32>
    %36 = arith.addf %30, %35 : vector<63x32xf32>
    %c0_33 = arith.constant 0 : index
    %c18 = arith.constant 18 : index
    %c0_34 = arith.constant 0 : index
    %37 = vector.load %arg1[%c0_33, %c18, %c0_34] : memref<1x83x32xbf16, #tpu.memory_space<vmem>>, vector<1x63x32xbf16>
    %38 = vector.shape_cast %37 : vector<1x63x32xbf16> to vector<63x32xbf16>
    %c6 = arith.constant 6 : index
    %c0_35 = arith.constant 0 : index
    %c0_36 = arith.constant 0 : index
    %39 = vector.load %arg2[%c6, %c0_35, %c0_36] : memref<9x32x32xbf16, #tpu.memory_space<vmem>>, vector<1x32x32xbf16>
    %40 = vector.shape_cast %39 : vector<1x32x32xbf16> to vector<32x32xbf16>
    %cst_37 = arith.constant dense<0.000000e+00> : vector<63x32xf32>
    %41 = tpu.matmul %38, %40, %cst_37 {dimension_numbers = #tpu.dot_dimension_numbers<[1], [0], [0], [1], [0, 0, 1, 1], [], []>} : vector<63x32xbf16>, vector<32x32xbf16>, vector<63x32xf32> -> vector<63x32xf32>
    %42 = arith.addf %36, %41 : vector<63x32xf32>
    %c0_38 = arith.constant 0 : index
    %c19 = arith.constant 19 : index
    %c0_39 = arith.constant 0 : index
    %43 = vector.load %arg1[%c0_38, %c19, %c0_39] : memref<1x83x32xbf16, #tpu.memory_space<vmem>>, vector<1x63x32xbf16>
    %44 = vector.shape_cast %43 : vector<1x63x32xbf16> to vector<63x32xbf16>
    %c7 = arith.constant 7 : index
    %c0_40 = arith.constant 0 : index
    %c0_41 = arith.constant 0 : index
    %45 = vector.load %arg2[%c7, %c0_40, %c0_41] : memref<9x32x32xbf16, #tpu.memory_space<vmem>>, vector<1x32x32xbf16>
    %46 = vector.shape_cast %45 : vector<1x32x32xbf16> to vector<32x32xbf16>
    %cst_42 = arith.constant dense<0.000000e+00> : vector<63x32xf32>
    %47 = tpu.matmul %44, %46, %cst_42 {dimension_numbers = #tpu.dot_dimension_numbers<[1], [0], [0], [1], [0, 0, 1, 1], [], []>} : vector<63x32xbf16>, vector<32x32xbf16>, vector<63x32xf32> -> vector<63x32xf32>
    %48 = arith.addf %42, %47 : vector<63x32xf32>
    %c0_43 = arith.constant 0 : index
    %c20 = arith.constant 20 : index
    %c0_44 = arith.constant 0 : index
    %49 = vector.load %arg1[%c0_43, %c20, %c0_44] : memref<1x83x32xbf16, #tpu.memory_space<vmem>>, vector<1x63x32xbf16>
    %50 = vector.shape_cast %49 : vector<1x63x32xbf16> to vector<63x32xbf16>
    %c8 = arith.constant 8 : index
    %c0_45 = arith.constant 0 : index
    %c0_46 = arith.constant 0 : index
    %51 = vector.load %arg2[%c8, %c0_45, %c0_46] : memref<9x32x32xbf16, #tpu.memory_space<vmem>>, vector<1x32x32xbf16>
    %52 = vector.shape_cast %51 : vector<1x32x32xbf16> to vector<32x32xbf16>
    %cst_47 = arith.constant dense<0.000000e+00> : vector<63x32xf32>
    %53 = tpu.matmul %50, %52, %cst_47 {dimension_numbers = #tpu.dot_dimension_numbers<[1], [0], [0], [1], [0, 0, 1, 1], [], []>} : vector<63x32xbf16>, vector<32x32xbf16>, vector<63x32xf32> -> vector<63x32xf32>
    %54 = arith.addf %48, %53 : vector<63x32xf32>
    %c0_48 = arith.constant 0 : index
    %c0_49 = arith.constant 0 : index
    %c0_50 = arith.constant 0 : index
    %55 = vector.load %arg3[%c0_48, %c0_49, %c0_50] : memref<1x63x32xf32, #tpu.memory_space<vmem>>, vector<1x63x32xf32>
    %56 = vector.shape_cast %55 : vector<1x63x32xf32> to vector<63x32xf32>
    %57 = vector.shape_cast %54 : vector<63x32xf32> to vector<1x63x32xf32>
    tpu.vector_store %arg3[%c0_48, %c0_49, %c0_50], %57 {strides = array<i32>} : memref<1x63x32xf32, #tpu.memory_space<vmem>>, vector<1x63x32xf32>,
    return
  }
  func.func @transform_0(%arg0: i32) -> (i32, i32, i32) {
    %c0_i32 = arith.constant 0 : i32
    %c0_i32_0 = arith.constant 0 : i32
    %c0_i32_1 = arith.constant 0 : i32
    return %arg0, %c0_i32, %c0_i32_0 : i32, i32, i32
  }
  func.func @transform_1(%arg0: i32) -> (i32, i32, i32) {
    %c0_i32 = arith.constant 0 : i32
    %c0_i32_0 = arith.constant 0 : i32
    %c0_i32_1 = arith.constant 0 : i32
    %c0_i32_2 = arith.constant 0 : i32
    return %c0_i32, %c0_i32_0, %c0_i32_1 : i32, i32, i32
  }
  func.func @transform_2(%arg0: i32) -> (i32, i32, i32) {
    %c0_i32 = arith.constant 0 : i32
    %c0_i32_0 = arith.constant 0 : i32
    %c0_i32_1 = arith.constant 0 : i32
    return %arg0, %c0_i32, %c0_i32_0 : i32, i32, i32
  }
}

module attributes {stable_mosaic.version = 11 : i64} {
  func.func @_maxpool_kernel(%arg0: i32, %arg1: memref<1x5x5x32xf32, #tpu.memory_space<vmem>>, %arg2: memref<1x5x4x32xf32, #tpu.memory_space<vmem>>, %arg3: memref<1x4x5x32xf32, #tpu.memory_space<vmem>>, %arg4: memref<1x4x4x32xf32, #tpu.memory_space<vmem>>, %arg5: memref<1x4x4x32xf32, #tpu.memory_space<vmem>>) attributes {dimension_semantics = [#tpu.dimension_semantics<parallel>], iteration_bounds = array<i64: 4>, scalar_prefetch = 0 : i64, scratch_operands = 0 : i64, tpu.core_type = #tpu.core_type<tc>, window_params = [{transform_indices = @transform_0, window_bounds = array<i64: 1, 5, 5, 32>}, {transform_indices = @transform_1, window_bounds = array<i64: 1, 5, 4, 32>}, {transform_indices = @transform_2, window_bounds = array<i64: 1, 4, 5, 32>}, {transform_indices = @transform_3, window_bounds = array<i64: 1, 4, 4, 32>}, {transform_indices = @transform_4, window_bounds = array<i64: 1, 4, 4, 32>}]} {
    %c0 = arith.constant 0 : index
    %c0_0 = arith.constant 0 : index
    %c0_1 = arith.constant 0 : index
    %c0_2 = arith.constant 0 : index
    %0 = vector.load %arg1[%c0, %c0_0, %c0_1, %c0_2] : memref<1x5x5x32xf32, #tpu.memory_space<vmem>>, vector<1x4x4x32xf32>
    %c0_3 = arith.constant 0 : index
    %c0_4 = arith.constant 0 : index
    %c1 = arith.constant 1 : index
    %c0_5 = arith.constant 0 : index
    %1 = vector.load %arg1[%c0_3, %c0_4, %c1, %c0_5] : memref<1x5x5x32xf32, #tpu.memory_space<vmem>>, vector<1x4x4x32xf32>
    %2 = arith.maximumf %0, %1 : vector<1x4x4x32xf32>
    %c0_6 = arith.constant 0 : index
    %c1_7 = arith.constant 1 : index
    %c0_8 = arith.constant 0 : index
    %c0_9 = arith.constant 0 : index
    %3 = vector.load %arg1[%c0_6, %c1_7, %c0_8, %c0_9] : memref<1x5x5x32xf32, #tpu.memory_space<vmem>>, vector<1x4x4x32xf32>
    %4 = arith.maximumf %2, %3 : vector<1x4x4x32xf32>
    %c0_10 = arith.constant 0 : index
    %c1_11 = arith.constant 1 : index
    %c1_12 = arith.constant 1 : index
    %c0_13 = arith.constant 0 : index
    %5 = vector.load %arg1[%c0_10, %c1_11, %c1_12, %c0_13] : memref<1x5x5x32xf32, #tpu.memory_space<vmem>>, vector<1x4x4x32xf32>
    %6 = arith.maximumf %4, %5 : vector<1x4x4x32xf32>
    %c0_14 = arith.constant 0 : index
    %c0_15 = arith.constant 0 : index
    %c0_16 = arith.constant 0 : index
    %c0_17 = arith.constant 0 : index
    %7 = vector.load %arg2[%c0_14, %c0_15, %c0_16, %c0_17] : memref<1x5x4x32xf32, #tpu.memory_space<vmem>>, vector<1x4x4x32xf32>
    %8 = arith.maximumf %6, %7 : vector<1x4x4x32xf32>
    %c0_18 = arith.constant 0 : index
    %c1_19 = arith.constant 1 : index
    %c0_20 = arith.constant 0 : index
    %c0_21 = arith.constant 0 : index
    %9 = vector.load %arg2[%c0_18, %c1_19, %c0_20, %c0_21] : memref<1x5x4x32xf32, #tpu.memory_space<vmem>>, vector<1x4x4x32xf32>
    %10 = arith.maximumf %8, %9 : vector<1x4x4x32xf32>
    %c0_22 = arith.constant 0 : index
    %c0_23 = arith.constant 0 : index
    %c0_24 = arith.constant 0 : index
    %c0_25 = arith.constant 0 : index
    %11 = vector.load %arg3[%c0_22, %c0_23, %c0_24, %c0_25] : memref<1x4x5x32xf32, #tpu.memory_space<vmem>>, vector<1x4x4x32xf32>
    %12 = arith.maximumf %10, %11 : vector<1x4x4x32xf32>
    %c0_26 = arith.constant 0 : index
    %c0_27 = arith.constant 0 : index
    %c1_28 = arith.constant 1 : index
    %c0_29 = arith.constant 0 : index
    %13 = vector.load %arg3[%c0_26, %c0_27, %c1_28, %c0_29] : memref<1x4x5x32xf32, #tpu.memory_space<vmem>>, vector<1x4x4x32xf32>
    %14 = arith.maximumf %12, %13 : vector<1x4x4x32xf32>
    %c0_30 = arith.constant 0 : index
    %c0_31 = arith.constant 0 : index
    %c0_32 = arith.constant 0 : index
    %c0_33 = arith.constant 0 : index
    %15 = vector.load %arg4[%c0_30, %c0_31, %c0_32, %c0_33] : memref<1x4x4x32xf32, #tpu.memory_space<vmem>>, vector<1x4x4x32xf32>
    %16 = arith.maximumf %14, %15 : vector<1x4x4x32xf32>
    %c0_34 = arith.constant 0 : index
    %c0_35 = arith.constant 0 : index
    %c0_36 = arith.constant 0 : index
    %c0_37 = arith.constant 0 : index
    %17 = vector.load %arg5[%c0_34, %c0_35, %c0_36, %c0_37] : memref<1x4x4x32xf32, #tpu.memory_space<vmem>>, vector<1x4x4x32xf32>
    tpu.vector_store %arg5[%c0_34, %c0_35, %c0_36, %c0_37], %16 {strides = array<i32>} : memref<1x4x4x32xf32, #tpu.memory_space<vmem>>, vector<1x4x4x32xf32>,
    return
  }
  func.func @transform_0(%arg0: i32) -> (i32, i32, i32, i32) {
    %c0_i32 = arith.constant 0 : i32
    %c0_i32_0 = arith.constant 0 : i32
    %c0_i32_1 = arith.constant 0 : i32
    %c0_i32_2 = arith.constant 0 : i32
    return %arg0, %c0_i32, %c0_i32_0, %c0_i32_1 : i32, i32, i32, i32
  }
  func.func @transform_1(%arg0: i32) -> (i32, i32, i32, i32) {
    %c0_i32 = arith.constant 0 : i32
    %c0_i32_0 = arith.constant 0 : i32
    %c0_i32_1 = arith.constant 0 : i32
    %c0_i32_2 = arith.constant 0 : i32
    return %arg0, %c0_i32, %c0_i32_0, %c0_i32_1 : i32, i32, i32, i32
  }
  func.func @transform_2(%arg0: i32) -> (i32, i32, i32, i32) {
    %c0_i32 = arith.constant 0 : i32
    %c0_i32_0 = arith.constant 0 : i32
    %c0_i32_1 = arith.constant 0 : i32
    %c0_i32_2 = arith.constant 0 : i32
    return %arg0, %c0_i32, %c0_i32_0, %c0_i32_1 : i32, i32, i32, i32
  }
  func.func @transform_3(%arg0: i32) -> (i32, i32, i32, i32) {
    %c0_i32 = arith.constant 0 : i32
    %c0_i32_0 = arith.constant 0 : i32
    %c0_i32_1 = arith.constant 0 : i32
    %c0_i32_2 = arith.constant 0 : i32
    return %arg0, %c0_i32, %c0_i32_0, %c0_i32_1 : i32, i32, i32, i32
  }
  func.func @transform_4(%arg0: i32) -> (i32, i32, i32, i32) {
    %c0_i32 = arith.constant 0 : i32
    %c0_i32_0 = arith.constant 0 : i32
    %c0_i32_1 = arith.constant 0 : i32
    %c0_i32_2 = arith.constant 0 : i32
    return %arg0, %c0_i32, %c0_i32_0, %c0_i32_1 : i32, i32, i32, i32
  }
}

module attributes {stable_mosaic.version = 11 : i64} {
  func.func @_conv_taps_kernel(%arg0: i32, %arg1: memref<1x38x32xbf16, #tpu.memory_space<vmem>>, %arg2: memref<9x32x96xbf16, #tpu.memory_space<vmem>>, %arg3: memref<1x24x96xbf16, #tpu.memory_space<vmem>>) attributes {dimension_semantics = [#tpu.dimension_semantics<parallel>], iteration_bounds = array<i64: 4>, scalar_prefetch = 0 : i64, scratch_operands = 0 : i64, tpu.core_type = #tpu.core_type<tc>, window_params = [{transform_indices = @transform_0, window_bounds = array<i64: 1, 38, 32>}, {pipeline_mode = #tpu.pipeline_mode<synchronous>, transform_indices = @transform_1, window_bounds = array<i64: 9, 32, 96>}, {transform_indices = @transform_2, window_bounds = array<i64: 1, 24, 96>}]} {
    %cst = arith.constant 0.000000e+00 : f32
    %0 = vector.broadcast %cst : f32 to vector<24x96xf32>
    %c0 = arith.constant 0 : index
    %c0_0 = arith.constant 0 : index
    %c0_1 = arith.constant 0 : index
    %1 = vector.load %arg1[%c0, %c0_0, %c0_1] : memref<1x38x32xbf16, #tpu.memory_space<vmem>>, vector<1x24x32xbf16>
    %2 = vector.shape_cast %1 : vector<1x24x32xbf16> to vector<24x32xbf16>
    %c0_2 = arith.constant 0 : index
    %c0_3 = arith.constant 0 : index
    %c0_4 = arith.constant 0 : index
    %3 = vector.load %arg2[%c0_2, %c0_3, %c0_4] : memref<9x32x96xbf16, #tpu.memory_space<vmem>>, vector<1x32x96xbf16>
    %4 = vector.shape_cast %3 : vector<1x32x96xbf16> to vector<32x96xbf16>
    %cst_5 = arith.constant dense<0.000000e+00> : vector<24x96xf32>
    %5 = tpu.matmul %2, %4, %cst_5 {dimension_numbers = #tpu.dot_dimension_numbers<[1], [0], [0], [1], [0, 0, 1, 1], [], []>} : vector<24x32xbf16>, vector<32x96xbf16>, vector<24x96xf32> -> vector<24x96xf32>
    %6 = arith.addf %0, %5 : vector<24x96xf32>
    %c0_6 = arith.constant 0 : index
    %c1 = arith.constant 1 : index
    %c0_7 = arith.constant 0 : index
    %7 = vector.load %arg1[%c0_6, %c1, %c0_7] : memref<1x38x32xbf16, #tpu.memory_space<vmem>>, vector<1x24x32xbf16>
    %8 = vector.shape_cast %7 : vector<1x24x32xbf16> to vector<24x32xbf16>
    %c1_8 = arith.constant 1 : index
    %c0_9 = arith.constant 0 : index
    %c0_10 = arith.constant 0 : index
    %9 = vector.load %arg2[%c1_8, %c0_9, %c0_10] : memref<9x32x96xbf16, #tpu.memory_space<vmem>>, vector<1x32x96xbf16>
    %10 = vector.shape_cast %9 : vector<1x32x96xbf16> to vector<32x96xbf16>
    %cst_11 = arith.constant dense<0.000000e+00> : vector<24x96xf32>
    %11 = tpu.matmul %8, %10, %cst_11 {dimension_numbers = #tpu.dot_dimension_numbers<[1], [0], [0], [1], [0, 0, 1, 1], [], []>} : vector<24x32xbf16>, vector<32x96xbf16>, vector<24x96xf32> -> vector<24x96xf32>
    %12 = arith.addf %6, %11 : vector<24x96xf32>
    %c0_12 = arith.constant 0 : index
    %c2 = arith.constant 2 : index
    %c0_13 = arith.constant 0 : index
    %13 = vector.load %arg1[%c0_12, %c2, %c0_13] : memref<1x38x32xbf16, #tpu.memory_space<vmem>>, vector<1x24x32xbf16>
    %14 = vector.shape_cast %13 : vector<1x24x32xbf16> to vector<24x32xbf16>
    %c2_14 = arith.constant 2 : index
    %c0_15 = arith.constant 0 : index
    %c0_16 = arith.constant 0 : index
    %15 = vector.load %arg2[%c2_14, %c0_15, %c0_16] : memref<9x32x96xbf16, #tpu.memory_space<vmem>>, vector<1x32x96xbf16>
    %16 = vector.shape_cast %15 : vector<1x32x96xbf16> to vector<32x96xbf16>
    %cst_17 = arith.constant dense<0.000000e+00> : vector<24x96xf32>
    %17 = tpu.matmul %14, %16, %cst_17 {dimension_numbers = #tpu.dot_dimension_numbers<[1], [0], [0], [1], [0, 0, 1, 1], [], []>} : vector<24x32xbf16>, vector<32x96xbf16>, vector<24x96xf32> -> vector<24x96xf32>
    %18 = arith.addf %12, %17 : vector<24x96xf32>
    %c0_18 = arith.constant 0 : index
    %c6 = arith.constant 6 : index
    %c0_19 = arith.constant 0 : index
    %19 = vector.load %arg1[%c0_18, %c6, %c0_19] : memref<1x38x32xbf16, #tpu.memory_space<vmem>>, vector<1x24x32xbf16>
    %20 = vector.shape_cast %19 : vector<1x24x32xbf16> to vector<24x32xbf16>
    %c3 = arith.constant 3 : index
    %c0_20 = arith.constant 0 : index
    %c0_21 = arith.constant 0 : index
    %21 = vector.load %arg2[%c3, %c0_20, %c0_21] : memref<9x32x96xbf16, #tpu.memory_space<vmem>>, vector<1x32x96xbf16>
    %22 = vector.shape_cast %21 : vector<1x32x96xbf16> to vector<32x96xbf16>
    %cst_22 = arith.constant dense<0.000000e+00> : vector<24x96xf32>
    %23 = tpu.matmul %20, %22, %cst_22 {dimension_numbers = #tpu.dot_dimension_numbers<[1], [0], [0], [1], [0, 0, 1, 1], [], []>} : vector<24x32xbf16>, vector<32x96xbf16>, vector<24x96xf32> -> vector<24x96xf32>
    %24 = arith.addf %18, %23 : vector<24x96xf32>
    %c0_23 = arith.constant 0 : index
    %c7 = arith.constant 7 : index
    %c0_24 = arith.constant 0 : index
    %25 = vector.load %arg1[%c0_23, %c7, %c0_24] : memref<1x38x32xbf16, #tpu.memory_space<vmem>>, vector<1x24x32xbf16>
    %26 = vector.shape_cast %25 : vector<1x24x32xbf16> to vector<24x32xbf16>
    %c4 = arith.constant 4 : index
    %c0_25 = arith.constant 0 : index
    %c0_26 = arith.constant 0 : index
    %27 = vector.load %arg2[%c4, %c0_25, %c0_26] : memref<9x32x96xbf16, #tpu.memory_space<vmem>>, vector<1x32x96xbf16>
    %28 = vector.shape_cast %27 : vector<1x32x96xbf16> to vector<32x96xbf16>
    %cst_27 = arith.constant dense<0.000000e+00> : vector<24x96xf32>
    %29 = tpu.matmul %26, %28, %cst_27 {dimension_numbers = #tpu.dot_dimension_numbers<[1], [0], [0], [1], [0, 0, 1, 1], [], []>} : vector<24x32xbf16>, vector<32x96xbf16>, vector<24x96xf32> -> vector<24x96xf32>
    %30 = arith.addf %24, %29 : vector<24x96xf32>
    %c0_28 = arith.constant 0 : index
    %c8 = arith.constant 8 : index
    %c0_29 = arith.constant 0 : index
    %31 = vector.load %arg1[%c0_28, %c8, %c0_29] : memref<1x38x32xbf16, #tpu.memory_space<vmem>>, vector<1x24x32xbf16>
    %32 = vector.shape_cast %31 : vector<1x24x32xbf16> to vector<24x32xbf16>
    %c5 = arith.constant 5 : index
    %c0_30 = arith.constant 0 : index
    %c0_31 = arith.constant 0 : index
    %33 = vector.load %arg2[%c5, %c0_30, %c0_31] : memref<9x32x96xbf16, #tpu.memory_space<vmem>>, vector<1x32x96xbf16>
    %34 = vector.shape_cast %33 : vector<1x32x96xbf16> to vector<32x96xbf16>
    %cst_32 = arith.constant dense<0.000000e+00> : vector<24x96xf32>
    %35 = tpu.matmul %32, %34, %cst_32 {dimension_numbers = #tpu.dot_dimension_numbers<[1], [0], [0], [1], [0, 0, 1, 1], [], []>} : vector<24x32xbf16>, vector<32x96xbf16>, vector<24x96xf32> -> vector<24x96xf32>
    %36 = arith.addf %30, %35 : vector<24x96xf32>
    %c0_33 = arith.constant 0 : index
    %c12 = arith.constant 12 : index
    %c0_34 = arith.constant 0 : index
    %37 = vector.load %arg1[%c0_33, %c12, %c0_34] : memref<1x38x32xbf16, #tpu.memory_space<vmem>>, vector<1x24x32xbf16>
    %38 = vector.shape_cast %37 : vector<1x24x32xbf16> to vector<24x32xbf16>
    %c6_35 = arith.constant 6 : index
    %c0_36 = arith.constant 0 : index
    %c0_37 = arith.constant 0 : index
    %39 = vector.load %arg2[%c6_35, %c0_36, %c0_37] : memref<9x32x96xbf16, #tpu.memory_space<vmem>>, vector<1x32x96xbf16>
    %40 = vector.shape_cast %39 : vector<1x32x96xbf16> to vector<32x96xbf16>
    %cst_38 = arith.constant dense<0.000000e+00> : vector<24x96xf32>
    %41 = tpu.matmul %38, %40, %cst_38 {dimension_numbers = #tpu.dot_dimension_numbers<[1], [0], [0], [1], [0, 0, 1, 1], [], []>} : vector<24x32xbf16>, vector<32x96xbf16>, vector<24x96xf32> -> vector<24x96xf32>
    %42 = arith.addf %36, %41 : vector<24x96xf32>
    %c0_39 = arith.constant 0 : index
    %c13 = arith.constant 13 : index
    %c0_40 = arith.constant 0 : index
    %43 = vector.load %arg1[%c0_39, %c13, %c0_40] : memref<1x38x32xbf16, #tpu.memory_space<vmem>>, vector<1x24x32xbf16>
    %44 = vector.shape_cast %43 : vector<1x24x32xbf16> to vector<24x32xbf16>
    %c7_41 = arith.constant 7 : index
    %c0_42 = arith.constant 0 : index
    %c0_43 = arith.constant 0 : index
    %45 = vector.load %arg2[%c7_41, %c0_42, %c0_43] : memref<9x32x96xbf16, #tpu.memory_space<vmem>>, vector<1x32x96xbf16>
    %46 = vector.shape_cast %45 : vector<1x32x96xbf16> to vector<32x96xbf16>
    %cst_44 = arith.constant dense<0.000000e+00> : vector<24x96xf32>
    %47 = tpu.matmul %44, %46, %cst_44 {dimension_numbers = #tpu.dot_dimension_numbers<[1], [0], [0], [1], [0, 0, 1, 1], [], []>} : vector<24x32xbf16>, vector<32x96xbf16>, vector<24x96xf32> -> vector<24x96xf32>
    %48 = arith.addf %42, %47 : vector<24x96xf32>
    %c0_45 = arith.constant 0 : index
    %c14 = arith.constant 14 : index
    %c0_46 = arith.constant 0 : index
    %49 = vector.load %arg1[%c0_45, %c14, %c0_46] : memref<1x38x32xbf16, #tpu.memory_space<vmem>>, vector<1x24x32xbf16>
    %50 = vector.shape_cast %49 : vector<1x24x32xbf16> to vector<24x32xbf16>
    %c8_47 = arith.constant 8 : index
    %c0_48 = arith.constant 0 : index
    %c0_49 = arith.constant 0 : index
    %51 = vector.load %arg2[%c8_47, %c0_48, %c0_49] : memref<9x32x96xbf16, #tpu.memory_space<vmem>>, vector<1x32x96xbf16>
    %52 = vector.shape_cast %51 : vector<1x32x96xbf16> to vector<32x96xbf16>
    %cst_50 = arith.constant dense<0.000000e+00> : vector<24x96xf32>
    %53 = tpu.matmul %50, %52, %cst_50 {dimension_numbers = #tpu.dot_dimension_numbers<[1], [0], [0], [1], [0, 0, 1, 1], [], []>} : vector<24x32xbf16>, vector<32x96xbf16>, vector<24x96xf32> -> vector<24x96xf32>
    %54 = arith.addf %48, %53 : vector<24x96xf32>
    %55 = arith.truncf %54 : vector<24x96xf32> to vector<24x96xbf16>
    %c0_51 = arith.constant 0 : index
    %c0_52 = arith.constant 0 : index
    %c0_53 = arith.constant 0 : index
    %56 = vector.load %arg3[%c0_51, %c0_52, %c0_53] : memref<1x24x96xbf16, #tpu.memory_space<vmem>>, vector<1x24x96xbf16>
    %57 = vector.shape_cast %56 : vector<1x24x96xbf16> to vector<24x96xbf16>
    %58 = vector.shape_cast %55 : vector<24x96xbf16> to vector<1x24x96xbf16>
    tpu.vector_store %arg3[%c0_51, %c0_52, %c0_53], %58 {strides = array<i32>} : memref<1x24x96xbf16, #tpu.memory_space<vmem>>, vector<1x24x96xbf16>,
    return
  }
  func.func @transform_0(%arg0: i32) -> (i32, i32, i32) {
    %c0_i32 = arith.constant 0 : i32
    %c0_i32_0 = arith.constant 0 : i32
    %c0_i32_1 = arith.constant 0 : i32
    return %arg0, %c0_i32, %c0_i32_0 : i32, i32, i32
  }
  func.func @transform_1(%arg0: i32) -> (i32, i32, i32) {
    %c0_i32 = arith.constant 0 : i32
    %c0_i32_0 = arith.constant 0 : i32
    %c0_i32_1 = arith.constant 0 : i32
    %c0_i32_2 = arith.constant 0 : i32
    return %c0_i32, %c0_i32_0, %c0_i32_1 : i32, i32, i32
  }
  func.func @transform_2(%arg0: i32) -> (i32, i32, i32) {
    %c0_i32 = arith.constant 0 : i32
    %c0_i32_0 = arith.constant 0 : i32
    %c0_i32_1 = arith.constant 0 : i32
    return %arg0, %c0_i32, %c0_i32_0 : i32, i32, i32
  }
}

module attributes {stable_mosaic.version = 11 : i64} {
  func.func @_attn_norm_kernel(%arg0: memref<16x4x32xbf16, #tpu.memory_space<vmem>>, %arg1: memref<16x4x32xbf16, #tpu.memory_space<vmem>>, %arg2: memref<16x4x32xbf16, #tpu.memory_space<vmem>>, %arg3: memref<4x4xf32, #tpu.memory_space<vmem>>, %arg4: memref<1x1x32xf32, #tpu.memory_space<vmem>>, %arg5: memref<1x1x32xf32, #tpu.memory_space<vmem>>, %arg6: memref<16x4x32xf32, #tpu.memory_space<vmem>>) attributes {dimension_semantics = [], scalar_prefetch = 0 : i64, scratch_operands = 0 : i64, tpu.core_type = #tpu.core_type<tc>} {
    %c0 = arith.constant 0 : index
    %c0_0 = arith.constant 0 : index
    %c0_1 = arith.constant 0 : index
    %0 = vector.load %arg0[%c0, %c0_0, %c0_1] : memref<16x4x32xbf16, #tpu.memory_space<vmem>>, vector<16x4x32xbf16>
    %c0_2 = arith.constant 0 : index
    %c0_3 = arith.constant 0 : index
    %c0_4 = arith.constant 0 : index
    %1 = vector.load %arg1[%c0_2, %c0_3, %c0_4] : memref<16x4x32xbf16, #tpu.memory_space<vmem>>, vector<16x4x32xbf16>
    %c0_5 = arith.constant 0 : index
    %c0_6 = arith.constant 0 : index
    %c0_7 = arith.constant 0 : index
    %2 = vector.load %arg2[%c0_5, %c0_6, %c0_7] : memref<16x4x32xbf16, #tpu.memory_space<vmem>>, vector<16x4x32xbf16>
    "tpu.trace_start"() <{level = 10 : i32, message = "snc,smc->snm"}> : () -> ()
    %cst = arith.constant dense<0.000000e+00> : vector<16x4x4xf32>
    %3 = tpu.matmul %0, %1, %cst {dimension_numbers = #tpu.dot_dimension_numbers<[2], [2], [1], [1], [0, 0, 0, 1, 1, 1], [0], [0]>} : vector<16x4x32xbf16>, vector<16x4x32xbf16>, vector<16x4x4xf32> -> vector<16x4x4xf32>
    "tpu.trace_stop"() : () -> ()
    %cst_8 = arith.constant 0.176776692 : f32
    %4 = vector.broadcast %cst_8 : f32 to vector<16x4x4xf32>
    %5 = arith.mulf %3, %4 : vector<16x4x4xf32>
    %c0_9 = arith.constant 0 : index
    %c0_10 = arith.constant 0 : index
    %6 = vector.load %arg3[%c0_9, %c0_10] : memref<4x4xf32, #tpu.memory_space<vmem>>, vector<4x4xf32>
    %7 = vector.shape_cast %6 : vector<4x4xf32> to vector<1x4x4xf32>
    %8 = vector.broadcast %7 : vector<1x4x4xf32> to vector<16x4x4xf32>
    %9 = arith.addf %5, %8 : vector<16x4x4xf32>
    %cst_11 = arith.constant dense<0xFF800000> : vector<16x4xf32>
    %10 = vector.multi_reduction <maximumf>, %9, %cst_11 [2] : vector<16x4x4xf32> to vector<16x4xf32>
    %11 = vector.shape_cast %10 : vector<16x4xf32> to vector<16x4x1xf32>
    %12 = vector.broadcast %11 : vector<16x4x1xf32> to vector<16x4x4xf32>
    %13 = arith.subf %9, %12 : vector<16x4x4xf32>
    %14 = math.exp %13 : vector<16x4x4xf32>
    %cst_12 = arith.constant dense<0.000000e+00> : vector<16x4xf32>
    %15 = vector.multi_reduction <add>, %14, %cst_12 [2] : vector<16x4x4xf32> to vector<16x4xf32>
    %16 = vector.shape_cast %15 : vector<16x4xf32> to vector<16x4x1xf32>
    %17 = tpu.reciprocal %16 {approx = true} : vector<16x4x1xf32> -> vector<16x4x1xf32>
    %18 = vector.broadcast %17 : vector<16x4x1xf32> to vector<16x4x4xf32>
    %19 = arith.mulf %14, %18 : vector<16x4x4xf32>
    %20 = arith.truncf %19 : vector<16x4x4xf32> to vector<16x4x4xbf16>
    "tpu.trace_start"() <{level = 10 : i32, message = "snm,smc->snc"}> : () -> ()
    %cst_13 = arith.constant dense<0.000000e+00> : vector<16x4x32xf32>
    %21 = tpu.matmul %20, %2, %cst_13 {dimension_numbers = #tpu.dot_dimension_numbers<[2], [1], [1], [2], [0, 0, 0, 1, 1, 2], [0], [0]>} : vector<16x4x4xbf16>, vector<16x4x32xbf16>, vector<16x4x32xf32> -> vector<16x4x32xf32>
    "tpu.trace_stop"() : () -> ()
    %cst_14 = arith.constant dense<0.000000e+00> : vector<16x4xf32>
    %22 = vector.multi_reduction <add>, %21, %cst_14 [2] : vector<16x4x32xf32> to vector<16x4xf32>
    %23 = vector.shape_cast %22 : vector<16x4xf32> to vector<16x4x1xf32>
    %cst_15 = arith.constant dense<0.000000e+00> : vector<4x1xf32>
    %24 = vector.multi_reduction <add>, %23, %cst_15 [0] : vector<16x4x1xf32> to vector<4x1xf32>
    %25 = vector.shape_cast %24 : vector<4x1xf32> to vector<1x4x1xf32>
    %cst_16 = arith.constant 5.120000e+02 : f32
    %26 = vector.broadcast %cst_16 : f32 to vector<1x4x1xf32>
    %27 = arith.divf %25, %26 : vector<1x4x1xf32>
    %28 = vector.broadcast %27 : vector<1x4x1xf32> to vector<16x4x32xf32>
    %29 = arith.subf %21, %28 : vector<16x4x32xf32>
    %30 = arith.mulf %29, %29 : vector<16x4x32xf32>
    %cst_17 = arith.constant dense<0.000000e+00> : vector<16x4xf32>
    %31 = vector.multi_reduction <add>, %30, %cst_17 [2] : vector<16x4x32xf32> to vector<16x4xf32>
    %32 = vector.shape_cast %31 : vector<16x4xf32> to vector<16x4x1xf32>
    %cst_18 = arith.constant dense<0.000000e+00> : vector<4x1xf32>
    %33 = vector.multi_reduction <add>, %32, %cst_18 [0] : vector<16x4x1xf32> to vector<4x1xf32>
    %34 = vector.shape_cast %33 : vector<4x1xf32> to vector<1x4x1xf32>
    %cst_19 = arith.constant 5.120000e+02 : f32
    %35 = vector.broadcast %cst_19 : f32 to vector<1x4x1xf32>
    %36 = arith.divf %34, %35 : vector<1x4x1xf32>
    %cst_20 = arith.constant 9.99999974E-6 : f32
    %37 = vector.broadcast %cst_20 : f32 to vector<1x4x1xf32>
    %38 = arith.addf %36, %37 : vector<1x4x1xf32>
    %39 = math.rsqrt %38 : vector<1x4x1xf32>
    %40 = vector.broadcast %39 : vector<1x4x1xf32> to vector<16x4x32xf32>
    %41 = arith.mulf %29, %40 : vector<16x4x32xf32>
    %c0_21 = arith.constant 0 : index
    %c0_22 = arith.constant 0 : index
    %c0_23 = arith.constant 0 : index
    %42 = vector.load %arg4[%c0_21, %c0_22, %c0_23] : memref<1x1x32xf32, #tpu.memory_space<vmem>>, vector<1x1x32xf32>
    %43 = vector.broadcast %42 : vector<1x1x32xf32> to vector<16x4x32xf32>
    %44 = arith.mulf %41, %43 : vector<16x4x32xf32>
    %c0_24 = arith.constant 0 : index
    %c0_25 = arith.constant 0 : index
    %c0_26 = arith.constant 0 : index
    %45 = vector.load %arg5[%c0_24, %c0_25, %c0_26] : memref<1x1x32xf32, #tpu.memory_space<vmem>>, vector<1x1x32xf32>
    %46 = vector.broadcast %45 : vector<1x1x32xf32> to vector<16x4x32xf32>
    %47 = arith.addf %44, %46 : vector<16x4x32xf32>
    %cst_27 = arith.constant 0.000000e+00 : f32
    %48 = vector.broadcast %cst_27 : f32 to vector<16x4x32xf32>
    %49 = arith.maximumf %47, %48 : vector<16x4x32xf32>
    %c0_28 = arith.constant 0 : index
    %c0_29 = arith.constant 0 : index
    %c0_30 = arith.constant 0 : index
    %50 = vector.load %arg6[%c0_28, %c0_29, %c0_30] : memref<16x4x32xf32, #tpu.memory_space<vmem>>, vector<16x4x32xf32>
    tpu.vector_store %arg6[%c0_28, %c0_29, %c0_30], %49 {strides = array<i32>} : memref<16x4x32xf32, #tpu.memory_space<vmem>>, vector<16x4x32xf32>,
    return
  }
}

module attributes {stable_mosaic.version = 11 : i64} {
  func.func @_conv_taps_kernel(%arg0: i32, %arg1: memref<1x38x32xbf16, #tpu.memory_space<vmem>>, %arg2: memref<9x32x32xbf16, #tpu.memory_space<vmem>>, %arg3: memref<1x24x32xf32, #tpu.memory_space<vmem>>) attributes {dimension_semantics = [#tpu.dimension_semantics<parallel>], iteration_bounds = array<i64: 4>, scalar_prefetch = 0 : i64, scratch_operands = 0 : i64, tpu.core_type = #tpu.core_type<tc>, window_params = [{transform_indices = @transform_0, window_bounds = array<i64: 1, 38, 32>}, {pipeline_mode = #tpu.pipeline_mode<synchronous>, transform_indices = @transform_1, window_bounds = array<i64: 9, 32, 32>}, {transform_indices = @transform_2, window_bounds = array<i64: 1, 24, 32>}]} {
    %cst = arith.constant 0.000000e+00 : f32
    %0 = vector.broadcast %cst : f32 to vector<24x32xf32>
    %c0 = arith.constant 0 : index
    %c0_0 = arith.constant 0 : index
    %c0_1 = arith.constant 0 : index
    %1 = vector.load %arg1[%c0, %c0_0, %c0_1] : memref<1x38x32xbf16, #tpu.memory_space<vmem>>, vector<1x24x32xbf16>
    %2 = vector.shape_cast %1 : vector<1x24x32xbf16> to vector<24x32xbf16>
    %c0_2 = arith.constant 0 : index
    %c0_3 = arith.constant 0 : index
    %c0_4 = arith.constant 0 : index
    %3 = vector.load %arg2[%c0_2, %c0_3, %c0_4] : memref<9x32x32xbf16, #tpu.memory_space<vmem>>, vector<1x32x32xbf16>
    %4 = vector.shape_cast %3 : vector<1x32x32xbf16> to vector<32x32xbf16>
    %cst_5 = arith.constant dense<0.000000e+00> : vector<24x32xf32>
    %5 = tpu.matmul %2, %4, %cst_5 {dimension_numbers = #tpu.dot_dimension_numbers<[1], [0], [0], [1], [0, 0, 1, 1], [], []>} : vector<24x32xbf16>, vector<32x32xbf16>, vector<24x32xf32> -> vector<24x32xf32>
    %6 = arith.addf %0, %5 : vector<24x32xf32>
    %c0_6 = arith.constant 0 : index
    %c1 = arith.constant 1 : index
    %c0_7 = arith.constant 0 : index
    %7 = vector.load %arg1[%c0_6, %c1, %c0_7] : memref<1x38x32xbf16, #tpu.memory_space<vmem>>, vector<1x24x32xbf16>
    %8 = vector.shape_cast %7 : vector<1x24x32xbf16> to vector<24x32xbf16>
    %c1_8 = arith.constant 1 : index
    %c0_9 = arith.constant 0 : index
    %c0_10 = arith.constant 0 : index
    %9 = vector.load %arg2[%c1_8, %c0_9, %c0_10] : memref<9x32x32xbf16, #tpu.memory_space<vmem>>, vector<1x32x32xbf16>
    %10 = vector.shape_cast %9 : vector<1x32x32xbf16> to vector<32x32xbf16>
    %cst_11 = arith.constant dense<0.000000e+00> : vector<24x32xf32>
    %11 = tpu.matmul %8, %10, %cst_11 {dimension_numbers = #tpu.dot_dimension_numbers<[1], [0], [0], [1], [0, 0, 1, 1], [], []>} : vector<24x32xbf16>, vector<32x32xbf16>, vector<24x32xf32> -> vector<24x32xf32>
    %12 = arith.addf %6, %11 : vector<24x32xf32>
    %c0_12 = arith.constant 0 : index
    %c2 = arith.constant 2 : index
    %c0_13 = arith.constant 0 : index
    %13 = vector.load %arg1[%c0_12, %c2, %c0_13] : memref<1x38x32xbf16, #tpu.memory_space<vmem>>, vector<1x24x32xbf16>
    %14 = vector.shape_cast %13 : vector<1x24x32xbf16> to vector<24x32xbf16>
    %c2_14 = arith.constant 2 : index
    %c0_15 = arith.constant 0 : index
    %c0_16 = arith.constant 0 : index
    %15 = vector.load %arg2[%c2_14, %c0_15, %c0_16] : memref<9x32x32xbf16, #tpu.memory_space<vmem>>, vector<1x32x32xbf16>
    %16 = vector.shape_cast %15 : vector<1x32x32xbf16> to vector<32x32xbf16>
    %cst_17 = arith.constant dense<0.000000e+00> : vector<24x32xf32>
    %17 = tpu.matmul %14, %16, %cst_17 {dimension_numbers = #tpu.dot_dimension_numbers<[1], [0], [0], [1], [0, 0, 1, 1], [], []>} : vector<24x32xbf16>, vector<32x32xbf16>, vector<24x32xf32> -> vector<24x32xf32>
    %18 = arith.addf %12, %17 : vector<24x32xf32>
    %c0_18 = arith.constant 0 : index
    %c6 = arith.constant 6 : index
    %c0_19 = arith.constant 0 : index
    %19 = vector.load %arg1[%c0_18, %c6, %c0_19] : memref<1x38x32xbf16, #tpu.memory_space<vmem>>, vector<1x24x32xbf16>
    %20 = vector.shape_cast %19 : vector<1x24x32xbf16> to vector<24x32xbf16>
    %c3 = arith.constant 3 : index
    %c0_20 = arith.constant 0 : index
    %c0_21 = arith.constant 0 : index
    %21 = vector.load %arg2[%c3, %c0_20, %c0_21] : memref<9x32x32xbf16, #tpu.memory_space<vmem>>, vector<1x32x32xbf16>
    %22 = vector.shape_cast %21 : vector<1x32x32xbf16> to vector<32x32xbf16>
    %cst_22 = arith.constant dense<0.000000e+00> : vector<24x32xf32>
    %23 = tpu.matmul %20, %22, %cst_22 {dimension_numbers = #tpu.dot_dimension_numbers<[1], [0], [0], [1], [0, 0, 1, 1], [], []>} : vector<24x32xbf16>, vector<32x32xbf16>, vector<24x32xf32> -> vector<24x32xf32>
    %24 = arith.addf %18, %23 : vector<24x32xf32>
    %c0_23 = arith.constant 0 : index
    %c7 = arith.constant 7 : index
    %c0_24 = arith.constant 0 : index
    %25 = vector.load %arg1[%c0_23, %c7, %c0_24] : memref<1x38x32xbf16, #tpu.memory_space<vmem>>, vector<1x24x32xbf16>
    %26 = vector.shape_cast %25 : vector<1x24x32xbf16> to vector<24x32xbf16>
    %c4 = arith.constant 4 : index
    %c0_25 = arith.constant 0 : index
    %c0_26 = arith.constant 0 : index
    %27 = vector.load %arg2[%c4, %c0_25, %c0_26] : memref<9x32x32xbf16, #tpu.memory_space<vmem>>, vector<1x32x32xbf16>
    %28 = vector.shape_cast %27 : vector<1x32x32xbf16> to vector<32x32xbf16>
    %cst_27 = arith.constant dense<0.000000e+00> : vector<24x32xf32>
    %29 = tpu.matmul %26, %28, %cst_27 {dimension_numbers = #tpu.dot_dimension_numbers<[1], [0], [0], [1], [0, 0, 1, 1], [], []>} : vector<24x32xbf16>, vector<32x32xbf16>, vector<24x32xf32> -> vector<24x32xf32>
    %30 = arith.addf %24, %29 : vector<24x32xf32>
    %c0_28 = arith.constant 0 : index
    %c8 = arith.constant 8 : index
    %c0_29 = arith.constant 0 : index
    %31 = vector.load %arg1[%c0_28, %c8, %c0_29] : memref<1x38x32xbf16, #tpu.memory_space<vmem>>, vector<1x24x32xbf16>
    %32 = vector.shape_cast %31 : vector<1x24x32xbf16> to vector<24x32xbf16>
    %c5 = arith.constant 5 : index
    %c0_30 = arith.constant 0 : index
    %c0_31 = arith.constant 0 : index
    %33 = vector.load %arg2[%c5, %c0_30, %c0_31] : memref<9x32x32xbf16, #tpu.memory_space<vmem>>, vector<1x32x32xbf16>
    %34 = vector.shape_cast %33 : vector<1x32x32xbf16> to vector<32x32xbf16>
    %cst_32 = arith.constant dense<0.000000e+00> : vector<24x32xf32>
    %35 = tpu.matmul %32, %34, %cst_32 {dimension_numbers = #tpu.dot_dimension_numbers<[1], [0], [0], [1], [0, 0, 1, 1], [], []>} : vector<24x32xbf16>, vector<32x32xbf16>, vector<24x32xf32> -> vector<24x32xf32>
    %36 = arith.addf %30, %35 : vector<24x32xf32>
    %c0_33 = arith.constant 0 : index
    %c12 = arith.constant 12 : index
    %c0_34 = arith.constant 0 : index
    %37 = vector.load %arg1[%c0_33, %c12, %c0_34] : memref<1x38x32xbf16, #tpu.memory_space<vmem>>, vector<1x24x32xbf16>
    %38 = vector.shape_cast %37 : vector<1x24x32xbf16> to vector<24x32xbf16>
    %c6_35 = arith.constant 6 : index
    %c0_36 = arith.constant 0 : index
    %c0_37 = arith.constant 0 : index
    %39 = vector.load %arg2[%c6_35, %c0_36, %c0_37] : memref<9x32x32xbf16, #tpu.memory_space<vmem>>, vector<1x32x32xbf16>
    %40 = vector.shape_cast %39 : vector<1x32x32xbf16> to vector<32x32xbf16>
    %cst_38 = arith.constant dense<0.000000e+00> : vector<24x32xf32>
    %41 = tpu.matmul %38, %40, %cst_38 {dimension_numbers = #tpu.dot_dimension_numbers<[1], [0], [0], [1], [0, 0, 1, 1], [], []>} : vector<24x32xbf16>, vector<32x32xbf16>, vector<24x32xf32> -> vector<24x32xf32>
    %42 = arith.addf %36, %41 : vector<24x32xf32>
    %c0_39 = arith.constant 0 : index
    %c13 = arith.constant 13 : index
    %c0_40 = arith.constant 0 : index
    %43 = vector.load %arg1[%c0_39, %c13, %c0_40] : memref<1x38x32xbf16, #tpu.memory_space<vmem>>, vector<1x24x32xbf16>
    %44 = vector.shape_cast %43 : vector<1x24x32xbf16> to vector<24x32xbf16>
    %c7_41 = arith.constant 7 : index
    %c0_42 = arith.constant 0 : index
    %c0_43 = arith.constant 0 : index
    %45 = vector.load %arg2[%c7_41, %c0_42, %c0_43] : memref<9x32x32xbf16, #tpu.memory_space<vmem>>, vector<1x32x32xbf16>
    %46 = vector.shape_cast %45 : vector<1x32x32xbf16> to vector<32x32xbf16>
    %cst_44 = arith.constant dense<0.000000e+00> : vector<24x32xf32>
    %47 = tpu.matmul %44, %46, %cst_44 {dimension_numbers = #tpu.dot_dimension_numbers<[1], [0], [0], [1], [0, 0, 1, 1], [], []>} : vector<24x32xbf16>, vector<32x32xbf16>, vector<24x32xf32> -> vector<24x32xf32>
    %48 = arith.addf %42, %47 : vector<24x32xf32>
    %c0_45 = arith.constant 0 : index
    %c14 = arith.constant 14 : index
    %c0_46 = arith.constant 0 : index
    %49 = vector.load %arg1[%c0_45, %c14, %c0_46] : memref<1x38x32xbf16, #tpu.memory_space<vmem>>, vector<1x24x32xbf16>
    %50 = vector.shape_cast %49 : vector<1x24x32xbf16> to vector<24x32xbf16>
    %c8_47 = arith.constant 8 : index
    %c0_48 = arith.constant 0 : index
    %c0_49 = arith.constant 0 : index
    %51 = vector.load %arg2[%c8_47, %c0_48, %c0_49] : memref<9x32x32xbf16, #tpu.memory_space<vmem>>, vector<1x32x32xbf16>
    %52 = vector.shape_cast %51 : vector<1x32x32xbf16> to vector<32x32xbf16>
    %cst_50 = arith.constant dense<0.000000e+00> : vector<24x32xf32>
    %53 = tpu.matmul %50, %52, %cst_50 {dimension_numbers = #tpu.dot_dimension_numbers<[1], [0], [0], [1], [0, 0, 1, 1], [], []>} : vector<24x32xbf16>, vector<32x32xbf16>, vector<24x32xf32> -> vector<24x32xf32>
    %54 = arith.addf %48, %53 : vector<24x32xf32>
    %c0_51 = arith.constant 0 : index
    %c0_52 = arith.constant 0 : index
    %c0_53 = arith.constant 0 : index
    %55 = vector.load %arg3[%c0_51, %c0_52, %c0_53] : memref<1x24x32xf32, #tpu.memory_space<vmem>>, vector<1x24x32xf32>
    %56 = vector.shape_cast %55 : vector<1x24x32xf32> to vector<24x32xf32>
    %57 = vector.shape_cast %54 : vector<24x32xf32> to vector<1x24x32xf32>
    tpu.vector_store %arg3[%c0_51, %c0_52, %c0_53], %57 {strides = array<i32>} : memref<1x24x32xf32, #tpu.memory_space<vmem>>, vector<1x24x32xf32>,
    return
  }
  func.func @transform_0(%arg0: i32) -> (i32, i32, i32) {
    %c0_i32 = arith.constant 0 : i32
    %c0_i32_0 = arith.constant 0 : i32
    %c0_i32_1 = arith.constant 0 : i32
    return %arg0, %c0_i32, %c0_i32_0 : i32, i32, i32
  }
  func.func @transform_1(%arg0: i32) -> (i32, i32, i32) {
    %c0_i32 = arith.constant 0 : i32
    %c0_i32_0 = arith.constant 0 : i32
    %c0_i32_1 = arith.constant 0 : i32
    %c0_i32_2 = arith.constant 0 : i32
    return %c0_i32, %c0_i32_0, %c0_i32_1 : i32, i32, i32
  }
  func.func @transform_2(%arg0: i32) -> (i32, i32, i32) {
    %c0_i32 = arith.constant 0 : i32
    %c0_i32_0 = arith.constant 0 : i32
    %c0_i32_1 = arith.constant 0 : i32
    return %arg0, %c0_i32, %c0_i32_0 : i32, i32, i32
  }
}

module attributes {stable_mosaic.version = 11 : i64} {
  func.func @_residual_gap_kernel(%arg0: i32, %arg1: memref<8x16x32xf32, #tpu.memory_space<vmem>>, %arg2: memref<8x16x32xf32, #tpu.memory_space<vmem>>, %arg3: memref<8x32xf32, #tpu.memory_space<vmem>>) attributes {dimension_semantics = [#tpu.dimension_semantics<parallel>], iteration_bounds = array<i64: 1>, scalar_prefetch = 0 : i64, scratch_operands = 0 : i64, tpu.core_type = #tpu.core_type<tc>, window_params = [{transform_indices = @transform_0, window_bounds = array<i64: 8, 16, 32>}, {transform_indices = @transform_1, window_bounds = array<i64: 8, 16, 32>}, {transform_indices = @transform_2, window_bounds = array<i64: 8, 32>}]} {
    %c0 = arith.constant 0 : index
    %c0_0 = arith.constant 0 : index
    %c0_1 = arith.constant 0 : index
    %0 = vector.load %arg1[%c0, %c0_0, %c0_1] : memref<8x16x32xf32, #tpu.memory_space<vmem>>, vector<8x16x32xf32>
    %c0_2 = arith.constant 0 : index
    %c0_3 = arith.constant 0 : index
    %c0_4 = arith.constant 0 : index
    %1 = vector.load %arg2[%c0_2, %c0_3, %c0_4] : memref<8x16x32xf32, #tpu.memory_space<vmem>>, vector<8x16x32xf32>
    %2 = arith.addf %0, %1 : vector<8x16x32xf32>
    %cst = arith.constant dense<0.000000e+00> : vector<8x32xf32>
    %3 = vector.multi_reduction <add>, %2, %cst [1] : vector<8x16x32xf32> to vector<8x32xf32>
    %cst_5 = arith.constant 1.600000e+01 : f32
    %4 = vector.broadcast %cst_5 : f32 to vector<8x32xf32>
    %5 = arith.divf %3, %4 : vector<8x32xf32>
    %c0_6 = arith.constant 0 : index
    %c0_7 = arith.constant 0 : index
    %6 = vector.load %arg3[%c0_6, %c0_7] : memref<8x32xf32, #tpu.memory_space<vmem>>, vector<8x32xf32>
    tpu.vector_store %arg3[%c0_6, %c0_7], %5 {strides = array<i32>} : memref<8x32xf32, #tpu.memory_space<vmem>>, vector<8x32xf32>,
    return
  }
  func.func @transform_0(%arg0: i32) -> (i32, i32, i32) {
    %c0_i32 = arith.constant 0 : i32
    %c0_i32_0 = arith.constant 0 : i32
    %c0_i32_1 = arith.constant 0 : i32
    return %arg0, %c0_i32, %c0_i32_0 : i32, i32, i32
  }
  func.func @transform_1(%arg0: i32) -> (i32, i32, i32) {
    %c0_i32 = arith.constant 0 : i32
    %c0_i32_0 = arith.constant 0 : i32
    %c0_i32_1 = arith.constant 0 : i32
    return %arg0, %c0_i32, %c0_i32_0 : i32, i32, i32
  }
  func.func @transform_2(%arg0: i32) -> (i32, i32) {
    %c0_i32 = arith.constant 0 : i32
    %c0_i32_0 = arith.constant 0 : i32
    return %arg0, %c0_i32 : i32, i32
  }
}

module attributes {stable_mosaic.version = 11 : i64} {
  func.func @_gap_fc_relu_kernel(%arg0: i32, %arg1: memref<8x32x64xf32, #tpu.memory_space<vmem>>, %arg2: memref<64x32xbf16, #tpu.memory_space<vmem>>, %arg3: memref<8x32xf32, #tpu.memory_space<vmem>>) attributes {dimension_semantics = [#tpu.dimension_semantics<parallel>], iteration_bounds = array<i64: 1>, scalar_prefetch = 0 : i64, scratch_operands = 0 : i64, tpu.core_type = #tpu.core_type<tc>, window_params = [{transform_indices = @transform_0, window_bounds = array<i64: 8, 32, 64>}, {pipeline_mode = #tpu.pipeline_mode<synchronous>, transform_indices = @transform_1, window_bounds = array<i64: 64, 32>}, {transform_indices = @transform_2, window_bounds = array<i64: 8, 32>}]} {
    %c0 = arith.constant 0 : index
    %c0_0 = arith.constant 0 : index
    %c0_1 = arith.constant 0 : index
    %0 = vector.load %arg1[%c0, %c0_0, %c0_1] : memref<8x32x64xf32, #tpu.memory_space<vmem>>, vector<8x32x64xf32>
    %cst = arith.constant dense<0.000000e+00> : vector<8x64xf32>
    %1 = vector.multi_reduction <add>, %0, %cst [1] : vector<8x32x64xf32> to vector<8x64xf32>
    %cst_2 = arith.constant 3.200000e+01 : f32
    %2 = vector.broadcast %cst_2 : f32 to vector<8x64xf32>
    %3 = arith.divf %1, %2 : vector<8x64xf32>
    %4 = arith.truncf %3 : vector<8x64xf32> to vector<8x64xbf16>
    %c0_3 = arith.constant 0 : index
    %c0_4 = arith.constant 0 : index
    %5 = vector.load %arg2[%c0_3, %c0_4] : memref<64x32xbf16, #tpu.memory_space<vmem>>, vector<64x32xbf16>
    %cst_5 = arith.constant dense<0.000000e+00> : vector<8x32xf32>
    %6 = tpu.matmul %4, %5, %cst_5 {dimension_numbers = #tpu.dot_dimension_numbers<[1], [0], [0], [1], [0, 0, 1, 1], [], []>} : vector<8x64xbf16>, vector<64x32xbf16>, vector<8x32xf32> -> vector<8x32xf32>
    %cst_6 = arith.constant 0.000000e+00 : f32
    %7 = vector.broadcast %cst_6 : f32 to vector<8x32xf32>
    %8 = arith.maximumf %6, %7 : vector<8x32xf32>
    %c0_7 = arith.constant 0 : index
    %c0_8 = arith.constant 0 : index
    %9 = vector.load %arg3[%c0_7, %c0_8] : memref<8x32xf32, #tpu.memory_space<vmem>>, vector<8x32xf32>
    tpu.vector_store %arg3[%c0_7, %c0_8], %8 {strides = array<i32>} : memref<8x32xf32, #tpu.memory_space<vmem>>, vector<8x32xf32>,
    return
  }
  func.func @transform_0(%arg0: i32) -> (i32, i32, i32) {
    %c0_i32 = arith.constant 0 : i32
    %c0_i32_0 = arith.constant 0 : i32
    %c0_i32_1 = arith.constant 0 : i32
    return %arg0, %c0_i32, %c0_i32_0 : i32, i32, i32
  }
  func.func @transform_1(%arg0: i32) -> (i32, i32) {
    %c0_i32 = arith.constant 0 : i32
    %c0_i32_0 = arith.constant 0 : i32
    %c0_i32_1 = arith.constant 0 : i32
    return %c0_i32, %c0_i32_0 : i32, i32
  }
  func.func @transform_2(%arg0: i32) -> (i32, i32) {
    %c0_i32 = arith.constant 0 : i32
    %c0_i32_0 = arith.constant 0 : i32
    return %arg0, %c0_i32 : i32, i32
  }
}

</mosaic_0001>

<bundles_post_ra>
// kernel: monkey_acar_qkv_forward.8
= control target key start
LH: loop header
LB: loop body
LE: loop exit
PB: predicated region body
PF: predicated region fallthrough
CT: control target
= control target key end

     0   :  { %s1400_s9 = smov 0   ;;  %s1402_s10 = smov 0   ;;  %s1500_s0 = inlined_call_operand.vmem [shape: bf16[512,128], index: 0, kind: input, shape index: {}]   ;;  %s1501_s1 = inlined_call_operand.vmem [shape: bf16[128,128], index: 1, kind: input, shape index: {}]   ;;  %s1502_s2 = inlined_call_operand.vmem [shape: bf16[512,128], index: 2, kind: output, shape index: {}]  }
   0x1   :  { %s1404_s11 = smov 0  }
   0x2 LB: > { %s31_s12 = sadd.s32 1, %s1379_s10  ;;  %p1035_p0 = scmp.ge.s32.totalorder %s1383_s11, 1  ;;  %s1383_s11 = sphi %s1404_s11, %s12_s11   ;;  %s1379_s10 = sphi %s1402_s10, %s1504_s10   ;;  %s1375_s9 = sphi %s1400_s9, %s1503_s9  }
   0x3   : > { %p33_p1 = scmp.ge.s32.totalorder %s31_s12, 2  ;;  %p155_p2 = scmp.lt.s32.totalorder %s1383_s11, 3 }
   0x5   : > { %s1506_s12 = smov (%p33_p1, %s31_s12), 0  ;;  %p156_p3 = pnand %p1035_p0, %p155_p2 }
   0x6   : > { %v1337_v0 = vld [vmem:[%s1501_s1] sm:$0xff] (!%p156_p3)   ;;  %s1036_s15 = sshll.u32 (!%p156_p3), %s1375_s9, 5  ;;  %v1338_v1 = vld [vmem:[%s1501_s1 + $0x8] sm:$0xff] (!%p156_p3)   ;;  %v1339_v2 = vld [vmem:[%s1501_s1 + $0x10] sm:$0xff] (!%p156_p3)  }
   0x7   : > { %159 = sbr.rel (%p156_p3) target bundleno = 283 (0x11b), region = 28  ;;  %p192_p4 = scmp.lt.s32.totalorder (!%p156_p3), %s1036_s15, 63  ;;  %1249 = vmatprep.subr.bf16.mxu0 (!%p156_p3), %v1337_v0  ;;  %1297 = vmatprep.subr.bf16.mxu1 (!%p156_p3), %v1337_v0  ;;  %v1340_v3 = vld [vmem:[%s1501_s1 + $0x18] sm:$0xff] (!%p156_p3)   ;;  %v1341_v6 = vld [vmem:[%s1501_s1 + $0x20] sm:$0xff] (!%p156_p3)   ;;  %v1342_v7 = vld [vmem:[%s1501_s1 + $0x28] sm:$0xff] (!%p156_p3)  }
   0x8   : > { %1250 = vmatpush3.bf16.msra.mxu0 (!%p156_p3), %v1337_v0  ;;  %1305 = vmatpush3.bf16.msra.mxu1 (!%p156_p3), %v1337_v0  ;;  %v1343_v8 = vld [vmem:[%s1501_s1 + $0x30] sm:$0xff] (!%p156_p3)   ;;  %v1344_v9 = vld [vmem:[%s1501_s1 + $0x38] sm:$0xff] (!%p156_p3)  }
   0x9   : > { %1251 = vmatprep.subr.bf16.mxu0 (!%p156_p3), %v1338_v1  ;;  %1298 = vmatprep.subr.bf16.mxu1 (!%p156_p3), %v1338_v1 }
   0xc   : > { %1252 = vmatpush3.bf16.msra.mxu0 (!%p156_p3), %v1338_v1  ;;  %1306 = vmatpush3.bf16.msra.mxu1 (!%p156_p3), %v1338_v1 }
   0xd   : > { %1253 = vmatprep.subr.bf16.mxu0 (!%p156_p3), %v1339_v2  ;;  %1299 = vmatprep.subr.bf16.mxu1 (!%p156_p3), %v1339_v2 }
   0xe   : > { %s1508_s15 = smov (!%p192_p4, %s1036_s15), 63 }
   0xf   : > { %s1037_s20 = sshll.u32 %s1508_s15, 2 }
  0x10   : > { %s1435_s23 = scalar_lea.vmem %s1500_s0, %s1037_s20  ;;  %1254 = vmatpush3.bf16.msra.mxu0 %v1339_v2  ;;  %1307 = vmatpush3.bf16.msra.mxu1 %v1339_v2  ;;  %s1473_s8 = scalar_lea.vmem %s1502_s2, %s1037_s20 }
  0x11   : > { %v1345_v4 = vld [vmem:[%s1435_s23] sm:$0xff]   ;;  %1255 = vmatprep.subr.bf16.mxu0 %v1340_v3  ;;  %1300 = vmatprep.subr.bf16.mxu1 %v1340_v3  ;;  %v1347_v10 = vld [vmem:[%s1435_s23 + $0x8] sm:$0xff]   ;;  %v1349_v12 = vld [vmem:[%s1435_s23 + $0x10] sm:$0xff]  }
  0x12   : > { %v1346_v5 = vld [vmem:[%s1435_s23 + $0x40] sm:$0xff]   ;;  %1265 = vmatprep.mubr.bf16.mxu0 %v1345_v4  ;;  %v1348_v11 = vld [vmem:[%s1435_s23 + $0x48] sm:$0xff]   ;;  %v1350_v13 = vld [vmem:[%s1435_s23 + $0x50] sm:$0xff]  }
  0x13   : > { %1281 = vmatprep.mubr.bf16.mxu1 %v1346_v5  ;;  %v1351_v14 = vld [vmem:[%s1435_s23 + $0x18] sm:$0xff]   ;;  %v1353_v16 = vld [vmem:[%s1435_s23 + $0x20] sm:$0xff]   ;;  %v1355_v18 = vld [vmem:[%s1435_s23 + $0x28] sm:$0xff]  }
  0x14   : > { %1256 = vmatpush3.bf16.msra.mxu0 %v1340_v3  ;;  %1308 = vmatpush3.bf16.msra.mxu1 %v1340_v3  ;;  %v1352_v15 = vld [vmem:[%s1435_s23 + $0x58] sm:$0xff]   ;;  %v1354_v17 = vld [vmem:[%s1435_s23 + $0x60] sm:$0xff]   ;;  %v1356_v19 = vld [vmem:[%s1435_s23 + $0x68] sm:$0xff]  }
  0x15   : > { %1257 = vmatprep.subr.bf16.mxu0 %v1341_v6  ;;  %1301 = vmatprep.subr.bf16.mxu1 %v1341_v6  ;;  %v1357_v20 = vld [vmem:[%s1435_s23 + $0x30] sm:$0xff]   ;;  %v1359_v22 = vld [vmem:[%s1435_s23 + $0x38] sm:$0xff]  }
  0x16   : > { %v1358_v21 = vld [vmem:[%s1435_s23 + $0x70] sm:$0xff]   ;;  %v1360_v23 = vld [vmem:[%s1435_s23 + $0x78] sm:$0xff]  }
  0x18   : > { %1258 = vmatpush3.bf16.msra.mxu0 %v1341_v6  ;;  %1309 = vmatpush3.bf16.msra.mxu1 %v1341_v6 }
  0x19   : > { %1259 = vmatprep.subr.bf16.mxu0 %v1342_v7  ;;  %1302 = vmatprep.subr.bf16.mxu1 %v1342_v7 }
  0x1c   : > { %1260 = vmatpush3.bf16.msra.mxu0 %v1342_v7  ;;  %1310 = vmatpush3.bf16.msra.mxu1 %v1342_v7 }
  0x1d   : > { %1261 = vmatprep.subr.bf16.mxu0 %v1343_v8  ;;  %1303 = vmatprep.subr.bf16.mxu1 %v1343_v8 }
  0x20   : > { %1262 = vmatpush3.bf16.msra.mxu0 %v1343_v8  ;;  %1311 = vmatpush3.bf16.msra.mxu1 %v1343_v8 }
  0x21   : > { %1263 = vmatprep.subr.bf16.mxu0 %v1344_v9  ;;  %1304 = vmatprep.subr.bf16.mxu1 %v1344_v9 }
  0x24   : > { %1264 = vmatpush3.bf16.msra.mxu0 %v1344_v9  ;;  %1312 = vmatpush3.bf16.msra.mxu1 %v1344_v9 }
  0x27   : > { %1266 = vmatmul.mubr.bf16.vlgmr.msra.gmra.mrb[0].mxu0 %v1347_v10  ;;  %1282 = vmatmul.mubr.bf16.vlgmr.msra.gmra.mrb[0].mxu1 %v1348_v11 }
  0x28   : > { %1269 = vmatprep.mubr.bf16.mxu0 %v1349_v12  ;;  %1285 = vmatprep.mubr.bf16.mxu1 %v1350_v13 }
  0x2f   : > { %1270 = vmatmul.mubr.bf16.gmra.mrb[4].mxu0 %v1351_v14  ;;  %1286 = vmatmul.mubr.bf16.gmra.mrb[4].mxu1 %v1352_v15 }
  0x30   : > { %1273 = vmatprep.mubr.bf16.mxu0 %v1353_v16  ;;  %1289 = vmatprep.mubr.bf16.mxu1 %v1354_v17 }
  0x37   : > { %1274 = vmatmul.mubr.bf16.gmra.mrb[8].mxu0 %v1355_v18  ;;  %1290 = vmatmul.mubr.bf16.gmra.mrb[8].mxu1 %v1356_v19 }
  0x38   : > { %1277 = vmatprep.mubr.bf16.mxu0 %v1357_v20  ;;  %1293 = vmatprep.mubr.bf16.mxu1 %v1358_v21 }
  0x3f   : > { %1278 = vmatmul.mubr.bf16.gmra.mrb[12].mxu0 %v1359_v22  ;;  %1294 = vmatmul.mubr.bf16.gmra.mrb[12].mxu1 %v1360_v23 }
  0xfa   : > { %v1267_v24 = vpop.f32.mrb[0].mxu0  ;;  %v1283_v25 = vpop.f32.mrb[0].mxu1 }
  0xfb   : > { %v513_v26 = vpop.f32.mrb[1].mxu0  ;;  %v577_v27 = vpop.f32.mrb[1].mxu1  ;;  %v741_v30 = vmax.f32 %v1267_v24, 0.0  ;;  %v757_v31 = vmax.f32 %v1283_v25, 0.0 }
  0xfc   : > { %v1268_v28 = vpop.f32.mrb[2].mxu0  ;;  %v1284_v29 = vpop.f32.mrb[2].mxu1  ;;  %v739_v36 = vmax.f32 %v513_v26, 0.0  ;;  %v755_v37 = vmax.f32 %v577_v27, 0.0 }
  0xfd   : > { %v742_v32 = vmax.f32 %v1268_v28, 0.0  ;;  %v758_v33 = vmax.f32 %v1284_v29, 0.0  ;;  %v516_v34 = vpop.f32.mrb[3].mxu0  ;;  %v580_v35 = vpop.f32.mrb[3].mxu1 }
  0xfe   : > { %v740_v38 = vmax.f32 %v516_v34, 0.0  ;;  %v756_v39 = vmax.f32 %v580_v35, 0.0 }
  0xff   : > { %v1138_v40 = vpack.c.bf16 %v742_v32, %v741_v30  ;;  %v1178_v41 = vpack.c.bf16 %v758_v33, %v757_v31 }
 0x100   : > { %v1133_v42 = vpack.c.bf16 %v740_v38, %v739_v36  ;;  %v1173_v43 = vpack.c.bf16 %v756_v39, %v755_v37 }
 0x101   : > { %1210 = vst [vmem:[%s1473_s8 + $0x8] sm:$0xff] %v1138_v40   ;;  %1218 = vst [vmem:[%s1473_s8 + $0x48] sm:$0xff] %v1178_v41  }
 0x102   : > { %1134 = vst [vmem:[%s1473_s8] sm:$0xff] %v1133_v42   ;;  %1217 = vst [vmem:[%s1473_s8 + $0x40] sm:$0xff] %v1173_v43   ;;  %v1271_v44 = vpop.f32.mrb[4].mxu0  ;;  %v1287_v45 = vpop.f32.mrb[4].mxu1 }
 0x103   : > { %v529_v46 = vpop.f32.mrb[5].mxu0  ;;  %v593_v47 = vpop.f32.mrb[5].mxu1  ;;  %v745_v50 = vmax.f32 %v1271_v44, 0.0  ;;  %v761_v51 = vmax.f32 %v1287_v45, 0.0 }
 0x104   : > { %v1272_v48 = vpop.f32.mrb[6].mxu0  ;;  %v1288_v49 = vpop.f32.mrb[6].mxu1  ;;  %v743_v56 = vmax.f32 %v529_v46, 0.0  ;;  %v759_v57 = vmax.f32 %v593_v47, 0.0 }
 0x105   : > { %v746_v52 = vmax.f32 %v1272_v48, 0.0  ;;  %v762_v53 = vmax.f32 %v1288_v49, 0.0  ;;  %v532_v54 = vpop.f32.mrb[7].mxu0  ;;  %v596_v55 = vpop.f32.mrb[7].mxu1 }
 0x106   : > { %v744_v58 = vmax.f32 %v532_v54, 0.0  ;;  %v760_v59 = vmax.f32 %v596_v55, 0.0 }
 0x107   : > { %v1148_v60 = vpack.c.bf16 %v746_v52, %v745_v50  ;;  %v1188_v61 = vpack.c.bf16 %v762_v53, %v761_v51 }
 0x108   : > { %v1143_v62 = vpack.c.bf16 %v744_v58, %v743_v56  ;;  %v1183_v63 = vpack.c.bf16 %v760_v59, %v759_v57 }
 0x109   : > { %1212 = vst [vmem:[%s1473_s8 + $0x18] sm:$0xff] %v1148_v60   ;;  %1220 = vst [vmem:[%s1473_s8 + $0x58] sm:$0xff] %v1188_v61  }
 0x10a   : > { %1211 = vst [vmem:[%s1473_s8 + $0x10] sm:$0xff] %v1143_v62   ;;  %1219 = vst [vmem:[%s1473_s8 + $0x50] sm:$0xff] %v1183_v63   ;;  %v1275_v0 = vpop.f32.mrb[8].mxu0  ;;  %v1291_v1 = vpop.f32.mrb[8].mxu1 }
 0x10b   : > { %v545_v2 = vpop.f32.mrb[9].mxu0  ;;  %v609_v3 = vpop.f32.mrb[9].mxu1  ;;  %v749_v6 = vmax.f32 %v1275_v0, 0.0  ;;  %v765_v7 = vmax.f32 %v1291_v1, 0.0 }
 0x10c   : > { %v1276_v4 = vpop.f32.mrb[10].mxu0  ;;  %v1292_v5 = vpop.f32.mrb[10].mxu1  ;;  %v747_v12 = vmax.f32 %v545_v2, 0.0  ;;  %v763_v13 = vmax.f32 %v609_v3, 0.0 }
 0x10d   : > { %v750_v8 = vmax.f32 %v1276_v4, 0.0  ;;  %v766_v9 = vmax.f32 %v1292_v5, 0.0  ;;  %v548_v10 = vpop.f32.mrb[11].mxu0  ;;  %v612_v11 = vpop.f32.mrb[11].mxu1 }
 0x10e   : > { %v748_v14 = vmax.f32 %v548_v10, 0.0  ;;  %v764_v15 = vmax.f32 %v612_v11, 0.0 }
 0x10f   : > { %v1158_v16 = vpack.c.bf16 %v750_v8, %v749_v6  ;;  %v1198_v17 = vpack.c.bf16 %v766_v9, %v765_v7 }
 0x110   : > { %v1153_v18 = vpack.c.bf16 %v748_v14, %v747_v12  ;;  %v1193_v19 = vpack.c.bf16 %v764_v15, %v763_v13 }
 0x111   : > { %1214 = vst [vmem:[%s1473_s8 + $0x28] sm:$0xff] %v1158_v16   ;;  %1222 = vst [vmem:[%s1473_s8 + $0x68] sm:$0xff] %v1198_v17  }
 0x112   : > { %1213 = vst [vmem:[%s1473_s8 + $0x20] sm:$0xff] %v1153_v18   ;;  %1221 = vst [vmem:[%s1473_s8 + $0x60] sm:$0xff] %v1193_v19   ;;  %v1279_v20 = vpop.f32.mrb[12].mxu0  ;;  %v1295_v21 = vpop.f32.mrb[12].mxu1 }
 0x113   : > { %v561_v22 = vpop.f32.mrb[13].mxu0  ;;  %v625_v23 = vpop.f32.mrb[13].mxu1  ;;  %v753_v26 = vmax.f32 %v1279_v20, 0.0  ;;  %v769_v27 = vmax.f32 %v1295_v21, 0.0 }
 0x114   : > { %v1280_v24 = vpop.f32.mrb[14].mxu0  ;;  %v1296_v25 = vpop.f32.mrb[14].mxu1  ;;  %v751_v32 = vmax.f32 %v561_v22, 0.0  ;;  %v767_v33 = vmax.f32 %v625_v23, 0.0 }
 0x115   : > { %v754_v28 = vmax.f32 %v1280_v24, 0.0  ;;  %v770_v29 = vmax.f32 %v1296_v25, 0.0  ;;  %v564_v30 = vpop.f32.mrb[15].mxu0  ;;  %v628_v31 = vpop.f32.mrb[15].mxu1 }
 0x116   : > { %v752_v34 = vmax.f32 %v564_v30, 0.0  ;;  %v768_v35 = vmax.f32 %v628_v31, 0.0 }
 0x117   : > { %v1168_v36 = vpack.c.bf16 %v754_v28, %v753_v26  ;;  %v1208_v37 = vpack.c.bf16 %v770_v29, %v769_v27 }
 0x118   : > { %v1163_v38 = vpack.c.bf16 %v752_v34, %v751_v32  ;;  %v1203_v39 = vpack.c.bf16 %v768_v35, %v767_v33 }
 0x119   : > { %1216 = vst [vmem:[%s1473_s8 + $0x38] sm:$0xff] %v1168_v36   ;;  %1224 = vst [vmem:[%s1473_s8 + $0x78] sm:$0xff] %v1208_v37  }
 0x11a   : > { %1215 = vst [vmem:[%s1473_s8 + $0x30] sm:$0xff] %v1163_v38   ;;  %1223 = vst [vmem:[%s1473_s8 + $0x70] sm:$0xff] %v1203_v39  }
 0x11b PF: > { %s12_s11 = sadd.s32 1, %s1383_s11   ;;  %s1503_s9 = smov %s1379_s10 }
 0x11c   : > { %p9_p5 = scmp.ge.s32.totalorder %s12_s11, 4   ;;  %s1504_s10 = smov %s1506_s12 }
 0x11e   :  { %11 = sbr.rel (!%p9_p5) target bundleno = 2 (0x2), region = 69 }

// kernel: monkey_acar_qkv_forward.10
= control target key start
LH: loop header
LB: loop body
LE: loop exit
PB: predicated region body
PF: predicated region fallthrough
CT: control target
= control target key end

     0   :  { %s497_s15 = smov 0   ;;  %s581_s0 = inlined_call_operand.vmem [shape: f32[4,5,5,32], index: 0, kind: input, shape index: {}]   ;;  %s582_s1 = inlined_call_operand.vmem [shape: f32[4,5,4,32], index: 1, kind: input, shape index: {}]   ;;  %s583_s2 = inlined_call_operand.vmem [shape: f32[4,4,5,32], index: 2, kind: input, shape index: {}]   ;;  %s584_s3 = inlined_call_operand.vmem [shape: f32[4,4,4,32], index: 3, kind: input, shape index: {}]   ;;  %s585_s4 = inlined_call_operand.vmem [shape: f32[4,4,4,32], index: 4, kind: output, shape index: {}]  }
   0x1 LB: > { %s424_s16 = sadd.s32 4294967295, %s470_s15   ;;  %p428_p0 = scmp.ge.s32.totalorder %s470_s15, 1  ;;  %s470_s15 = sphi %s497_s15, %s14_s15  }
   0x2   : > { %p192_p1 = scmp.lt.s32.totalorder %s470_s15, 5 }
   0x4   : > { %p193_p2 = pnand %p428_p0, %p192_p1 }
   0x5   : > { %p233_p3 = scmp.lt.s32.totalorder (!%p193_p2), %s424_s16, 3  ;;  %vm328_vm0 = vcmask (!%p193_p2), 257024  }
   0x6   : > { %196 = sbr.rel (%p193_p2) target bundleno = 42 (0x2a), region = 36 }
   0xd   : > { %s587_s16 = smov (!%p233_p3, %s424_s16), 3 }
   0xe   : > { %s454_s17 = smul.u32 40, %s587_s16  ;;  %s451_s25 = sshll.u32 %s587_s16, 5 }
   0xf   : > { %s455_s18 = smul.u32 20, %s587_s16  ;;  %s530_s28 = scalar_lea.vmem %s583_s2, %s451_s25 }
  0x10   : > { %s512_s21 = scalar_lea.vmem %s581_s0, %s454_s17  ;;  %s452_s29 = sshll.u32 %s587_s16, 4  ;;  %v304_v21 = vld [vmem:[%s530_s28] sm:$0xf]  ;;  %v305_v34 = vld [vmem:[%s530_s28 + $0x8] sm:$0xf] }
  0x11   : > { %v258_v0 = vld [vmem:[%s512_s21] sm:$0xf]  ;;  %v437_v2 = vld [vmem:[%s512_s21 + $0x8] sm:$0xf]  ;;  %s520_s24 = scalar_lea.vmem %s582_s1, %s455_s18  ;;  %v438_v9 = vld [vmem:[%s512_s21 + $0x10] sm:$0xf]  ;;  %s550_s6 = scalar_lea.vmem %s584_s3, %s452_s29 }
  0x12   : > { %v262_v1 = vld [vmem:[%s512_s21 + $0x1] sm:$0xf]  ;;  %v441_v4 = vld [vmem:[%s512_s21 + $0x9] sm:$0xf]  ;;  %v442_v11 = vld [vmem:[%s512_s21 + $0x11] sm:$0xf]  ;;  %s257_s9 = scalar_lea.vmem %s585_s4, %s452_s29 }
  0x13   : > { %v266_v3 = vmax.f32 %v258_v0, %v262_v1  ;;  %v259_v5 = vld [vmem:[%s512_s21 + $0x8] sm:$0xf]  ;;  %v287_v10 = vld [vmem:[%s520_s24] sm:$0xf]  ;;  %v260_v14 = vld [vmem:[%s512_s21 + $0x10] sm:$0xf] }
  0x14   : > { %v263_v6 = vld [vmem:[%s512_s21 + $0x9] sm:$0xf]  ;;  %v264_v15 = vld [vmem:[%s512_s21 + $0x11] sm:$0xf]  ;;  %v445_v16 = vld [vmem:[%s520_s24 + $0x4] sm:$0xf] }
  0x15   : > { %v275_v7 = vmax.f32 %v266_v3, %v437_v2  ;;  %v267_v8 = vmax.f32 %v259_v5, %v263_v6  ;;  %v288_v17 = vld [vmem:[%s520_s24 + $0x4] sm:$0xf]  ;;  %v268_v18 = vmax.f32 %v260_v14, %v264_v15  ;;  %v439_v19 = vld [vmem:[%s512_s21 + $0x18] sm:$0xf]  ;;  %v446_v24 = vld [vmem:[%s520_s24 + $0x8] sm:$0xf] }
  0x16   : > { %v443_v23 = vld [vmem:[%s512_s21 + $0x19] sm:$0xf]  ;;  %v289_v30 = vld [vmem:[%s520_s24 + $0x8] sm:$0xf]  ;;  %v440_v32 = vld [vmem:[%s512_s21 + $0x20] sm:$0xf] }
  0x17   : > { %v283_v12 = vmax.f32 %v275_v7, %v441_v4  ;;  %v276_v13 = vmax.f32 %v267_v8, %v438_v9  ;;  %v277_v25 = vmax.f32 %v268_v18, %v439_v19  ;;  %v261_v26 = vld [vmem:[%s512_s21 + $0x18] sm:$0xf]  ;;  %v312_v33 = vld [vmem:[%s530_s28 + $0x1] sm:$0xf]  ;;  %v447_v39 = vld [vmem:[%s520_s24 + $0xc] sm:$0xf] }
  0x18   : > { %v265_v27 = vld [vmem:[%s512_s21 + $0x19] sm:$0xf]  ;;  %v444_v36 = vld [vmem:[%s512_s21 + $0x21] sm:$0xf]  ;;  %v313_v42 = vld [vmem:[%s530_s28 + $0x9] sm:$0xf] }
  0x19   : > { %v291_v20 = vmax.f32 %v283_v12, %v287_v10  ;;  %v284_v22 = vmax.f32 %v276_v13, %v442_v11  ;;  %v269_v31 = vmax.f32 %v261_v26, %v265_v27  ;;  %v285_v35 = vmax.f32 %v277_v25, %v443_v23  ;;  %v320_v41 = vld [vmem:[%s550_s6] sm:$0xf]  ;;  %v290_v44 = vld [vmem:[%s520_s24 + $0xc] sm:$0xf]  ;;  %v306_v47 = vld [vmem:[%s530_s28 + $0x10] sm:$0xf] }
  0x1a   : > { %v321_v49 = vld [vmem:[%s550_s6 + $0x4] sm:$0xf]  ;;  %v448_v51 = vld [vmem:[%s520_s24 + $0x10] sm:$0xf]  ;;  %v307_v57 = vld [vmem:[%s530_s28 + $0x18] sm:$0xf] }
  0x1b   : > { %v300_v28 = vmax.f32 %v291_v20, %v445_v16  ;;  %v292_v29 = vmax.f32 %v284_v22, %v288_v17  ;;  %v278_v40 = vmax.f32 %v269_v31, %v440_v32  ;;  %v293_v43 = vmax.f32 %v285_v35, %v289_v30  ;;  %v314_v54 = vld [vmem:[%s530_s28 + $0x11] sm:$0xf]  ;;  %v322_v59 = vld [vmem:[%s550_s6 + $0x8] sm:$0xf]  ;;  %v315_v62 = vld [vmem:[%s530_s28 + $0x19] sm:$0xf] }
  0x1c   : > { %v323_v1 = vld [vmem:[%s550_s6 + $0xc] sm:$0xf] }
  0x1d   : > { %v308_v37 = vmax.f32 %v300_v28, %v304_v21  ;;  %v301_v38 = vmax.f32 %v292_v29, %v446_v24  ;;  %v286_v48 = vmax.f32 %v278_v40, %v444_v36  ;;  %v302_v50 = vmax.f32 %v293_v43, %v447_v39 }
  0x1f   : > { %v316_v45 = vmax.f32 %v308_v37, %v312_v33  ;;  %v309_v46 = vmax.f32 %v301_v38, %v305_v34  ;;  %v294_v55 = vmax.f32 %v286_v48, %v290_v44  ;;  %v310_v56 = vmax.f32 %v302_v50, %v306_v47 }
  0x21   : > { %v324_v52 = vmax.f32 %v316_v45, %v320_v41  ;;  %v317_v53 = vmax.f32 %v309_v46, %v313_v42  ;;  %v303_v60 = vmax.f32 %v294_v55, %v448_v51  ;;  %v318_v61 = vmax.f32 %v310_v56, %v314_v54 }
  0x23   : > { %329 = vst.msk [vmem:[%s257_s9] sm:$0xf] %vm328_vm0, %v324_v52  ;;  %v325_v58 = vmax.f32 %v317_v53, %v321_v49  ;;  %v311_v63 = vmax.f32 %v303_v60, %v307_v57  ;;  %v326_v0 = vmax.f32 %v318_v61, %v322_v59 }
  0x25   : > { %330 = vst.msk [vmem:[%s257_s9 + $0x4] sm:$0xf] %vm328_vm0, %v325_v58  ;;  %v319_v2 = vmax.f32 %v311_v63, %v315_v62  ;;  %331 = vst.msk [vmem:[%s257_s9 + $0x8] sm:$0xf] %vm328_vm0, %v326_v0 }
  0x27   : > { %v327_v3 = vmax.f32 %v319_v2, %v323_v1 }
  0x29   : > { %332 = vst.msk [vmem:[%s257_s9 + $0xc] sm:$0xf] %vm328_vm0, %v327_v3 }
  0x2a PF: > { %s14_s15 = sadd.s32 1, %s470_s15  }
  0x2b   : > { %p11_p4 = scmp.ge.s32.totalorder %s14_s15, 6  }
  0x2d   :  { %13 = sbr.rel (!%p11_p4) target bundleno = 1 (0x1), region = 77 }

// kernel: monkey_acar_qkv_forward.9
= control target key start
LH: loop header
LB: loop body
LE: loop exit
PB: predicated region body
PF: predicated region fallthrough
CT: control target
= control target key end

     0   :  { %s1863_s9 = smov 0   ;;  %s2138_s0 = inlined_call_operand.vmem [shape: bf16[4,83,32], index: 0, kind: input, shape index: {}]   ;;  %s2139_s1 = inlined_call_operand.vmem [shape: bf16[9,32,32], index: 1, kind: input, shape index: {}]   ;;  %s2140_s2 = inlined_call_operand.vmem [shape: f32[4,63,32], index: 2, kind: output, shape index: {}]  }
   0x1 LB: > { %s1436_s10 = sadd.s32 4294967295, %s1846_s9   ;;  %p1440_p0 = scmp.ge.s32.totalorder %s1846_s9, 1  ;;  %s1846_s9 = sphi %s1863_s9, %s12_s9  }
   0x2   : > { %p112_p1 = scmp.lt.s32.totalorder %s1846_s9, 5 }
   0x4   : > { %p113_p2 = pnand %p1440_p0, %p112_p1 }
   0x5   : > { %v1874_v0 = vld [vmem:[%s2139_s1 + $0x40] sm:$0xff] (!%p113_p2)   ;;  %p134_p3 = scmp.lt.s32.totalorder (!%p113_p2), %s1436_s10, 3  ;;  %v1798_v1 = vld [vmem:[%s2139_s1 + $0x10] sm:$0xff] (!%p113_p2)   ;;  %v1883_v2 = vld [vmem:[%s2139_s1 + $0x48] sm:$0xff] (!%p113_p2)   ;;  %vm226_vm0 = vcmask (!%p113_p2), 261120   ;;  %vm426_vm2 = vcmask (!%p113_p2), 1046528  }
   0x6   : > { %116 = sbr.rel (%p113_p2) target bundleno = 313 (0x139), region = 28  ;;  %1660 = vmatprep.subr.bf16.mxu0 (!%p113_p2), %v1874_v0  ;;  %1612 = vmatprep.subr.bf16.mxu1 (!%p113_p2), %v1798_v1  ;;  %v1800_v3 = vld [vmem:[%s2139_s1 + $0x18] sm:$0xff] (!%p113_p2)   ;;  %v1896_v4 = vld [vmem:[%s2139_s1] sm:$0xff] (!%p113_p2)   ;;  %v1807_v5 = vld [vmem:[%s2139_s1 + $0x50] sm:$0xff] (!%p113_p2)   ;;  %vm182_vm1 = vsmask.f32 (!%p113_p2), 7424 }
   0x7   : > { %1661 = vmatpush3.bf16.msra.mxu0 (!%p113_p2), %v1874_v0  ;;  %1613 = vmatpush3.bf16.msra.mxu1 (!%p113_p2), %v1798_v1  ;;  %v1809_v20 = vld [vmem:[%s2139_s1 + $0x58] sm:$0xff] (!%p113_p2)   ;;  %vm821_vm3 = vsmask.f32 (!%p113_p2), 6400  ;;  %v1812_v34 = vld [vmem:[%s2139_s1 + $0x60] sm:$0xff] (!%p113_p2)   ;;  %v1811_v37 = vld [vmem:[%s2139_s1 + $0x8] sm:$0xff] (!%p113_p2)   ;;  %vm1265_vm4 = vcmask (!%p113_p2), 1045504  }
   0x8   : > { %1662 = vmatprep.subr.bf16.mxu0 (!%p113_p2), %v1883_v2  ;;  %1614 = vmatprep.subr.bf16.mxu1 (!%p113_p2), %v1800_v3  ;;  %v1813_v55 = vld [vmem:[%s2139_s1 + $0x20] sm:$0xff] (!%p113_p2)   ;;  %vm1379_vm5 = vcmask (!%p113_p2), 260096  }
   0xb   : > { %1663 = vmatpush3.bf16.msra.mxu0 (!%p113_p2), %v1883_v2  ;;  %1615 = vmatpush3.bf16.msra.mxu1 (!%p113_p2), %v1800_v3 }
   0xc   : > { %1672 = vmatprep.subr.bf16.mxu0 (!%p113_p2), %v1807_v5  ;;  %1624 = vmatprep.subr.bf16.mxu1 (!%p113_p2), %v1896_v4 }
   0xd   : > { %s2142_s10 = smov (!%p134_p3, %s1436_s10), 3 }
   0xe   : > { %s1788_s19 = smul.u32 44, %s2142_s10 }
  0x10   : > { %s1901_s24 = scalar_lea.vmem %s2138_s0, %s1788_s19 }
  0x11   : > { %v1801_v6 = vld [vmem:[%s1901_s24 + $0x4] sm:$0xfe]   ;;  %v1802_v7 = vld [vmem:[%s1901_s24 + $0xc] sm:$0xff]   ;;  %v1910_v8 = vld [vmem:[%s1901_s24 + $0x14] sm:$0xff]  }
  0x12   : > { %v710_v9 = vrot.slane %v1801_v6, 1  ;;  %v711_v10 = vrot.slane %v1802_v7, 1  ;;  %v713_v11 = vrot.slane %v1910_v8, 1  ;;  %v1915_v12 = vld [vmem:[%s1901_s24] sm:$0xff]   ;;  %v1919_v14 = vld [vmem:[%s1901_s24 + $0x8] sm:$0xff]   ;;  %v823_v15 = vshrl.u32 %v1801_v6, 16 }
  0x13   : > { %v184_v17 = vshrl.u32 %v1915_v12, 16  ;;  %v186_v18 = vshll.u32 %v1915_v12, 16  ;;  %v1928_v19 = vld [vmem:[%s1901_s24 + $0x10] sm:$0xff]   ;;  %v191_v21 = vshll.u32 %v1919_v14, 16  ;;  %v195_v22 = vshrl.u32 %v1919_v14, 16  ;;  %v1937_v23 = vld [vmem:[%s1901_s24 + $0x18] sm:$0xff]  }
  0x14   : > { %v712_v13 = vsel %vm426_vm2, %v710_v9, %v711_v10  ;;  %v714_v16 = vsel %vm426_vm2, %v711_v10, %v713_v11  ;;  %v199_v25 = vshll.u32 %v1928_v19, 16  ;;  %v203_v26 = vshrl.u32 %v1928_v19, 16  ;;  %v1957_v50 = vld [vmem:[%s1901_s24 + $0x1c] sm:$0xff]   ;;  %v1962_v53 = vld [vmem:[%s1901_s24 + $0x24] ss:$0 sps:$4 sm:$0x11]  }
  0x15   : > { %1664 = vmatprep.mubr.msk.bf16.mxu0 %vm226_vm0, %v712_v13  ;;  %v188_v24 = vrot.slane %v186_v18, 1  ;;  %v825_v27 = vrot.slane %v823_v15, 1  ;;  %v193_v28 = vrot.slane %v191_v21, 1  ;;  %v207_v29 = vshll.u32 %v1937_v23, 16  ;;  %v1973_v61 = vld [vmem:[%s1901_s24 + $0x10] sm:$0xff]   ;;  %v1816_v15 = vld [vmem:[%s2139_s1 + $0x68] sm:$0xff]  }
  0x16   : > { %1665 = vmatmul.mubr.msk.bf16.vlgmr.msra.gmra.mrb[0].mxu0 %vm226_vm0, %v714_v16  ;;  %v201_v31 = vrot.slane %v199_v25, 1  ;;  %v826_v32 = vshll.u32 %v1801_v6, 16  ;;  %v831_v33 = vshrl.u32 %v1802_v7, 16  ;;  %v834_v38 = vshll.u32 %v1802_v7, 16  ;;  %v390_v25 = vld [vmem:[%s1901_s24 + $0x4] sm:$0xf] }
  0x17   : > { %1673 = vmatpush3.bf16.msra.mxu0 %v1807_v5  ;;  %v189_v30 = vor.u32 %v188_v24, %v184_v17  ;;  %v197_v35 = vor.u32 %v195_v22, %v193_v28  ;;  %v209_v36 = vrot.slane %v207_v29, 1  ;;  %v211_v39 = vshrl.u32 %v1937_v23, 16  ;;  %v1978_v5 = vld [vmem:[%s1901_s24 + $0xc] sm:$0xf]  ;;  %v1821_v22 = vld [vmem:[%s2139_s1 + $0x70] sm:$0xff]  }
  0x18   : > { %1674 = vmatprep.subr.bf16.mxu0 %v1809_v20  ;;  %v205_v41 = vor.u32 %v203_v26, %v201_v31  ;;  %v828_v42 = vrot.slane %v826_v32, 2  ;;  %v833_v43 = vrot.slane %v831_v33, 1  ;;  %v836_v45 = vrot.slane %v834_v38, 2  ;;  %v389_v24 = vld [vmem:[%s1901_s24] sm:$0xe]  ;;  %v1817_v29 = vld [vmem:[%s2139_s1 + $0x28] sm:$0xff]  }
  0x19   : > { %v194_v40 = vsel %vm182_vm1, %v189_v30, %v193_v28  ;;  %v202_v44 = vsel %vm182_vm1, %v197_v35, %v201_v31  ;;  %v840_v46 = vshrl.u32 %v1910_v8, 16  ;;  %v843_v49 = vshll.u32 %v1910_v8, 16  ;;  %v391_v26 = vld [vmem:[%s1901_s24 + $0x8] sm:$0xf]  ;;  %v2009_v33 = vld [vmem:[%s1901_s24 + $0x20] sm:$0xff]  }
  0x1a   : > { %1616 = vmatprep.mubr.msk.bf16.mxu1 %vm226_vm0, %v194_v40  ;;  %v210_v47 = vsel %vm182_vm1, %v205_v41, %v209_v36  ;;  %v829_v48 = vor.u32 %v828_v42, %v825_v27  ;;  %v837_v51 = vor.u32 %v836_v45, %v833_v43  ;;  %v849_v56 = vshrl.u32 %v1957_v50, 16  ;;  %v392_v27 = vld [vmem:[%s1901_s24 + $0xc] sm:$0xf]  ;;  %v2014_v35 = vld [vmem:[%s1901_s24 + $0x14] sm:$0xf] }
  0x1b   : > { %1675 = vmatpush3.bf16.msra.mxu0 %v1809_v20  ;;  %1617 = vmatmul.mubr.msk.bf16.vlgmr.msra.gmra.mrb[0].mxu1 %vm226_vm0, %v202_v44  ;;  %v842_v52 = vrot.slane %v840_v46, 1  ;;  %v845_v54 = vrot.slane %v843_v49, 2  ;;  %v852_v57 = vshll.u32 %v1957_v50, 16  ;;  %v858_v59 = vshrl.u32 %v1962_v53, 16  ;;  %v1990_v20 = vld [vmem:[%s1901_s24 + $0x18] sm:$0xff]  }
  0x1c   : > { %1684 = vmatprep.subr.bf16.mxu0 %v1812_v34  ;;  %1625 = vmatpush3.bf16.msra.mxu1 %v1896_v4  ;;  %v838_v58 = vsel %vm821_vm3, %v829_v48, %v837_v51  ;;  %v861_v60 = vshll.u32 %v1962_v53, 16  ;;  %v213_v62 = vor.u32 %v211_v39, %v209_v36  ;;  %v851_v1 = vrot.slane %v849_v56, 1  ;;  %v963_v4 = vld [vmem:[%s1901_s24 + $0x8] sm:$0xe]  ;;  %v2017_v36 = vld [vmem:[%s1901_s24 + $0x18] sm:$0xf] }
  0x1d   : > { %1620 = vmatprep.mubr.msk.bf16.mxu1 %vm226_vm0, %v210_v47  ;;  %1626 = vmatprep.subr.bf16.mxu1 %v1811_v37  ;;  %v846_v63 = vor.u32 %v845_v54, %v842_v52  ;;  %v854_v3 = vrot.slane %v852_v57, 2  ;;  %v860_v6 = vrot.slane %v858_v59, 1  ;;  %v1522_v9 = vcombine.low %v963_v4, %v1978_v5  ;;  %v1829_v57 = vld [vmem:[%s2139_s1 + $0x78] sm:$0xff]  }
  0x1e   : > { %1676 = vmatprep.mubr.msk.bf16.mxu0 %vm226_vm0, %v838_v58  ;;  %v863_v7 = vrot.slane %v861_v60, 2  ;;  %v1001_v18 = vrot.slane %v1973_v61, 1  ;;  %v1003_v30 = vrot.slane %v1990_v20, 1  ;;  %v1468_v31 = vcombine.low %v389_v24, %v390_v25 }
  0x1f   : > { %v847_v10 = vsel %vm821_vm3, %v837_v51, %v846_v63  ;;  %v855_v13 = vor.u32 %v854_v3, %v851_v1  ;;  %v1000_v21 = vrot.slane %v1522_v9, 1  ;;  %v1469_v32 = vcombine.low %v391_v26, %v392_v27 }
  0x20   : > { %1627 = vmatpush3.bf16.msra.mxu1 %v1811_v37  ;;  %v864_v17 = vor.u32 %v863_v7, %v860_v6  ;;  %v2023_v37 = vld [vmem:[%s1901_s24 + $0x1c] sm:$0xf]  ;;  %v1112_v38 = vshrl.u32 %v1522_v9, 16  ;;  %v1115_v39 = vshll.u32 %v1522_v9, 16  ;;  %v1120_v40 = vshrl.u32 %v1973_v61, 16 }
  0x21   : > { %1636 = vmatprep.subr.bf16.mxu1 %v1813_v55  ;;  %v856_v16 = vsel %vm821_vm3, %v846_v63, %v855_v13  ;;  %v1123_v41 = vshll.u32 %v1973_v61, 16  ;;  %v427_v42 = vrot.slane %v1468_v31, 1  ;;  %v428_v43 = vrot.slane %v1469_v32, 1 }
  0x22   : > { %1677 = vmatmul.mubr.msk.bf16.vlgmr.msra.gmra.mrb[0].mxu0 %vm226_vm0, %v847_v10  ;;  %v865_v28 = vsel %vm821_vm3, %v855_v13, %v864_v17  ;;  %v1005_v44 = vrot.slane %v2009_v33, 1  ;;  %v1004_v45 = vsel %vm426_vm2, %v1001_v18, %v1003_v30  ;;  %v1471_v47 = vcombine.low %v2017_v36, %v2023_v37 }
  0x23   : > { %1621 = vmatmul.mubr.msk.bf16.gmra.mrb[4].mxu1 %vm226_vm0, %v213_v62  ;;  %1685 = vmatpush3.bf16.msra.mxu0 %v1812_v34  ;;  %v393_v34 = vld [vmem:[%s1901_s24 + $0x10] sm:$0xf]  ;;  %v1114_v48 = vrot.slane %v1112_v38, 1  ;;  %v1117_v49 = vrot.slane %v1115_v39, 2  ;;  %v1122_v51 = vrot.slane %v1120_v40, 1  ;;  %v1125_v52 = vrot.slane %v1123_v41, 2 }
  0x24   : > { %1628 = vmatprep.mubr.msk.bf16.mxu1 %vm226_vm0, %v1915_v12  ;;  %1680 = vmatprep.mubr.msk.bf16.mxu0 %vm226_vm0, %v856_v16  ;;  %v1002_v12 = vsel %vm426_vm2, %v1000_v21, %v1001_v18  ;;  %v1470_v46 = vcombine.low %v393_v34, %v2014_v35  ;;  %v429_v54 = vsel %vm426_vm2, %v427_v42, %v428_v43  ;;  %v1129_v60 = vshrl.u32 %v1990_v20, 16  ;;  %v1833_v21 = vld [vmem:[%s1901_s24 + $0x20] ss:$0 sps:$4 sm:$0x11]   ;;  %v1252_v42 = vld [vmem:[%s1901_s24 + $0x8] sm:$0xc] }
  0x25   : > { %1686 = vmatprep.subr.bf16.mxu0 %v1816_v15  ;;  %v1006_v56 = vsel %vm426_vm2, %v1003_v30, %v1005_v44  ;;  %v1132_v62 = vshll.u32 %v1990_v20, 16  ;;  %v432_v63 = vrot.slane %v1471_v47, 1  ;;  %v1118_v1 = vor.u32 %v1117_v49, %v1114_v48 }
  0x26   : > { %v430_v58 = vrot.slane %v1470_v46, 1  ;;  %v1126_v3 = vor.u32 %v1125_v52, %v1122_v51  ;;  %v1484_v4 = vcombine.low %v392_v27, %v393_v34  ;;  %v1138_v7 = vshrl.u32 %v2009_v33, 16 }
  0x27   : > { %1687 = vmatpush3.bf16.msra.mxu0 %v1816_v15  ;;  %v1141_v9 = vshll.u32 %v2009_v33, 16  ;;  %v1131_v15 = vrot.slane %v1129_v60, 1  ;;  %v1134_v16 = vrot.slane %v1132_v62, 2  ;;  %v1485_v30 = vcombine.low %v2014_v35, %v2017_v36 }
  0x28   : > { %1696 = vmatprep.subr.bf16.mxu0 %v1821_v22  ;;  %v431_v10 = vsel %vm426_vm2, %v428_v43, %v430_v58  ;;  %v433_v17 = vsel %vm426_vm2, %v430_v58, %v432_v63  ;;  %v1127_v18 = vsel %vm821_vm3, %v1118_v1, %v1126_v3  ;;  %v553_v24 = vshll.u32 %v1484_v4, 16 }
  0x29   : > { %v1140_v27 = vrot.slane %v1138_v7, 1  ;;  %v1135_v31 = vor.u32 %v1134_v16, %v1131_v15  ;;  %v434_v38 = vrot.slane %v1833_v21, 1  ;;  %v561_v43 = vshll.u32 %v1485_v30, 16 }
  0x2a   : > { %1681 = vmatmul.mubr.msk.bf16.gmra.mrb[4].mxu0 %vm226_vm0, %v865_v28  ;;  %v1143_v28 = vrot.slane %v1141_v9, 2  ;;  %v555_v35 = vrot.slane %v553_v24, 1  ;;  %v1547_v8 = vcombine.low %v1252_v42, %v1978_v5  ;;  %v565_v48 = vshrl.u32 %v1485_v30, 16 }
  0x2b   : > { %1629 = vmatmul.mubr.msk.bf16.vlgmr.msra.gmra.mrb[0].mxu1 %vm226_vm0, %v1919_v14  ;;  %1688 = vmatprep.mubr.msk.bf16.mxu0 %vm226_vm0, %v1002_v12  ;;  %v1825_v14 = vld [vmem:[%s2139_s1 + $0x30] sm:$0xff]   ;;  %v715_v12 = vrot.slane %v1957_v50, 1  ;;  %v435_v46 = vsel %vm426_vm2, %v432_v63, %v434_v38  ;;  %v563_v51 = vrot.slane %v561_v43, 1  ;;  %v1269_v63 = vrot.slane %v1990_v20, 2 }
  0x2c   : > { %1637 = vmatpush3.bf16.msra.mxu1 %v1813_v55  ;;  %1632 = vmatprep.mubr.msk.bf16.mxu1 %vm226_vm0, %v1928_v19  ;;  %v2036_v19 = vld [vmem:[%s1901_s24 + $0x28] ss:$0 sps:$4 sm:$0x11]   ;;  %v1483_v55 = vcombine.low %v390_v25, %v391_v26  ;;  %v1832_v25 = vld [vmem:[%s2139_s1 + $0x38] sm:$0xff]   ;;  %v1144_v36 = vor.u32 %v1143_v28, %v1140_v27  ;;  %v1271_v1 = vrot.slane %v2009_v33, 2  ;;  %v717_v33 = vrot.slane %v1962_v53, 1 }
  0x2d   : > { %1638 = vmatprep.subr.bf16.mxu1 %v1817_v29  ;;  %v1007_v59 = vrot.slane %v2036_v19, 1  ;;  %v1147_v32 = vshrl.u32 %v2036_v19, 16  ;;  %v1150_v34 = vshll.u32 %v2036_v19, 16  ;;  %v716_v39 = vsel %vm426_vm2, %v713_v11, %v715_v12 }
  0x2e   : > { %v548_v6 = vshll.u32 %v1483_v55, 16  ;;  %v557_v19 = vshrl.u32 %v1484_v4, 16  ;;  %v1145_v47 = vsel %vm821_vm3, %v1135_v31, %v1144_v36  ;;  %v1839_v4 = vld [vmem:[%s1901_s24 + $0x28] ss:$0 sps:$4 sm:$0x33]  }
  0x2f   : > { %v1008_v13 = vsel %vm426_vm2, %v1005_v44, %v1007_v59  ;;  %v1136_v44 = vsel %vm821_vm3, %v1126_v3, %v1135_v31 }
  0x30   : > { %1639 = vmatpush3.bf16.msra.mxu1 %v1817_v29  ;;  %v550_v26 = vrot.slane %v548_v6, 1  ;;  %v533_v29 = vld [vmem:[%s1901_s24 + $0x20] sm:$0xf]  ;;  %v559_v5 = vor.u32 %v557_v19, %v555_v35  ;;  %v1272_v6 = vsel %vm1265_vm4, %v1269_v63, %v1271_v1  ;;  %s1557_s24 = sshll.u32 %s2142_s10, 6 }
  0x31   : > { %1648 = vmatprep.subr.bf16.mxu1 %v1825_v14  ;;  %v1486_v41 = vcombine.low %v2023_v37, %v533_v29  ;;  %v1836_v37 = vld [vmem:[%s2139_s1 + $0x88] sm:$0xff]   ;;  %s143_s28 = scalar_lea.vmem %s2140_s2, %s1557_s24 }
  0x32   : > { %1689 = vmatmul.mubr.msk.bf16.vlgmr.msra.gmra.mrb[0].mxu0 %vm226_vm0, %v1004_v45  ;;  %v1152_v45 = vrot.slane %v1150_v34, 2  ;;  %v564_v59 = vsel %vm182_vm1, %v559_v5, %v563_v51 }
  0x33   : > { %1633 = vmatmul.mubr.msk.bf16.gmra.mrb[4].mxu1 %vm226_vm0, %v1937_v23  ;;  %1697 = vmatpush3.bf16.msra.mxu0 %v1821_v22  ;;  %v1834_v23 = vld [vmem:[%s2139_s1 + $0x80] sm:$0xff]   ;;  %v546_v22 = vshrl.u32 %v1483_v55, 16  ;;  %v569_v49 = vshll.u32 %v1486_v41, 16  ;;  %v1267_v55 = vrot.slane %v1973_v61, 2  ;;  %v573_v61 = vshrl.u32 %v1486_v41, 16 }
  0x34   : > { %1640 = vmatprep.mubr.msk.bf16.mxu1 %vm226_vm0, %v429_v54  ;;  %1692 = vmatprep.mubr.msk.bf16.mxu0 %vm226_vm0, %v1006_v56  ;;  %v1266_v54 = vrot.slane %v1547_v8, 2  ;;  %v567_v56 = vor.u32 %v565_v48, %v563_v51 }
  0x35   : > { %1698 = vmatprep.subr.bf16.mxu0 %v1829_v57  ;;  %v551_v40 = vor.u32 %v550_v26, %v546_v22 }
  0x36   : > { %v1268_v60 = vsel %vm1265_vm4, %v1266_v54, %v1267_v55 }
  0x37   : > { %1699 = vmatpush3.bf16.msra.mxu0 %v1829_v57  ;;  %v556_v11 = vsel %vm182_vm1, %v551_v40, %v555_v35  ;;  %v571_v57 = vrot.slane %v569_v49, 1 }
  0x38   : > { %1708 = vmatprep.subr.bf16.mxu0 %v1834_v23 }
  0x39   : > { %v572_v62 = vsel %vm182_vm1, %v567_v56, %v571_v57  ;;  %v575_v3 = vor.u32 %v573_v61, %v571_v57 }
  0x3a   : > { %1693 = vmatmul.mubr.msk.bf16.gmra.mrb[4].mxu0 %vm226_vm0, %v1008_v13 }
  0x3b   : > { %1641 = vmatmul.mubr.msk.bf16.vlgmr.msra.gmra.mrb[0].mxu1 %vm226_vm0, %v431_v10  ;;  %1700 = vmatprep.mubr.msk.bf16.mxu0 %vm226_vm0, %v1127_v18 }
  0x3c   : > { %1649 = vmatpush3.bf16.msra.mxu1 %v1825_v14  ;;  %1644 = vmatprep.mubr.msk.bf16.mxu1 %vm226_vm0, %v433_v17  ;;  %v1149_v14 = vrot.slane %v1147_v32, 1 }
  0x3d   : > { %1650 = vmatprep.subr.bf16.mxu1 %v1832_v25 }
  0x3e   : > { %v1153_v52 = vor.u32 %v1152_v45, %v1149_v14 }
  0x40   : > { %1651 = vmatpush3.bf16.msra.mxu1 %v1832_v25  ;;  %v1154_v58 = vsel %vm821_vm3, %v1144_v36, %v1153_v52 }
  0x41   : > { %1720 = vmatprep.subr.bf16.mxu1 %v1874_v0 }
  0x42   : > { %1701 = vmatmul.mubr.msk.bf16.vlgmr.msra.gmra.mrb[0].mxu0 %vm226_vm0, %v1136_v44 }
  0x43   : > { %1645 = vmatmul.mubr.msk.bf16.gmra.mrb[4].mxu1 %vm226_vm0, %v435_v46  ;;  %1709 = vmatpush3.bf16.msra.mxu0 %v1834_v23  ;;  %v1270_v23 = vsel %vm1265_vm4, %v1267_v55, %v1269_v63 }
  0x44   : > { %1652 = vmatprep.mubr.msk.bf16.mxu1 %vm226_vm0, %v556_v11  ;;  %1704 = vmatprep.mubr.msk.bf16.mxu0 %vm226_vm0, %v1145_v47 }
  0x45   : > { %1710 = vmatprep.subr.bf16.mxu0 %v1836_v37 }
  0x47   : > { %1711 = vmatpush3.bf16.msra.mxu0 %v1836_v37 }
  0x4a   : > { %1705 = vmatmul.mubr.msk.bf16.gmra.mrb[4].mxu0 %vm226_vm0, %v1154_v58 }
  0x4b   : > { %1653 = vmatmul.mubr.msk.bf16.vlgmr.msra.gmra.mrb[0].mxu1 %vm226_vm0, %v564_v59  ;;  %1712 = vmatprep.mubr.msk.bf16.mxu0 %vm226_vm0, %v1268_v60 }
  0x4c   : > { %1722 = vmatpush3.bf16.msra.mxu1 %v1874_v0  ;;  %1656 = vmatprep.mubr.msk.bf16.mxu1 %vm226_vm0, %v572_v62  ;;  %v1273_v0 = vrot.slane %v1839_v4, 2 }
  0x4d   : > { %1721 = vmatprep.subr.bf16.mxu1 %v1883_v2 }
  0x4e   : > { %v1274_v20 = vsel %vm1265_vm4, %v1271_v1, %v1273_v0 }
  0x50   : > { %1723 = vmatpush3.bf16.msra.mxu1 %v1883_v2  ;;  %v718_v2 = vsel %vm426_vm2, %v715_v12, %v717_v33 }
  0x52   : > { %1713 = vmatmul.mubr.msk.bf16.vlgmr.msra.gmra.mrb[0].mxu0 %vm226_vm0, %v1270_v23 }
  0x53   : > { %1657 = vmatmul.mubr.msk.bf16.gmra.mrb[4].mxu1 %vm226_vm0, %v575_v3  ;;  %1716 = vmatprep.mubr.msk.bf16.mxu0 %vm226_vm0, %v1272_v6 }
  0x54   : > { %1668 = vmatprep.mubr.msk.bf16.mxu1 %vm226_vm0, %v716_v39 }
  0x5a   : > { %1717 = vmatmul.mubr.msk.bf16.gmra.mrb[4].mxu0 %vm226_vm0, %v1274_v20 }
  0x5f   : > { %1669 = vmatmul.mubr.msk.bf16.vlgmr.msra.gmra.mrb[4].mxu1 %vm226_vm0, %v718_v2 }
 0x11e   : > { %v1654_v7 = vpop.f32.mrb[0].mxu1 }
 0x11f   : > { %v634_v9 = vpop.f32.mrb[1].mxu1 }
 0x120   : > { %v1655_v10 = vpop.f32.mrb[2].mxu1 }
 0x121   : > { %v637_v13 = vpop.f32.mrb[3].mxu1 }
 0x125   : > { %v1714_v15 = vpop.f32.mrb[0].mxu0 }
 0x126   : > { %v1724_v16 = vadd.f32 %v1714_v15, %v1654_v7  ;;  %v1333_v53 = vpop.f32.mrb[1].mxu0 }
 0x127   : > { %v1725_v17 = vadd.f32 %v1333_v53, %v634_v9  ;;  %v1715_v18 = vpop.f32.mrb[2].mxu0 }
 0x128   : > { %1374 = vst.msk [vmem:[%s143_s28 + $0x10] sm:$0xff] %vm226_vm0, %v1724_v16  ;;  %v1726_v50 = vadd.f32 %v1715_v18, %v1655_v10  ;;  %v1336_v21 = vpop.f32.mrb[3].mxu0 }
 0x129   : > { %1372 = vst.msk [vmem:[%s143_s28] sm:$0xff] %vm226_vm0, %v1725_v17  ;;  %v1727_v22 = vadd.f32 %v1336_v21, %v637_v13 }
 0x12a   : > { %1375 = vst.msk [vmem:[%s143_s28 + $0x18] sm:$0xff] %vm226_vm0, %v1726_v50 }
 0x12b   : > { %1373 = vst.msk [vmem:[%s143_s28 + $0x8] sm:$0xff] %vm226_vm0, %v1727_v22 }
 0x12d   : > { %v1718_v24 = vpop.f32.mrb[4].mxu0 }
 0x12e   : > { %v1349_v25 = vpop.f32.mrb[5].mxu0 }
 0x12f   : > { %v1719_v26 = vpop.f32.mrb[6].mxu0 }
 0x130   : > { %v1352_v27 = vpop.f32.mrb[7].mxu0 }
 0x132   : > { %v1670_v28 = vpop.f32.mrb[4].mxu1 }
 0x133   : > { %v1728_v12 = vadd.f32 %v1718_v24, %v1670_v28  ;;  %v793_v29 = vpop.f32.mrb[5].mxu1 }
 0x134   : > { %v1729_v30 = vadd.f32 %v1349_v25, %v793_v29  ;;  %v1671_v31 = vpop.f32.mrb[6].mxu1 }
 0x135   : > { %1378 = vst.msk [vmem:[%s143_s28 + $0x30] sm:$0xff] %vm226_vm0, %v1728_v12  ;;  %v1730_v32 = vadd.f32 %v1719_v26, %v1671_v31  ;;  %v796_v34 = vpop.f32.mrb[7].mxu1 }
 0x136   : > { %1376 = vst.msk [vmem:[%s143_s28 + $0x20] sm:$0xff] %vm226_vm0, %v1729_v30  ;;  %v1731_v38 = vadd.f32 %v1352_v27, %v796_v34 }
 0x137   : > { %1380 = vst.msk [vmem:[%s143_s28 + $0x38] sm:$0x7f] %vm1379_vm5, %v1730_v32 }
 0x138   : > { %1377 = vst.msk [vmem:[%s143_s28 + $0x28] sm:$0xff] %vm226_vm0, %v1731_v38 }
 0x139 PF: > { %s12_s9 = sadd.s32 1, %s1846_s9  }
 0x13a   : > { %p9_p4 = scmp.ge.s32.totalorder %s12_s9, 6  }
 0x13c   :  { %11 = sbr.rel (!%p9_p4) target bundleno = 1 (0x1), region = 66 }

// kernel: monkey_acar_qkv_forward.11
= control target key start
LH: loop header
LB: loop body
LE: loop exit
PB: predicated region body
PF: predicated region fallthrough
CT: control target
= control target key end

     0   :  { %s1297_s9 = smov 0   ;;  %s1442_s0 = inlined_call_operand.vmem [shape: bf16[4,38,32], index: 0, kind: input, shape index: {}]   ;;  %s1443_s1 = inlined_call_operand.vmem [shape: bf16[9,32,96], index: 1, kind: input, shape index: {}]   ;;  %s1444_s2 = inlined_call_operand.vmem [shape: bf16[4,24,96], index: 2, kind: output, shape index: {}]  }
   0x1 LB: > { %s998_s10 = sadd.s32 4294967295, %s1280_s9   ;;  %p1002_p0 = scmp.ge.s32.totalorder %s1280_s9, 1  ;;  %s1280_s9 = sphi %s1297_s9, %s12_s9  }
   0x2   : > { %p112_p1 = scmp.lt.s32.totalorder %s1280_s9, 5 }
   0x4   : > { %p113_p2 = pnand %p1002_p0, %p112_p1 }
   0x5   : > { %v1243_v0 = vld [vmem:[%s1443_s1 + $0x40] sm:$0xff] (!%p113_p2)   ;;  %p134_p3 = scmp.lt.s32.totalorder (!%p113_p2), %s998_s10, 3  ;;  %v1244_v1 = vld [vmem:[%s1443_s1 + $0x10] sm:$0xff] (!%p113_p2)   ;;  %v1245_v2 = vld [vmem:[%s1443_s1 + $0x48] sm:$0xff] (!%p113_p2)   ;;  %vm168_vm0 = vsmask.f32 (!%p113_p2), 7424 }
   0x6   : > { %116 = sbr.rel (%p113_p2) target bundleno = 298 (0x12a), region = 28  ;;  %1162 = vmatprep.subr.bf16.mxu0 (!%p113_p2), %v1243_v0  ;;  %1130 = vmatprep.subr.bf16.mxu1 (!%p113_p2), %v1244_v1  ;;  %v1246_v3 = vld [vmem:[%s1443_s1 + $0x18] sm:$0xff] (!%p113_p2)   ;;  %v1252_v4 = vld [vmem:[%s1443_s1 + $0x50] sm:$0xff] (!%p113_p2)   ;;  %v1253_v5 = vld [vmem:[%s1443_s1] sm:$0xff] (!%p113_p2)   ;;  %vm494_vm1 = vsmask.f32 (!%p113_p2), 4352 }
   0x7   : > { %1163 = vmatpush3.bf16.msra.mxu0 (!%p113_p2), %v1243_v0  ;;  %1131 = vmatpush3.bf16.msra.mxu1 (!%p113_p2), %v1244_v1  ;;  %vm196_vm2 = vcmask (!%p113_p2), 261120   ;;  %v1254_v35 = vld [vmem:[%s1443_s1 + $0x58] sm:$0xff] (!%p113_p2)   ;;  %v1255_v36 = vld [vmem:[%s1443_s1 + $0x8] sm:$0xff] (!%p113_p2)   ;;  %v1259_v44 = vld [vmem:[%s1443_s1 + $0x20] sm:$0xff] (!%p113_p2)   ;;  %vm326_vm3 = vcmask (!%p113_p2), 1046528   ;;  %vm676_vm4 = vcmask (!%p113_p2), 1045504  }
   0x8   : > { %1164 = vmatprep.subr.bf16.mxu0 (!%p113_p2), %v1245_v2  ;;  %1132 = vmatprep.subr.bf16.mxu1 (!%p113_p2), %v1246_v3  ;;  %v1257_v48 = vld [vmem:[%s1443_s1 + $0x60] sm:$0xff] (!%p113_p2)   ;;  %v1261_v57 = vld [vmem:[%s1443_s1 + $0x28] sm:$0xff] (!%p113_p2)   ;;  %vm412_vm5 = vcmask (!%p113_p2), 1044480   ;;  %vm758_vm6 = vsmask.f32 (!%p113_p2), 5376  ;;  %vm939_vm7 = vcmask (!%p113_p2), 781312  }
   0x9   : > { %v1260_v61 = vld [vmem:[%s1443_s1 + $0x68] sm:$0xff] (!%p113_p2)  }
   0xb   : > { %1165 = vmatpush3.bf16.msra.mxu0 (!%p113_p2), %v1245_v2  ;;  %1133 = vmatpush3.bf16.msra.mxu1 (!%p113_p2), %v1246_v3  ;;  %v1267_v2 = vld [vmem:[%s1443_s1 + $0x30] sm:$0xff] (!%p113_p2)  }
   0xc   : > { %1170 = vmatprep.subr.bf16.mxu0 (!%p113_p2), %v1252_v4  ;;  %1138 = vmatprep.subr.bf16.mxu1 (!%p113_p2), %v1253_v5 }
   0xd   : > { %s1446_s10 = smov (!%p134_p3, %s998_s10), 3 }
   0xe   : > { %s1233_s19 = smul.u32 20, %s1446_s10 }
   0xf   : > { %s1234_s25 = smul.u32 12, %s1446_s10 }
  0x10   : > { %s1326_s24 = scalar_lea.vmem %s1442_s0, %s1233_s19 }
  0x11   : > { %v145_v6 = vld [vmem:[%s1326_s24] sm:$0xf]  ;;  %v146_v7 = vld [vmem:[%s1326_s24 + $0x4] sm:$0xf]  ;;  %v1334_v8 = vld [vmem:[%s1326_s24 + $0x8] sm:$0xf]  ;;  %s143_s28 = scalar_lea.vmem %s1444_s2, %s1234_s25 }
  0x12   : > { %v152_v9 = vld [vmem:[%s1326_s24 + $0xc] sm:$0x1]  ;;  %v1009_v10 = vcombine.low %v145_v6, %v146_v7  ;;  %v399_v11 = vld [vmem:[%s1326_s24] sm:$0x8]  ;;  %v657_v38 = vld [vmem:[%s1326_s24 + $0x4] sm:$0xc]  ;;  %v1052_v42 = vcombine.low %v146_v7, %v1334_v8  ;;  %v1015_v54 = vcombine.low %v1334_v8, %v1334_v8 }
  0x13   : > { %v1339_v12 = vld [vmem:[%s1326_s24 + $0xc] sm:$0xf]  ;;  %v1342_v13 = vcombine.low %v1334_v8, %v152_v9  ;;  %v1344_v14 = vcombine.low %v399_v11, %v146_v7  ;;  %v317_v37 = vld [vmem:[%s1326_s24] sm:$0xe]  ;;  %v1363_v39 = vld [vmem:[%s1326_s24 + $0x8] sm:$0xf] }
  0x14   : > { %v1043_v15 = vcombine.low %v1334_v8, %v1339_v12  ;;  %v170_v16 = vshrl.u32 %v1009_v10, 16  ;;  %v172_v17 = vshll.u32 %v1009_v10, 16  ;;  %v659_v40 = vld [vmem:[%s1326_s24 + $0xc] sm:$0xf]  ;;  %v660_v43 = vld [vmem:[%s1326_s24 + $0x10] sm:$0x3]  ;;  %v1024_v45 = vcombine.low %v317_v37, %v146_v7 }
  0x15   : > { %v177_v18 = vshll.u32 %v1342_v13, 16  ;;  %v181_v19 = vshrl.u32 %v1342_v13, 16  ;;  %v496_v20 = vshrl.u32 %v1344_v14, 16  ;;  %v499_v21 = vshll.u32 %v1344_v14, 16  ;;  %v749_v49 = vld [vmem:[%s1326_s24 + $0x10] sm:$0x7] }
  0x16   : > { %v174_v22 = vrot.slane %v172_v17, 1  ;;  %v504_v23 = vshrl.u32 %v1043_v15, 16  ;;  %v507_v24 = vshll.u32 %v1043_v15, 16  ;;  %v1062_v46 = vcombine.low %v657_v38, %v1363_v39  ;;  %v400_v60 = vld [vmem:[%s1326_s24 + $0xc] sm:$0x7] }
  0x17   : > { %v179_v25 = vrot.slane %v177_v18, 1  ;;  %v498_v26 = vrot.slane %v496_v20, 3  ;;  %v501_v27 = vrot.slane %v499_v21, 4  ;;  %v1063_v47 = vcombine.low %v659_v40, %v660_v43  ;;  %v845_v17 = vld [vmem:[%s1326_s24 + $0x4] sm:$0x8] }
  0x18   : > { %v175_v28 = vor.u32 %v174_v22, %v170_v16  ;;  %v506_v29 = vrot.slane %v504_v23, 3  ;;  %v509_v30 = vrot.slane %v507_v24, 4  ;;  %v327_v50 = vrot.slane %v1024_v45, 1  ;;  %v1268_v16 = vld [vmem:[%s1443_s1 + $0x78] sm:$0xff]   ;;  %v1271_v18 = vld [vmem:[%s1443_s1 + $0x80] sm:$0xff]   ;;  %v1272_v22 = vld [vmem:[%s1443_s1 + $0x88] sm:$0xff]  }
  0x19   : > { %v183_v31 = vor.u32 %v181_v19, %v179_v25  ;;  %v502_v32 = vor.u32 %v501_v27, %v498_v26  ;;  %v328_v51 = vrot.slane %v1342_v13, 1  ;;  %v677_v52 = vrot.slane %v1062_v46, 2  ;;  %v1269_v13 = vld [vmem:[%s1443_s1 + $0x38] sm:$0xff]  }
  0x1a   : > { %v180_v33 = vsel %vm168_vm0, %v175_v28, %v179_v25  ;;  %v510_v34 = vor.u32 %v509_v30, %v506_v29  ;;  %v678_v53 = vrot.slane %v1063_v47, 2  ;;  %v1385_v55 = vcombine.low %v659_v40, %v749_v49 }
  0x1b   : > { %1134 = vmatprep.mubr.msk.bf16.mxu1 %vm196_vm2, %v180_v33  ;;  %v1053_v56 = vcombine.low %v1339_v12, %v1339_v12  ;;  %v329_v58 = vsel %vm326_vm3, %v327_v50, %v328_v51  ;;  %v760_v62 = vshrl.u32 %v1062_v46, 16  ;;  %v763_v63 = vshll.u32 %v1062_v46, 16 }
  0x1c   : > { %v511_v41 = vsel %vm494_vm1, %v502_v32, %v510_v34  ;;  %1135 = vmatmul.mubr.msk.bf16.vlgmr.msra.gmra.mrb[0].mxu1 %vm196_vm2, %v183_v31  ;;  %v679_v59 = vsel %vm676_vm4, %v677_v52, %v678_v53  ;;  %v768_v0 = vshrl.u32 %v1385_v55, 16  ;;  %v771_v1 = vshll.u32 %v1385_v55, 16 }
  0x1d   : > { %1166 = vmatprep.mubr.msk.bf16.mxu0 %vm196_vm2, %v511_v41  ;;  %1139 = vmatpush3.bf16.msra.mxu1 %v1253_v5  ;;  %v1034_v3 = vcombine.low %v1334_v8, %v400_v60  ;;  %v762_v5 = vrot.slane %v760_v62, 2  ;;  %v765_v6 = vrot.slane %v763_v63, 3  ;;  %v1081_v19 = vcombine.low %v845_v17, %v1363_v39 }
  0x1e   : > { %1167 = vmatmul.mubr.msk.bf16.vlgmr.msra.gmra.mrb[0].mxu0 %vm196_vm2, %v510_v34  ;;  %1140 = vmatprep.subr.bf16.mxu1 %v1255_v36  ;;  %v770_v7 = vrot.slane %v768_v0, 2  ;;  %v773_v9 = vrot.slane %v771_v1, 3  ;;  %v855_v21 = vrot.slane %v1385_v55, 3 }
  0x1f   : > { %1171 = vmatpush3.bf16.msra.mxu0 %v1252_v4  ;;  %1142 = vmatprep.mubr.msk.bf16.mxu1 %vm196_vm2, %v1009_v10  ;;  %v1266_v4 = vld [vmem:[%s1443_s1 + $0x70] sm:$0xff]   ;;  %v413_v10 = vrot.slane %v1344_v14, 3  ;;  %v414_v11 = vrot.slane %v1034_v3, 3  ;;  %v766_v8 = vor.u32 %v765_v6, %v762_v5  ;;  %v854_v20 = vrot.slane %v1081_v19, 3 }
  0x20   : > { %1172 = vmatprep.subr.bf16.mxu0 %v1254_v35  ;;  %1174 = vmatprep.mubr.msk.bf16.mxu0 %vm196_vm2, %v1052_v42  ;;  %v774_v12 = vor.u32 %v773_v9, %v770_v7 }
  0x21   : > { %1141 = vmatpush3.bf16.msra.mxu1 %v1255_v36  ;;  %v415_v15 = vsel %vm412_vm5, %v413_v10, %v414_v11  ;;  %v856_v23 = vsel %vm412_vm5, %v854_v20, %v855_v21 }
  0x22   : > { %1146 = vmatprep.subr.bf16.mxu1 %v1259_v44  ;;  %v775_v14 = vsel %vm758_vm6, %v766_v8, %v774_v12 }
  0x23   : > { %1173 = vmatpush3.bf16.msra.mxu0 %v1254_v35 }
  0x24   : > { %1178 = vmatprep.subr.bf16.mxu0 %v1257_v48 }
  0x28   : > { %1143 = vmatmul.mubr.msk.bf16.vlgmr.msra.gmra.mrb[0].mxu1 %vm196_vm2, %v1015_v54 }
  0x29   : > { %1147 = vmatpush3.bf16.msra.mxu1 %v1259_v44  ;;  %1150 = vmatprep.mubr.msk.bf16.mxu1 %vm196_vm2, %v329_v58 }
  0x2a   : > { %1175 = vmatmul.mubr.msk.bf16.vlgmr.msra.gmra.mrb[0].mxu0 %vm196_vm2, %v1053_v56  ;;  %1148 = vmatprep.subr.bf16.mxu1 %v1261_v57 }
  0x2b   : > { %1179 = vmatpush3.bf16.msra.mxu0 %v1257_v48  ;;  %1182 = vmatprep.mubr.msk.bf16.mxu0 %vm196_vm2, %v679_v59 }
  0x2c   : > { %1180 = vmatprep.subr.bf16.mxu0 %v1260_v61 }
  0x2d   : > { %1149 = vmatpush3.bf16.msra.mxu1 %v1261_v57 }
  0x2e   : > { %1154 = vmatprep.subr.bf16.mxu1 %v1267_v2 }
  0x2f   : > { %1181 = vmatpush3.bf16.msra.mxu0 %v1260_v61 }
  0x30   : > { %1186 = vmatprep.subr.bf16.mxu0 %v1266_v4 }
  0x34   : > { %1151 = vmatmul.mubr.msk.bf16.vlgmr.msra.gmra.mrb[0].mxu1 %vm196_vm2, %v328_v51 }
  0x35   : > { %1155 = vmatpush3.bf16.msra.mxu1 %v1267_v2  ;;  %1158 = vmatprep.mubr.msk.bf16.mxu1 %vm196_vm2, %v415_v15 }
  0x36   : > { %1183 = vmatmul.mubr.msk.bf16.vlgmr.msra.gmra.mrb[0].mxu0 %vm196_vm2, %v678_v53  ;;  %1156 = vmatprep.subr.bf16.mxu1 %v1269_v13 }
  0x37   : > { %1187 = vmatpush3.bf16.msra.mxu0 %v1266_v4  ;;  %1190 = vmatprep.mubr.msk.bf16.mxu0 %vm196_vm2, %v775_v14 }
  0x38   : > { %1188 = vmatprep.subr.bf16.mxu0 %v1268_v16 }
  0x39   : > { %1157 = vmatpush3.bf16.msra.mxu1 %v1269_v13 }
  0x3b   : > { %1189 = vmatpush3.bf16.msra.mxu0 %v1268_v16 }
  0x3c   : > { %1194 = vmatprep.subr.bf16.mxu0 %v1271_v18 }
  0x40   : > { %1159 = vmatmul.mubr.msk.bf16.vlgmr.msra.gmra.mrb[0].mxu1 %vm196_vm2, %v414_v11 }
  0x42   : > { %1191 = vmatmul.mubr.msk.bf16.vlgmr.msra.gmra.mrb[0].mxu0 %vm196_vm2, %v774_v12 }
  0x43   : > { %1195 = vmatpush3.bf16.msra.mxu0 %v1271_v18  ;;  %1198 = vmatprep.mubr.msk.bf16.mxu0 %vm196_vm2, %v856_v23 }
  0x44   : > { %1196 = vmatprep.subr.bf16.mxu0 %v1272_v22 }
  0x47   : > { %1197 = vmatpush3.bf16.msra.mxu0 %v1272_v22 }
  0x4e   : > { %1199 = vmatmul.mubr.msk.bf16.vlgmr.msra.gmra.mrb[0].mxu0 %vm196_vm2, %v855_v21 }
 0x113   : > { %v1160_v24 = vpop.f32.mrb[0].mxu1 }
 0x114   : > { %v468_v25 = vpop.f32.mrb[1].mxu1 }
 0x115   : > { %v1161_v26 = vpop.f32.mrb[2].mxu1 }
 0x116   : > { %v471_v27 = vpop.f32.mrb[3].mxu1 }
 0x121   : > { %v1200_v28 = vpop.f32.mrb[0].mxu0 }
 0x122   : > { %v1202_v29 = vadd.f32 %v1200_v28, %v1160_v24  ;;  %v909_v30 = vpop.f32.mrb[1].mxu0 }
 0x123   : > { %v1203_v31 = vadd.f32 %v909_v30, %v468_v25  ;;  %v1201_v32 = vpop.f32.mrb[2].mxu0 }
 0x124   : > { %v1093_v33 = vpack.c.bf16 %v1202_v29, %v1202_v29  ;;  %v912_v34 = vpop.f32.mrb[3].mxu0 }
 0x125   : > { %v1091_v35 = vpack.c.bf16 %v1203_v31, %v1203_v31  ;;  %v1204_v36 = vadd.f32 %v912_v34, %v471_v27 }
 0x126   : > { %942 = vst.msk [vmem:[%s143_s28 + $0x8] sm:$0xf] %vm939_vm7, %v1093_v33 }
 0x127   : > { %940 = vst.msk [vmem:[%s143_s28] sm:$0xf] %vm939_vm7, %v1091_v35  ;;  %v1092_v37 = vpack.c.bf16 %v1204_v36, %v1204_v36 }
 0x129   : > { %941 = vst.msk [vmem:[%s143_s28 + $0x4] sm:$0xf] %vm939_vm7, %v1092_v37 }
 0x12a PF: > { %s12_s9 = sadd.s32 1, %s1280_s9  }
 0x12b   : > { %p9_p4 = scmp.ge.s32.totalorder %s12_s9, 6  }
 0x12d   :  { %11 = sbr.rel (!%p9_p4) target bundleno = 1 (0x1), region = 66 }

// kernel: monkey_acar_qkv_forward.13
= control target key start
LH: loop header
LB: loop body
LE: loop exit
PB: predicated region body
PF: predicated region fallthrough
CT: control target
= control target key end

     0   :  { %s1277_s9 = smov 0   ;;  %s1425_s0 = inlined_call_operand.vmem [shape: bf16[4,38,32], index: 0, kind: input, shape index: {}]   ;;  %s1426_s1 = inlined_call_operand.vmem [shape: bf16[9,32,32], index: 1, kind: input, shape index: {}]   ;;  %s1427_s2 = inlined_call_operand.vmem [shape: f32[4,24,32], index: 2, kind: output, shape index: {}]  }
   0x1 LB: > { %s984_s10 = sadd.s32 4294967295, %s1260_s9   ;;  %p988_p0 = scmp.ge.s32.totalorder %s1260_s9, 1  ;;  %s1260_s9 = sphi %s1277_s9, %s12_s9  }
   0x2   : > { %p112_p1 = scmp.lt.s32.totalorder %s1260_s9, 5 }
   0x4   : > { %p113_p2 = pnand %p988_p0, %p112_p1 }
   0x5   : > { %v1223_v0 = vld [vmem:[%s1426_s1 + $0x40] sm:$0xff] (!%p113_p2)   ;;  %p134_p3 = scmp.lt.s32.totalorder (!%p113_p2), %s984_s10, 3  ;;  %v1224_v1 = vld [vmem:[%s1426_s1 + $0x10] sm:$0xff] (!%p113_p2)   ;;  %v1225_v2 = vld [vmem:[%s1426_s1 + $0x48] sm:$0xff] (!%p113_p2)   ;;  %vm168_vm0 = vsmask.f32 (!%p113_p2), 7424 }
   0x6   : > { %116 = sbr.rel (%p113_p2) target bundleno = 296 (0x128), region = 28  ;;  %1142 = vmatprep.subr.bf16.mxu0 (!%p113_p2), %v1223_v0  ;;  %1110 = vmatprep.subr.bf16.mxu1 (!%p113_p2), %v1224_v1  ;;  %v1226_v3 = vld [vmem:[%s1426_s1 + $0x18] sm:$0xff] (!%p113_p2)   ;;  %v1232_v4 = vld [vmem:[%s1426_s1 + $0x50] sm:$0xff] (!%p113_p2)   ;;  %v1233_v5 = vld [vmem:[%s1426_s1] sm:$0xff] (!%p113_p2)   ;;  %vm494_vm1 = vsmask.f32 (!%p113_p2), 4352 }
   0x7   : > { %1143 = vmatpush3.bf16.msra.mxu0 (!%p113_p2), %v1223_v0  ;;  %1111 = vmatpush3.bf16.msra.mxu1 (!%p113_p2), %v1224_v1  ;;  %vm196_vm2 = vcmask (!%p113_p2), 261120   ;;  %v1234_v35 = vld [vmem:[%s1426_s1 + $0x58] sm:$0xff] (!%p113_p2)   ;;  %v1235_v36 = vld [vmem:[%s1426_s1 + $0x8] sm:$0xff] (!%p113_p2)   ;;  %v1239_v44 = vld [vmem:[%s1426_s1 + $0x20] sm:$0xff] (!%p113_p2)   ;;  %vm326_vm3 = vcmask (!%p113_p2), 1046528   ;;  %vm676_vm4 = vcmask (!%p113_p2), 1045504  }
   0x8   : > { %1144 = vmatprep.subr.bf16.mxu0 (!%p113_p2), %v1225_v2  ;;  %1112 = vmatprep.subr.bf16.mxu1 (!%p113_p2), %v1226_v3  ;;  %v1237_v48 = vld [vmem:[%s1426_s1 + $0x60] sm:$0xff] (!%p113_p2)   ;;  %v1241_v57 = vld [vmem:[%s1426_s1 + $0x28] sm:$0xff] (!%p113_p2)   ;;  %vm412_vm5 = vcmask (!%p113_p2), 1044480   ;;  %vm758_vm6 = vsmask.f32 (!%p113_p2), 5376 }
   0x9   : > { %v1240_v61 = vld [vmem:[%s1426_s1 + $0x68] sm:$0xff] (!%p113_p2)  }
   0xb   : > { %1145 = vmatpush3.bf16.msra.mxu0 (!%p113_p2), %v1225_v2  ;;  %1113 = vmatpush3.bf16.msra.mxu1 (!%p113_p2), %v1226_v3  ;;  %v1247_v2 = vld [vmem:[%s1426_s1 + $0x30] sm:$0xff] (!%p113_p2)  }
   0xc   : > { %1150 = vmatprep.subr.bf16.mxu0 (!%p113_p2), %v1232_v4  ;;  %1118 = vmatprep.subr.bf16.mxu1 (!%p113_p2), %v1233_v5 }
   0xd   : > { %s1429_s10 = smov (!%p134_p3, %s984_s10), 3 }
   0xe   : > { %s1213_s19 = smul.u32 20, %s1429_s10 }
   0xf   : > { %s1214_s25 = smul.u32 24, %s1429_s10 }
  0x10   : > { %s1306_s24 = scalar_lea.vmem %s1425_s0, %s1213_s19 }
  0x11   : > { %v145_v6 = vld [vmem:[%s1306_s24] sm:$0xf]  ;;  %v146_v7 = vld [vmem:[%s1306_s24 + $0x4] sm:$0xf]  ;;  %v1314_v8 = vld [vmem:[%s1306_s24 + $0x8] sm:$0xf]  ;;  %s143_s28 = scalar_lea.vmem %s1427_s2, %s1214_s25 }
  0x12   : > { %v152_v9 = vld [vmem:[%s1306_s24 + $0xc] sm:$0x1]  ;;  %v995_v10 = vcombine.low %v145_v6, %v146_v7  ;;  %v399_v11 = vld [vmem:[%s1306_s24] sm:$0x8]  ;;  %v657_v38 = vld [vmem:[%s1306_s24 + $0x4] sm:$0xc]  ;;  %v1038_v42 = vcombine.low %v146_v7, %v1314_v8  ;;  %v1001_v54 = vcombine.low %v1314_v8, %v1314_v8 }
  0x13   : > { %v1319_v12 = vld [vmem:[%s1306_s24 + $0xc] sm:$0xf]  ;;  %v1322_v13 = vcombine.low %v1314_v8, %v152_v9  ;;  %v1324_v14 = vcombine.low %v399_v11, %v146_v7  ;;  %v317_v37 = vld [vmem:[%s1306_s24] sm:$0xe]  ;;  %v1343_v39 = vld [vmem:[%s1306_s24 + $0x8] sm:$0xf] }
  0x14   : > { %v1029_v15 = vcombine.low %v1314_v8, %v1319_v12  ;;  %v170_v16 = vshrl.u32 %v995_v10, 16  ;;  %v172_v17 = vshll.u32 %v995_v10, 16  ;;  %v659_v40 = vld [vmem:[%s1306_s24 + $0xc] sm:$0xf]  ;;  %v660_v43 = vld [vmem:[%s1306_s24 + $0x10] sm:$0x3]  ;;  %v1010_v45 = vcombine.low %v317_v37, %v146_v7 }
  0x15   : > { %v177_v18 = vshll.u32 %v1322_v13, 16  ;;  %v181_v19 = vshrl.u32 %v1322_v13, 16  ;;  %v496_v20 = vshrl.u32 %v1324_v14, 16  ;;  %v499_v21 = vshll.u32 %v1324_v14, 16  ;;  %v749_v49 = vld [vmem:[%s1306_s24 + $0x10] sm:$0x7] }
  0x16   : > { %v174_v22 = vrot.slane %v172_v17, 1  ;;  %v504_v23 = vshrl.u32 %v1029_v15, 16  ;;  %v507_v24 = vshll.u32 %v1029_v15, 16  ;;  %v1048_v46 = vcombine.low %v657_v38, %v1343_v39  ;;  %v400_v60 = vld [vmem:[%s1306_s24 + $0xc] sm:$0x7] }
  0x17   : > { %v179_v25 = vrot.slane %v177_v18, 1  ;;  %v498_v26 = vrot.slane %v496_v20, 3  ;;  %v501_v27 = vrot.slane %v499_v21, 4  ;;  %v1049_v47 = vcombine.low %v659_v40, %v660_v43  ;;  %v845_v17 = vld [vmem:[%s1306_s24 + $0x4] sm:$0x8] }
  0x18   : > { %v175_v28 = vor.u32 %v174_v22, %v170_v16  ;;  %v506_v29 = vrot.slane %v504_v23, 3  ;;  %v509_v30 = vrot.slane %v507_v24, 4  ;;  %v327_v50 = vrot.slane %v1010_v45, 1  ;;  %v1248_v16 = vld [vmem:[%s1426_s1 + $0x78] sm:$0xff]   ;;  %v1251_v18 = vld [vmem:[%s1426_s1 + $0x80] sm:$0xff]   ;;  %v1252_v22 = vld [vmem:[%s1426_s1 + $0x88] sm:$0xff]  }
  0x19   : > { %v183_v31 = vor.u32 %v181_v19, %v179_v25  ;;  %v502_v32 = vor.u32 %v501_v27, %v498_v26  ;;  %v328_v51 = vrot.slane %v1322_v13, 1  ;;  %v677_v52 = vrot.slane %v1048_v46, 2  ;;  %v1249_v13 = vld [vmem:[%s1426_s1 + $0x38] sm:$0xff]  }
  0x1a   : > { %v180_v33 = vsel %vm168_vm0, %v175_v28, %v179_v25  ;;  %v510_v34 = vor.u32 %v509_v30, %v506_v29  ;;  %v678_v53 = vrot.slane %v1049_v47, 2  ;;  %v1365_v55 = vcombine.low %v659_v40, %v749_v49 }
  0x1b   : > { %1114 = vmatprep.mubr.msk.bf16.mxu1 %vm196_vm2, %v180_v33  ;;  %v1039_v56 = vcombine.low %v1319_v12, %v1319_v12  ;;  %v329_v58 = vsel %vm326_vm3, %v327_v50, %v328_v51  ;;  %v760_v62 = vshrl.u32 %v1048_v46, 16  ;;  %v763_v63 = vshll.u32 %v1048_v46, 16 }
  0x1c   : > { %v511_v41 = vsel %vm494_vm1, %v502_v32, %v510_v34  ;;  %1115 = vmatmul.mubr.msk.bf16.vlgmr.msra.gmra.mrb[0].mxu1 %vm196_vm2, %v183_v31  ;;  %v679_v59 = vsel %vm676_vm4, %v677_v52, %v678_v53  ;;  %v768_v0 = vshrl.u32 %v1365_v55, 16  ;;  %v771_v1 = vshll.u32 %v1365_v55, 16 }
  0x1d   : > { %1146 = vmatprep.mubr.msk.bf16.mxu0 %vm196_vm2, %v511_v41  ;;  %1119 = vmatpush3.bf16.msra.mxu1 %v1233_v5  ;;  %v1020_v3 = vcombine.low %v1314_v8, %v400_v60  ;;  %v762_v5 = vrot.slane %v760_v62, 2  ;;  %v765_v6 = vrot.slane %v763_v63, 3  ;;  %v1067_v19 = vcombine.low %v845_v17, %v1343_v39 }
  0x1e   : > { %1147 = vmatmul.mubr.msk.bf16.vlgmr.msra.gmra.mrb[0].mxu0 %vm196_vm2, %v510_v34  ;;  %1120 = vmatprep.subr.bf16.mxu1 %v1235_v36  ;;  %v770_v7 = vrot.slane %v768_v0, 2  ;;  %v773_v9 = vrot.slane %v771_v1, 3  ;;  %v855_v21 = vrot.slane %v1365_v55, 3 }
  0x1f   : > { %1151 = vmatpush3.bf16.msra.mxu0 %v1232_v4  ;;  %1122 = vmatprep.mubr.msk.bf16.mxu1 %vm196_vm2, %v995_v10  ;;  %v1246_v4 = vld [vmem:[%s1426_s1 + $0x70] sm:$0xff]   ;;  %v413_v10 = vrot.slane %v1324_v14, 3  ;;  %v414_v11 = vrot.slane %v1020_v3, 3  ;;  %v766_v8 = vor.u32 %v765_v6, %v762_v5  ;;  %v854_v20 = vrot.slane %v1067_v19, 3 }
  0x20   : > { %1152 = vmatprep.subr.bf16.mxu0 %v1234_v35  ;;  %1154 = vmatprep.mubr.msk.bf16.mxu0 %vm196_vm2, %v1038_v42  ;;  %v774_v12 = vor.u32 %v773_v9, %v770_v7 }
  0x21   : > { %1121 = vmatpush3.bf16.msra.mxu1 %v1235_v36  ;;  %v415_v15 = vsel %vm412_vm5, %v413_v10, %v414_v11  ;;  %v856_v23 = vsel %vm412_vm5, %v854_v20, %v855_v21 }
  0x22   : > { %1126 = vmatprep.subr.bf16.mxu1 %v1239_v44  ;;  %v775_v14 = vsel %vm758_vm6, %v766_v8, %v774_v12 }
  0x23   : > { %1153 = vmatpush3.bf16.msra.mxu0 %v1234_v35 }
  0x24   : > { %1158 = vmatprep.subr.bf16.mxu0 %v1237_v48 }
  0x28   : > { %1123 = vmatmul.mubr.msk.bf16.vlgmr.msra.gmra.mrb[0].mxu1 %vm196_vm2, %v1001_v54 }
  0x29   : > { %1127 = vmatpush3.bf16.msra.mxu1 %v1239_v44  ;;  %1130 = vmatprep.mubr.msk.bf16.mxu1 %vm196_vm2, %v329_v58 }
  0x2a   : > { %1155 = vmatmul.mubr.msk.bf16.vlgmr.msra.gmra.mrb[0].mxu0 %vm196_vm2, %v1039_v56  ;;  %1128 = vmatprep.subr.bf16.mxu1 %v1241_v57 }
  0x2b   : > { %1159 = vmatpush3.bf16.msra.mxu0 %v1237_v48  ;;  %1162 = vmatprep.mubr.msk.bf16.mxu0 %vm196_vm2, %v679_v59 }
  0x2c   : > { %1160 = vmatprep.subr.bf16.mxu0 %v1240_v61 }
  0x2d   : > { %1129 = vmatpush3.bf16.msra.mxu1 %v1241_v57 }
  0x2e   : > { %1134 = vmatprep.subr.bf16.mxu1 %v1247_v2 }
  0x2f   : > { %1161 = vmatpush3.bf16.msra.mxu0 %v1240_v61 }
  0x30   : > { %1166 = vmatprep.subr.bf16.mxu0 %v1246_v4 }
  0x34   : > { %1131 = vmatmul.mubr.msk.bf16.vlgmr.msra.gmra.mrb[0].mxu1 %vm196_vm2, %v328_v51 }
  0x35   : > { %1135 = vmatpush3.bf16.msra.mxu1 %v1247_v2  ;;  %1138 = vmatprep.mubr.msk.bf16.mxu1 %vm196_vm2, %v415_v15 }
  0x36   : > { %1163 = vmatmul.mubr.msk.bf16.vlgmr.msra.gmra.mrb[0].mxu0 %vm196_vm2, %v678_v53  ;;  %1136 = vmatprep.subr.bf16.mxu1 %v1249_v13 }
  0x37   : > { %1167 = vmatpush3.bf16.msra.mxu0 %v1246_v4  ;;  %1170 = vmatprep.mubr.msk.bf16.mxu0 %vm196_vm2, %v775_v14 }
  0x38   : > { %1168 = vmatprep.subr.bf16.mxu0 %v1248_v16 }
  0x39   : > { %1137 = vmatpush3.bf16.msra.mxu1 %v1249_v13 }
  0x3b   : > { %1169 = vmatpush3.bf16.msra.mxu0 %v1248_v16 }
  0x3c   : > { %1174 = vmatprep.subr.bf16.mxu0 %v1251_v18 }
  0x40   : > { %1139 = vmatmul.mubr.msk.bf16.vlgmr.msra.gmra.mrb[0].mxu1 %vm196_vm2, %v414_v11 }
  0x42   : > { %1171 = vmatmul.mubr.msk.bf16.vlgmr.msra.gmra.mrb[0].mxu0 %vm196_vm2, %v774_v12 }
  0x43   : > { %1175 = vmatpush3.bf16.msra.mxu0 %v1251_v18  ;;  %1178 = vmatprep.mubr.msk.bf16.mxu0 %vm196_vm2, %v856_v23 }
  0x44   : > { %1176 = vmatprep.subr.bf16.mxu0 %v1252_v22 }
  0x47   : > { %1177 = vmatpush3.bf16.msra.mxu0 %v1252_v22 }
  0x4e   : > { %1179 = vmatmul.mubr.msk.bf16.vlgmr.msra.gmra.mrb[0].mxu0 %vm196_vm2, %v855_v21 }
 0x113   : > { %v1140_v24 = vpop.f32.mrb[0].mxu1 }
 0x114   : > { %v468_v25 = vpop.f32.mrb[1].mxu1 }
 0x115   : > { %v1141_v26 = vpop.f32.mrb[2].mxu1 }
 0x116   : > { %v471_v27 = vpop.f32.mrb[3].mxu1 }
 0x121   : > { %v1180_v28 = vpop.f32.mrb[0].mxu0 }
 0x122   : > { %v1182_v29 = vadd.f32 %v1180_v28, %v1140_v24  ;;  %v909_v30 = vpop.f32.mrb[1].mxu0 }
 0x123   : > { %v1183_v31 = vadd.f32 %v909_v30, %v468_v25  ;;  %v1181_v32 = vpop.f32.mrb[2].mxu0 }
 0x124   : > { %928 = vst.msk [vmem:[%s143_s28 + $0x10] sm:$0xff] %vm196_vm2, %v1182_v29  ;;  %v912_v33 = vpop.f32.mrb[3].mxu0 }
 0x125   : > { %926 = vst.msk [vmem:[%s143_s28] sm:$0xff] %vm196_vm2, %v1183_v31  ;;  %v1184_v34 = vadd.f32 %v912_v33, %v471_v27 }
 0x127   : > { %927 = vst.msk [vmem:[%s143_s28 + $0x8] sm:$0xff] %vm196_vm2, %v1184_v34 }
 0x128 PF: > { %s12_s9 = sadd.s32 1, %s1260_s9  }
 0x129   : > { %p9_p4 = scmp.ge.s32.totalorder %s12_s9, 6  }
 0x12b   :  { %11 = sbr.rel (!%p9_p4) target bundleno = 1 (0x1), region = 66 }

// kernel: monkey_acar_qkv_forward.14
= control target key start
LH: loop header
LB: loop body
LE: loop exit
PB: predicated region body
PF: predicated region fallthrough
CT: control target
= control target key end

     0   :  { %vm59_vm0 = vcmask 261120   ;;  %vm149_vm1 = vcmask 1041409   ;;  %vm151_vm2 = vcmask 1042434   ;;  %vm153_vm3 = vcmask 1043459   ;;  %s302_s0 = inlined_call_operand.vmem [shape: f32[8,16,32], index: 0, kind: input, shape index: {}]   ;;  %s303_s1 = inlined_call_operand.vmem [shape: f32[8,16,32], index: 1, kind: input, shape index: {}]   ;;  %s304_s2 = inlined_call_operand.vmem [shape: f32[8,32], index: 2, kind: output, shape index: {}]  }
   0x1   :  { %v11_v0 = vld [vmem:[%s302_s0] sm:$0xff]  ;;  %v12_v1 = vld [vmem:[%s302_s0 + $0x8] sm:$0xff]  ;;  %v13_v2 = vld [vmem:[%s302_s0 + $0x10] sm:$0xff]  ;;  %vm155_vm4 = vcmask 1044484   ;;  %vm157_vm5 = vcmask 1045509   ;;  %vm159_vm6 = vcmask 1046534  }
   0x2   :  { %v14_v3 = vld [vmem:[%s302_s0 + $0x18] sm:$0xff]  ;;  %v15_v4 = vld [vmem:[%s302_s0 + $0x20] sm:$0xff]  ;;  %v16_v5 = vld [vmem:[%s302_s0 + $0x28] sm:$0xff]  ;;  %vm161_vm7 = vcmask 1047559  }
   0x3   :  { %v17_v6 = vld [vmem:[%s302_s0 + $0x30] sm:$0xff]  ;;  %v18_v7 = vld [vmem:[%s302_s0 + $0x38] sm:$0xff]  ;;  %v19_v8 = vld [vmem:[%s302_s0 + $0x40] sm:$0xff] }
   0x4   :  { %v20_v9 = vld [vmem:[%s302_s0 + $0x48] sm:$0xff]  ;;  %v21_v10 = vld [vmem:[%s302_s0 + $0x50] sm:$0xff]  ;;  %v22_v11 = vld [vmem:[%s302_s0 + $0x58] sm:$0xff] }
   0x5   :  { %v23_v12 = vld [vmem:[%s302_s0 + $0x60] sm:$0xff]  ;;  %v24_v13 = vld [vmem:[%s302_s0 + $0x68] sm:$0xff]  ;;  %v25_v16 = vld [vmem:[%s302_s0 + $0x70] sm:$0xff] }
   0x6   :  { %v27_v14 = vld [vmem:[%s303_s1] sm:$0xff]  ;;  %v28_v15 = vld [vmem:[%s303_s1 + $0x8] sm:$0xff]  ;;  %v26_v17 = vld [vmem:[%s302_s0 + $0x78] sm:$0xff] }
   0x7   :  { %v29_v18 = vld [vmem:[%s303_s1 + $0x10] sm:$0xff]  ;;  %v30_v19 = vld [vmem:[%s303_s1 + $0x18] sm:$0xff]  ;;  %v31_v20 = vld [vmem:[%s303_s1 + $0x20] sm:$0xff]  ;;  %v43_v21 = vadd.f32 %v27_v14, %v11_v0  ;;  %v44_v22 = vadd.f32 %v28_v15, %v12_v1 }
   0x8   :  { %v32_v23 = vld [vmem:[%s303_s1 + $0x28] sm:$0xff]  ;;  %v33_v24 = vld [vmem:[%s303_s1 + $0x30] sm:$0xff]  ;;  %v34_v25 = vld [vmem:[%s303_s1 + $0x38] sm:$0xff]  ;;  %v45_v26 = vadd.f32 %v29_v18, %v13_v2  ;;  %v46_v27 = vadd.f32 %v30_v19, %v14_v3  ;;  %v47_v28 = vadd.f32 %v31_v20, %v15_v4 }
   0x9   :  { %v35_v29 = vld [vmem:[%s303_s1 + $0x40] sm:$0xff]  ;;  %v36_v30 = vld [vmem:[%s303_s1 + $0x48] sm:$0xff]  ;;  %v37_v31 = vld [vmem:[%s303_s1 + $0x50] sm:$0xff]  ;;  %v48_v32 = vadd.f32 %v32_v23, %v16_v5  ;;  %v49_v33 = vadd.f32 %v33_v24, %v17_v6  ;;  %v50_v34 = vadd.f32 %v34_v25, %v18_v7  ;;  %v60_v35 = vsel %vm59_vm0, %v43_v21, 0.0 }
   0xa   :  { %v38_v36 = vld [vmem:[%s303_s1 + $0x58] sm:$0xff]  ;;  %v39_v37 = vld [vmem:[%s303_s1 + $0x60] sm:$0xff]  ;;  %v40_v38 = vld [vmem:[%s303_s1 + $0x68] sm:$0xff]  ;;  %v51_v39 = vadd.f32 %v35_v29, %v19_v8  ;;  %v52_v40 = vadd.f32 %v36_v30, %v20_v9  ;;  %v53_v41 = vadd.f32 %v37_v31, %v21_v10  ;;  %v61_v42 = vsel %vm59_vm0, %v44_v22, 0.0 }
   0xb   :  { %v41_v43 = vld [vmem:[%s303_s1 + $0x70] sm:$0xff]  ;;  %v42_v44 = vld [vmem:[%s303_s1 + $0x78] sm:$0xff]  ;;  %v54_v45 = vadd.f32 %v38_v36, %v22_v11  ;;  %v55_v46 = vadd.f32 %v39_v37, %v23_v12  ;;  %v56_v47 = vadd.f32 %v40_v38, %v24_v13  ;;  %v62_v48 = vadd.f32 %v61_v42, %v60_v35 }
   0xc   :  { %v57_v49 = vadd.f32 %v41_v43, %v25_v16  ;;  %v58_v50 = vadd.f32 %v42_v44, %v26_v17  ;;  %v69_v51 = vsel %vm59_vm0, %v45_v26, 0.0  ;;  %v70_v52 = vsel %vm59_vm0, %v46_v27, 0.0 }
   0xd   :  { %v63_v53 = vrot.slane %v62_v48, 4  ;;  %v71_v54 = vadd.f32 %v70_v52, %v69_v51  ;;  %v78_v55 = vsel %vm59_vm0, %v47_v28, 0.0  ;;  %v79_v56 = vsel %vm59_vm0, %v48_v32, 0.0 }
   0xe   :  { %v80_v57 = vadd.f32 %v79_v56, %v78_v55  ;;  %v87_v58 = vsel %vm59_vm0, %v49_v33, 0.0  ;;  %v88_v59 = vsel %vm59_vm0, %v50_v34, 0.0  ;;  %v96_v60 = vsel %vm59_vm0, %v51_v39, 0.0 }
   0xf   :  { %v64_v61 = vadd.f32 %v63_v53, %v62_v48  ;;  %v72_v62 = vrot.slane %v71_v54, 4  ;;  %v89_v63 = vadd.f32 %v88_v59, %v87_v58  ;;  %v97_v0 = vsel %vm59_vm0, %v52_v40, 0.0 }
  0x10   :  { %v81_v1 = vrot.slane %v80_v57, 4  ;;  %v98_v2 = vadd.f32 %v97_v0, %v96_v60  ;;  %v105_v3 = vsel %vm59_vm0, %v53_v41, 0.0  ;;  %v106_v4 = vsel %vm59_vm0, %v54_v45, 0.0 }
  0x11   :  { %v65_v5 = vrot.slane %v64_v61, 2  ;;  %v73_v6 = vadd.f32 %v72_v62, %v71_v54  ;;  %v90_v7 = vrot.slane %v89_v63, 4  ;;  %v107_v8 = vadd.f32 %v106_v4, %v105_v3 }
  0x12   :  { %v82_v9 = vadd.f32 %v81_v1, %v80_v57  ;;  %v99_v10 = vrot.slane %v98_v2, 4  ;;  %v114_v11 = vsel %vm59_vm0, %v55_v46, 0.0  ;;  %v115_v12 = vsel %vm59_vm0, %v56_v47, 0.0 }
  0x13   :  { %v66_v13 = vadd.f32 %v65_v5, %v64_v61  ;;  %v74_v14 = vrot.slane %v73_v6, 2  ;;  %v91_v15 = vadd.f32 %v90_v7, %v89_v63  ;;  %v108_v16 = vrot.slane %v107_v8, 4 }
  0x14   :  { %v83_v17 = vrot.slane %v82_v9, 2  ;;  %v100_v18 = vadd.f32 %v99_v10, %v98_v2  ;;  %v116_v19 = vadd.f32 %v115_v12, %v114_v11  ;;  %v123_v20 = vsel %vm59_vm0, %v57_v49, 0.0 }
  0x15   :  { %v67_v21 = vrot.slane %v66_v13, 1  ;;  %v75_v22 = vadd.f32 %v74_v14, %v73_v6  ;;  %v92_v23 = vrot.slane %v91_v15, 2  ;;  %v109_v24 = vadd.f32 %v108_v16, %v107_v8 }
  0x16   :  { %v84_v25 = vadd.f32 %v83_v17, %v82_v9  ;;  %v101_v26 = vrot.slane %v100_v18, 2  ;;  %v117_v27 = vrot.slane %v116_v19, 4  ;;  %v124_v28 = vsel %vm59_vm0, %v58_v50, 0.0 }
  0x17   :  { %v68_v29 = vadd.f32 %v67_v21, %v66_v13  ;;  %v76_v30 = vrot.slane %v75_v22, 1  ;;  %v93_v31 = vadd.f32 %v92_v23, %v91_v15  ;;  %v110_v32 = vrot.slane %v109_v24, 2 }
  0x18   :  { %v85_v33 = vrot.slane %v84_v25, 1  ;;  %v102_v34 = vadd.f32 %v101_v26, %v100_v18  ;;  %v118_v35 = vadd.f32 %v117_v27, %v116_v19  ;;  %v125_v36 = vadd.f32 %v124_v28, %v123_v20 }
  0x19   :  { %v77_v37 = vadd.f32 %v76_v30, %v75_v22  ;;  %v94_v38 = vrot.slane %v93_v31, 1  ;;  %v111_v39 = vadd.f32 %v110_v32, %v109_v24  ;;  %v133_v40 = vmul.f32 0.0625, %v68_v29 }
  0x1a   :  { %v86_v41 = vadd.f32 %v85_v33, %v84_v25  ;;  %v103_v42 = vrot.slane %v102_v34, 1  ;;  %v119_v43 = vrot.slane %v118_v35, 2  ;;  %v126_v44 = vrot.slane %v125_v36, 4 }
  0x1b   :  { %v95_v45 = vadd.f32 %v94_v38, %v93_v31  ;;  %v112_v46 = vrot.slane %v111_v39, 1  ;;  %v134_v47 = vmul.f32 0.0625, %v77_v37 }
  0x1c   :  { %v104_v48 = vadd.f32 %v103_v42, %v102_v34  ;;  %v120_v49 = vadd.f32 %v119_v43, %v118_v35  ;;  %v127_v50 = vadd.f32 %v126_v44, %v125_v36  ;;  %v135_v51 = vmul.f32 0.0625, %v86_v41 }
  0x1d   :  { %v113_v52 = vadd.f32 %v112_v46, %v111_v39  ;;  %v136_v53 = vmul.f32 0.0625, %v95_v45  ;;  %v150_v54 = vsel %vm149_vm1, %v134_v47, %v133_v40 }
  0x1e   :  { %v121_v55 = vrot.slane %v120_v49, 1  ;;  %v128_v56 = vrot.slane %v127_v50, 2  ;;  %v137_v57 = vmul.f32 0.0625, %v104_v48  ;;  %v152_v58 = vsel %vm151_vm2, %v135_v51, %v150_v54 }
  0x1f   :  { %v138_v59 = vmul.f32 0.0625, %v113_v52  ;;  %v154_v60 = vsel %vm153_vm3, %v136_v53, %v152_v58 }
  0x20   :  { %v122_v61 = vadd.f32 %v121_v55, %v120_v49  ;;  %v129_v62 = vadd.f32 %v128_v56, %v127_v50  ;;  %v156_v63 = vsel %vm155_vm4, %v137_v57, %v154_v60 }
  0x21   :  { %v158_v2 = vsel %vm157_vm5, %v138_v59, %v156_v63 }
  0x22   :  { %v130_v0 = vrot.slane %v129_v62, 1  ;;  %v139_v1 = vmul.f32 0.0625, %v122_v61 }
  0x24   :  { %v131_v3 = vadd.f32 %v130_v0, %v129_v62  ;;  %v160_v4 = vsel %vm159_vm6, %v139_v1, %v158_v2 }
  0x26   :  { %v140_v5 = vmul.f32 0.0625, %v131_v3 }
  0x28   :  { %v162_v6 = vsel %vm161_vm7, %v140_v5, %v160_v4 }
  0x29   :  { %164 = vst.msk [vmem:[%s304_s2] sm:$0xff] %vm59_vm0, %v162_v6 }

// kernel: monkey_acar_qkv_forward.12
= control target key start
LH: loop header
LB: loop body
LE: loop exit
PB: predicated region body
PF: predicated region fallthrough
CT: control target
= control target key end

     0   :  { %vm72_vm0 = vcmask 261120   ;;  %v2426_v0 = vmov 0.0   ;;  %vm2427_vm1 = vmmov 0   ;;  %vm842_vm2 = vcmask 27648   ;;  %s3268_s1 = inlined_call_operand.vmem [shape: bf16[16,4,32], index: 1, kind: input, shape index: {}]   ;;  %s3269_s0 = inlined_call_operand.vmem [shape: bf16[16,4,32], index: 0, kind: input, shape index: {}]   ;;  %s3270_s3 = inlined_call_operand.vmem [shape: f32[4,4], index: 3, kind: input, shape index: {}]   ;;  %s3271_s2 = inlined_call_operand.vmem [shape: bf16[16,4,32], index: 2, kind: input, shape index: {}]   ;;  %s3272_s4 = inlined_call_operand.vmem [shape: f32[1,1,32], index: 4, kind: input, shape index: {}]   ;;  %s3273_s5 = inlined_call_operand.vmem [shape: f32[1,1,32], index: 5, kind: input, shape index: {}]   ;;  %s3274_s6 = inlined_call_operand.vmem [shape: f32[16,4,32], index: 6, kind: output, shape index: {}]  }
   0x1   :  { %2166 = vmatprep.subr.bf16.mxu0 %v2426_v0  ;;  %2172 = vmatprep.subr.bf16.mxu1 %v2426_v0  ;;  %v40_v1 = vld [vmem:[%s3268_s1] sm:$0x3]  ;;  %v41_v2 = vld [vmem:[%s3268_s1 + $0x2] sm:$0x3]  ;;  %v42_v5 = vld [vmem:[%s3268_s1 + $0x4] sm:$0x3] }
   0x2   :  { %v77_v3 = vsel %vm72_vm0, %v40_v1, 0  ;;  %v123_v4 = vsel %vm72_vm0, %v41_v2, 0  ;;  %2168 = vmatprep.mubr.msk.bf16.mxu0 %vm2427_vm1, %v2426_v0  ;;  %2174 = vmatprep.mubr.msk.bf16.mxu1 %vm2427_vm1, %v2426_v0  ;;  %v43_v6 = vld [vmem:[%s3268_s1 + $0x6] sm:$0x3]  ;;  %v24_v7 = vld [vmem:[%s3269_s0] sm:$0x3] }
   0x3   :  { %2167 = vmatpush3.bf16.xpose.msra.mxu0 %v77_v3  ;;  %2173 = vmatpush3.bf16.xpose.msra.mxu1 %v123_v4  ;;  %v25_v8 = vld [vmem:[%s3269_s0 + $0x2] sm:$0x3]  ;;  %v169_v9 = vsel %vm72_vm0, %v42_v5, 0  ;;  %v215_v10 = vsel %vm72_vm0, %v43_v6, 0  ;;  %v44_v11 = vld [vmem:[%s3268_s1 + $0x8] sm:$0x3] }
   0x4   :  { %2178 = vmatprep.subr.bf16.mxu0 %v2426_v0  ;;  %2184 = vmatprep.subr.bf16.mxu1 %v2426_v0  ;;  %v45_v12 = vld [vmem:[%s3268_s1 + $0xa] sm:$0x3]  ;;  %v26_v13 = vld [vmem:[%s3269_s0 + $0x4] sm:$0x3]  ;;  %v27_v14 = vld [vmem:[%s3269_s0 + $0x6] sm:$0x3] }
   0x5   :  { %v261_v15 = vsel %vm72_vm0, %v44_v11, 0  ;;  %v307_v16 = vsel %vm72_vm0, %v45_v12, 0  ;;  %v46_v17 = vld [vmem:[%s3268_s1 + $0xc] sm:$0x3]  ;;  %v47_v18 = vld [vmem:[%s3268_s1 + $0xe] sm:$0x3] }
   0x6   :  { %v28_v19 = vld [vmem:[%s3269_s0 + $0x8] sm:$0x3]  ;;  %v29_v20 = vld [vmem:[%s3269_s0 + $0xa] sm:$0x3]  ;;  %v353_v21 = vsel %vm72_vm0, %v46_v17, 0  ;;  %v399_v22 = vsel %vm72_vm0, %v47_v18, 0 }
   0x7   :  { %v48_v23 = vld [vmem:[%s3268_s1 + $0x10] sm:$0x3]  ;;  %v49_v24 = vld [vmem:[%s3268_s1 + $0x12] sm:$0x3]  ;;  %v30_v25 = vld [vmem:[%s3269_s0 + $0xc] sm:$0x3] }
   0x8   :  { %v31_v26 = vld [vmem:[%s3269_s0 + $0xe] sm:$0x3]  ;;  %v445_v27 = vsel %vm72_vm0, %v48_v23, 0  ;;  %v491_v28 = vsel %vm72_vm0, %v49_v24, 0  ;;  %v50_v29 = vld [vmem:[%s3268_s1 + $0x14] sm:$0x3] }
   0x9   :  { %v51_v30 = vld [vmem:[%s3268_s1 + $0x16] sm:$0x3]  ;;  %v32_v31 = vld [vmem:[%s3269_s0 + $0x10] sm:$0x3]  ;;  %v33_v32 = vld [vmem:[%s3269_s0 + $0x12] sm:$0x3] }
   0xa   :  { %2169 = vmatmul.mubr.msk.bf16.vlgmr.msra.gmra.mrb[0].mxu0 %vm72_vm0, %v24_v7  ;;  %2175 = vmatmul.mubr.msk.bf16.vlgmr.msra.gmra.mrb[0].mxu1 %vm72_vm0, %v25_v8  ;;  %v537_v33 = vsel %vm72_vm0, %v50_v29, 0  ;;  %v583_v34 = vsel %vm72_vm0, %v51_v30, 0  ;;  %v52_v35 = vld [vmem:[%s3268_s1 + $0x18] sm:$0x3]  ;;  %v53_v36 = vld [vmem:[%s3268_s1 + $0x1a] sm:$0x3] }
   0xb   :  { %2179 = vmatpush3.bf16.xpose.msra.mxu0 %v169_v9  ;;  %2185 = vmatpush3.bf16.xpose.msra.mxu1 %v215_v10  ;;  %v34_v37 = vld [vmem:[%s3269_s0 + $0x14] sm:$0x3]  ;;  %v35_v38 = vld [vmem:[%s3269_s0 + $0x16] sm:$0x3]  ;;  %v629_v39 = vsel %vm72_vm0, %v52_v35, 0  ;;  %v675_v40 = vsel %vm72_vm0, %v53_v36, 0 }
   0xc   :  { %2180 = vmatprep.mubr.msk.bf16.mxu0 %vm2427_vm1, %v2426_v0  ;;  %2186 = vmatprep.mubr.msk.bf16.mxu1 %vm2427_vm1, %v2426_v0  ;;  %v54_v41 = vld [vmem:[%s3268_s1 + $0x1c] sm:$0x3]  ;;  %v55_v42 = vld [vmem:[%s3268_s1 + $0x1e] sm:$0x3]  ;;  %v36_v43 = vld [vmem:[%s3269_s0 + $0x18] sm:$0x3] }
   0xd   :  { %2190 = vmatprep.subr.bf16.mxu0 %v2426_v0  ;;  %2196 = vmatprep.subr.bf16.mxu1 %v2426_v0  ;;  %v37_v44 = vld [vmem:[%s3269_s0 + $0x1a] sm:$0x3]  ;;  %v721_v45 = vsel %vm72_vm0, %v54_v41, 0  ;;  %v767_v46 = vsel %vm72_vm0, %v55_v42, 0  ;;  %v38_v47 = vld [vmem:[%s3269_s0 + $0x1c] sm:$0x3] }
   0xe   :  { %v39_v48 = vld [vmem:[%s3269_s0 + $0x1e] sm:$0x3]  ;;  %v2648_v51 = vld [vmem:[%s3270_s3] sm:$0xf]  ;;  %vm1039_vm3 = vcmask 1041408   ;;  %vm1035_vm4 = vcmask 31744  }
   0xf   :  { %vm1773_vm5 = vcmask 257024   ;;  %vm1822_vm6 = vcmask 1043456  }
  0x12   :  { %2181 = vmatmul.mubr.msk.bf16.vlgmr.msra.gmra.mrb[4].mxu0 %vm72_vm0, %v26_v13  ;;  %2187 = vmatmul.mubr.msk.bf16.vlgmr.msra.gmra.mrb[4].mxu1 %vm72_vm0, %v27_v14 }
  0x13   :  { %2191 = vmatpush3.bf16.xpose.msra.mxu0 %v261_v15  ;;  %2197 = vmatpush3.bf16.xpose.msra.mxu1 %v307_v16 }
  0x14   :  { %2192 = vmatprep.mubr.msk.bf16.mxu0 %vm2427_vm1, %v2426_v0  ;;  %2198 = vmatprep.mubr.msk.bf16.mxu1 %vm2427_vm1, %v2426_v0 }
  0x15   :  { %2202 = vmatprep.subr.bf16.mxu0 %v2426_v0  ;;  %2208 = vmatprep.subr.bf16.mxu1 %v2426_v0 }
  0x1a   :  { %2193 = vmatmul.mubr.msk.bf16.vlgmr.msra.gmra.mrb[8].mxu0 %vm72_vm0, %v28_v19  ;;  %2199 = vmatmul.mubr.msk.bf16.vlgmr.msra.gmra.mrb[8].mxu1 %vm72_vm0, %v29_v20 }
  0x1b   :  { %2203 = vmatpush3.bf16.xpose.msra.mxu0 %v353_v21  ;;  %2209 = vmatpush3.bf16.xpose.msra.mxu1 %v399_v22 }
  0x1c   :  { %2204 = vmatprep.mubr.msk.bf16.mxu0 %vm2427_vm1, %v2426_v0  ;;  %2210 = vmatprep.mubr.msk.bf16.mxu1 %vm2427_vm1, %v2426_v0 }
  0x1d   :  { %2214 = vmatprep.subr.bf16.mxu0 %v2426_v0  ;;  %2220 = vmatprep.subr.bf16.mxu1 %v2426_v0 }
  0x22   :  { %2205 = vmatmul.mubr.msk.bf16.vlgmr.msra.gmra.mrb[12].mxu0 %vm72_vm0, %v30_v25  ;;  %2211 = vmatmul.mubr.msk.bf16.vlgmr.msra.gmra.mrb[12].mxu1 %vm72_vm0, %v31_v26 }
  0x23   :  { %2215 = vmatpush3.bf16.xpose.msra.mxu0 %v445_v27  ;;  %2221 = vmatpush3.bf16.xpose.msra.mxu1 %v491_v28 }
  0x24   :  { %2216 = vmatprep.mubr.msk.bf16.mxu0 %vm2427_vm1, %v2426_v0  ;;  %2222 = vmatprep.mubr.msk.bf16.mxu1 %vm2427_vm1, %v2426_v0 }
  0x25   :  { %2226 = vmatprep.subr.bf16.mxu0 %v2426_v0  ;;  %2232 = vmatprep.subr.bf16.mxu1 %v2426_v0 }
  0x2a   :  { %2217 = vmatmul.mubr.msk.bf16.vlgmr.msra.gmra.mrb[16].mxu0 %vm72_vm0, %v32_v31  ;;  %2223 = vmatmul.mubr.msk.bf16.vlgmr.msra.gmra.mrb[16].mxu1 %vm72_vm0, %v33_v32 }
  0x2b   :  { %2227 = vmatpush3.bf16.xpose.msra.mxu0 %v537_v33  ;;  %2233 = vmatpush3.bf16.xpose.msra.mxu1 %v583_v34 }
  0x2c   :  { %2228 = vmatprep.mubr.msk.bf16.mxu0 %vm2427_vm1, %v2426_v0  ;;  %2234 = vmatprep.mubr.msk.bf16.mxu1 %vm2427_vm1, %v2426_v0 }
  0x2d   :  { %2238 = vmatprep.subr.bf16.mxu0 %v2426_v0  ;;  %2244 = vmatprep.subr.bf16.mxu1 %v2426_v0 }
  0x32   :  { %2229 = vmatmul.mubr.msk.bf16.vlgmr.msra.gmra.mrb[20].mxu0 %vm72_vm0, %v34_v37  ;;  %2235 = vmatmul.mubr.msk.bf16.vlgmr.msra.gmra.mrb[20].mxu1 %vm72_vm0, %v35_v38 }
  0x33   :  { %2239 = vmatpush3.bf16.xpose.msra.mxu0 %v629_v39  ;;  %2245 = vmatpush3.bf16.xpose.msra.mxu1 %v675_v40 }
  0x34   :  { %2240 = vmatprep.mubr.msk.bf16.mxu0 %vm2427_vm1, %v2426_v0  ;;  %2246 = vmatprep.mubr.msk.bf16.mxu1 %vm2427_vm1, %v2426_v0 }
  0x35   :  { %2250 = vmatprep.subr.bf16.mxu0 %v2426_v0  ;;  %2256 = vmatprep.subr.bf16.mxu1 %v2426_v0 }
  0x3a   :  { %2241 = vmatmul.mubr.msk.bf16.vlgmr.msra.gmra.mrb[24].mxu0 %vm72_vm0, %v36_v43  ;;  %2247 = vmatmul.mubr.msk.bf16.vlgmr.msra.gmra.mrb[24].mxu1 %vm72_vm0, %v37_v44 }
  0x3b   :  { %2251 = vmatpush3.bf16.xpose.msra.mxu0 %v721_v45  ;;  %2257 = vmatpush3.bf16.xpose.msra.mxu1 %v767_v46 }
  0x3c   :  { %2252 = vmatprep.mubr.msk.bf16.mxu0 %vm2427_vm1, %v2426_v0  ;;  %2258 = vmatprep.mubr.msk.bf16.mxu1 %vm2427_vm1, %v2426_v0 }
  0x3d   :  { %2262 = vmatprep.subr.bf16.mxu0 %v2426_v0  ;;  %2268 = vmatprep.subr.bf16.mxu1 %v2426_v0 }
  0x42   :  { %2253 = vmatmul.mubr.msk.bf16.vlgmr.msra.gmra.mrb[28].mxu0 %vm72_vm0, %v38_v47  ;;  %2259 = vmatmul.mubr.msk.bf16.vlgmr.msra.gmra.mrb[28].mxu1 %vm72_vm0, %v39_v48 }
  0x43   :  { %2264 = vmatprep.mubr.msk.bf16.mxu0 %vm2427_vm1, %v2426_v0  ;;  %2270 = vmatprep.mubr.msk.bf16.mxu1 %vm2427_vm1, %v2426_v0 }
  0xdd   :  { %v113_v49 = vpop.f32.mrb[0].mxu0  ;;  %v159_v50 = vpop.f32.mrb[0].mxu1 }
  0xde   :  { %v809_v52 = vmul.f32 0.17677669, %v113_v49  ;;  %v2170_v53 = vpop.f32.mrb[1].mxu0  ;;  %v810_v54 = vmul.f32 0.17677669, %v159_v50  ;;  %v2176_v55 = vpop.f32.mrb[1].mxu1 }
  0xdf   :  { %v116_v56 = vpop.f32.mrb[2].mxu0  ;;  %v162_v57 = vpop.f32.mrb[2].mxu1 }
  0xe0   :  { %v2171_v58 = vpop.f32.mrb[3].mxu0  ;;  %v2177_v59 = vpop.f32.mrb[3].mxu1  ;;  %v2651_v60 = vadd.f32 %v2648_v51, %v809_v52  ;;  %v2654_v61 = vadd.f32 %v2648_v51, %v810_v54 }
  0xe2   :  { %v843_v62 = vsel %vm842_vm2, %v2651_v60, -inf  ;;  %v846_v63 = vsel %vm842_vm2, %v2654_v61, -inf }
  0xe3   :  { %844 = vmax.xlane.f32.xlu0 %v843_v62 }
  0xe5   :  { %v205_v1 = vpop.f32.mrb[4].mxu0  ;;  %v251_v2 = vpop.f32.mrb[4].mxu1 }
  0xe6   :  { %v811_v3 = vmul.f32 0.17677669, %v205_v1  ;;  %v2182_v4 = vpop.f32.mrb[5].mxu0  ;;  %v812_v5 = vmul.f32 0.17677669, %v251_v2  ;;  %v2188_v6 = vpop.f32.mrb[5].mxu1 }
  0xe7   :  { %847 = vmax.xlane.f32.xlu0 %v846_v63  ;;  %v208_v7 = vpop.f32.mrb[6].mxu0  ;;  %v254_v8 = vpop.f32.mrb[6].mxu1 }
  0xe8   :  { %v2183_v9 = vpop.f32.mrb[7].mxu0  ;;  %v2189_v10 = vpop.f32.mrb[7].mxu1  ;;  %v2661_v11 = vadd.f32 %v2648_v51, %v811_v3  ;;  %v2664_v12 = vadd.f32 %v2648_v51, %v812_v5 }
  0xea   :  { %v849_v13 = vsel %vm842_vm2, %v2661_v11, -inf  ;;  %v852_v14 = vsel %vm842_vm2, %v2664_v12, -inf }
  0xeb   :  { %850 = vmax.xlane.f32.xlu1 %v849_v13 }
  0xed   :  { %v297_v15 = vpop.f32.mrb[8].mxu0  ;;  %v343_v16 = vpop.f32.mrb[8].mxu1 }
  0xee   :  { %v813_v17 = vmul.f32 0.17677669, %v297_v15  ;;  %v814_v18 = vmul.f32 0.17677669, %v343_v16  ;;  %v2194_v19 = vpop.f32.mrb[9].mxu0  ;;  %v2200_v20 = vpop.f32.mrb[9].mxu1 }
  0xef   :  { %853 = vmax.xlane.f32.xlu1 %v852_v14  ;;  %v300_v21 = vpop.f32.mrb[10].mxu0  ;;  %v346_v22 = vpop.f32.mrb[10].mxu1 }
  0xf0   :  { %v2195_v23 = vpop.f32.mrb[11].mxu0  ;;  %v2201_v24 = vpop.f32.mrb[11].mxu1  ;;  %v2671_v25 = vadd.f32 %v2648_v51, %v814_v18  ;;  %v2674_v26 = vadd.f32 %v2648_v51, %v813_v17 }
  0xf2   :  { %v858_v27 = vsel %vm842_vm2, %v2671_v25, -inf  ;;  %v855_v28 = vsel %vm842_vm2, %v2674_v26, -inf }
  0xf3   :  { %859 = vmax.xlane.f32.xlu1 %v858_v27  ;;  %856 = vmax.xlane.f32.xlu0 %v855_v28 }
  0xf5   :  { %v389_v29 = vpop.f32.mrb[12].mxu0  ;;  %v435_v30 = vpop.f32.mrb[12].mxu1 }
  0xf6   :  { %v815_v31 = vmul.f32 0.17677669, %v389_v29  ;;  %v816_v32 = vmul.f32 0.17677669, %v435_v30  ;;  %v2206_v33 = vpop.f32.mrb[13].mxu0  ;;  %v2212_v34 = vpop.f32.mrb[13].mxu1 }
  0xf7   :  { %v392_v35 = vpop.f32.mrb[14].mxu0  ;;  %v438_v36 = vpop.f32.mrb[14].mxu1 }
  0xf8   :  { %v2207_v37 = vpop.f32.mrb[15].mxu0  ;;  %v2213_v38 = vpop.f32.mrb[15].mxu1  ;;  %v2681_v39 = vadd.f32 %v2648_v51, %v816_v32  ;;  %v2684_v40 = vadd.f32 %v2648_v51, %v815_v31 }
  0xfa   :  { %v864_v41 = vsel %vm842_vm2, %v2681_v39, -inf  ;;  %v861_v42 = vsel %vm842_vm2, %v2684_v40, -inf }
  0xfb   :  { %865 = vmax.xlane.f32.xlu1 %v864_v41  ;;  %862 = vmax.xlane.f32.xlu0 %v861_v42 }
  0xfd   :  { %v481_v43 = vpop.f32.mrb[16].mxu0  ;;  %v527_v44 = vpop.f32.mrb[16].mxu1 }
  0xfe   :  { %v817_v45 = vmul.f32 0.17677669, %v481_v43  ;;  %v818_v46 = vmul.f32 0.17677669, %v527_v44  ;;  %v2218_v47 = vpop.f32.mrb[17].mxu0  ;;  %v2224_v48 = vpop.f32.mrb[17].mxu1 }
  0xff   :  { %v484_v49 = vpop.f32.mrb[18].mxu0  ;;  %v530_v50 = vpop.f32.mrb[18].mxu1 }
 0x100   :  { %v2219_v52 = vpop.f32.mrb[19].mxu0  ;;  %v2225_v53 = vpop.f32.mrb[19].mxu1  ;;  %v2691_v54 = vadd.f32 %v2648_v51, %v818_v46  ;;  %v2694_v55 = vadd.f32 %v2648_v51, %v817_v45 }
 0x102   :  { %v870_v56 = vsel %vm842_vm2, %v2691_v54, -inf  ;;  %v867_v57 = vsel %vm842_vm2, %v2694_v55, -inf }
 0x103   :  { %871 = vmax.xlane.f32.xlu1 %v870_v56  ;;  %868 = vmax.xlane.f32.xlu0 %v867_v57 }
 0x105   :  { %v573_v58 = vpop.f32.mrb[20].mxu0  ;;  %v619_v59 = vpop.f32.mrb[20].mxu1 }
 0x106   :  { %v819_v62 = vmul.f32 0.17677669, %v573_v58  ;;  %v820_v63 = vmul.f32 0.17677669, %v619_v59  ;;  %v2230_v1 = vpop.f32.mrb[21].mxu0  ;;  %v2236_v2 = vpop.f32.mrb[21].mxu1 }
 0x107   :  { %v576_v3 = vpop.f32.mrb[22].mxu0  ;;  %v622_v4 = vpop.f32.mrb[22].mxu1 }
 0x108   :  { %v2231_v5 = vpop.f32.mrb[23].mxu0  ;;  %v2237_v6 = vpop.f32.mrb[23].mxu1  ;;  %v2701_v7 = vadd.f32 %v2648_v51, %v820_v63  ;;  %v2704_v8 = vadd.f32 %v2648_v51, %v819_v62 }
 0x10a   :  { %v876_v9 = vsel %vm842_vm2, %v2701_v7, -inf  ;;  %v873_v10 = vsel %vm842_vm2, %v2704_v8, -inf }
 0x10b   :  { %877 = vmax.xlane.f32.xlu1 %v876_v9  ;;  %874 = vmax.xlane.f32.xlu0 %v873_v10 }
 0x10d   :  { %v665_v13 = vpop.f32.mrb[24].mxu0  ;;  %v711_v14 = vpop.f32.mrb[24].mxu1 }
 0x10e   :  { %v821_v15 = vmul.f32 0.17677669, %v665_v13  ;;  %v822_v16 = vmul.f32 0.17677669, %v711_v14  ;;  %v2242_v17 = vpop.f32.mrb[25].mxu0  ;;  %v2248_v18 = vpop.f32.mrb[25].mxu1 }
 0x10f   :  { %v668_v19 = vpop.f32.mrb[26].mxu0  ;;  %v714_v20 = vpop.f32.mrb[26].mxu1 }
 0x110   :  { %v2243_v21 = vpop.f32.mrb[27].mxu0  ;;  %v2249_v22 = vpop.f32.mrb[27].mxu1  ;;  %v2711_v23 = vadd.f32 %v2648_v51, %v822_v16  ;;  %v2714_v24 = vadd.f32 %v2648_v51, %v821_v15 }
 0x112   :  { %v882_v27 = vsel %vm842_vm2, %v2711_v23, -inf  ;;  %v879_v28 = vsel %vm842_vm2, %v2714_v24, -inf }
 0x113   :  { %883 = vmax.xlane.f32.xlu1 %v882_v27  ;;  %880 = vmax.xlane.f32.xlu0 %v879_v28 }
 0x115   :  { %v757_v29 = vpop.f32.mrb[28].mxu0  ;;  %v803_v30 = vpop.f32.mrb[28].mxu1 }
 0x116   :  { %v823_v31 = vmul.f32 0.17677669, %v757_v29  ;;  %v824_v32 = vmul.f32 0.17677669, %v803_v30  ;;  %v2254_v33 = vpop.f32.mrb[29].mxu0  ;;  %v2260_v34 = vpop.f32.mrb[29].mxu1 }
 0x117   :  { %v760_v35 = vpop.f32.mrb[30].mxu0  ;;  %v806_v36 = vpop.f32.mrb[30].mxu1  ;;  %v56_v34 = vld [vmem:[%s3271_s2] sm:$0x3] }
 0x118   :  { %v2255_v37 = vpop.f32.mrb[31].mxu0  ;;  %v2261_v38 = vpop.f32.mrb[31].mxu1  ;;  %v2721_v41 = vadd.f32 %v2648_v51, %v824_v32  ;;  %v2724_v42 = vadd.f32 %v2648_v51, %v823_v31 }
 0x119   :  { %v1041_v37 = vsel %vm1039_vm3, %v56_v34, 0 }
 0x11a   :  { %v888_v43 = vsel %vm842_vm2, %v2721_v41, -inf  ;;  %v885_v44 = vsel %vm842_vm2, %v2724_v42, -inf  ;;  %2263 = vmatpush3.bf16.msra.mxu0 %v1041_v37  ;;  %v70_v37 = vld [vmem:[%s3271_s2 + $0x1c] sm:$0x3] }
 0x11b   :  { %889 = vmax.xlane.f32.xlu1 %v888_v43  ;;  %886 = vmax.xlane.f32.xlu0 %v885_v44 }
 0x11c   :  { %2274 = vmatprep.subr.bf16.mxu0 %v2426_v0 }
 0x170   :  { %v845_v45 = vpop.xlane.xlu0 %844 }
 0x171   :  { %v891_v46 = vsub.f32 %v2651_v60, %v845_v45 }
 0x173   :  { %v907_v47 = vmul.f32 1.442695, %v891_v46 }
 0x174   :  { %v848_v48 = vpop.xlane.xlu0 %847 }
 0x175   :  { %2360 = vpow2.f32 %v907_v47  ;;  %v892_v49 = vsub.f32 %v2654_v61, %v848_v48 }
 0x177   :  { %v909_v50 = vmul.f32 1.442695, %v892_v49 }
 0x178   :  { %v851_v52 = vpop.xlane.xlu1 %850 }
 0x179   :  { %2362 = vpow2.f32 %v909_v50  ;;  %v893_v51 = vsub.f32 %v2661_v11, %v851_v52  ;;  %v58_v50 = vld [vmem:[%s3271_s2 + $0x4] sm:$0x3] }
 0x17b   :  { %v911_v53 = vmul.f32 1.442695, %v893_v51 }
 0x17c   :  { %v854_v56 = vpop.xlane.xlu1 %853 }
 0x17d   :  { %2364 = vpow2.f32 %v911_v53  ;;  %v894_v57 = vsub.f32 %v2664_v12, %v854_v56  ;;  %v2798_v53 = vsel %vm1039_vm3, %v58_v50, 0 }
 0x17f   :  { %v2734_v58 = vpop.eup %2360  ;;  %v913_v59 = vmul.f32 1.442695, %v894_v57 }
 0x180   :  { %v860_v62 = vpop.xlane.xlu1 %859  ;;  %v857_v60 = vpop.xlane.xlu0 %856  ;;  %v939_v63 = vsel %vm842_vm2, %v2734_v58, 0.0 }
 0x181   :  { %2366 = vpow2.f32 %v913_v59  ;;  %v896_v61 = vsub.f32 %v2671_v25, %v860_v62  ;;  %v895_v1 = vsub.f32 %v2674_v26, %v857_v60  ;;  %940 = vadd.xlane.f32.xlu0 %v939_v63 }
 0x183   :  { %v2740_v11 = vpop.eup %2362  ;;  %v917_v2 = vmul.f32 1.442695, %v896_v61  ;;  %v915_v3 = vmul.f32 1.442695, %v895_v1 }
 0x184   :  { %v942_v12 = vsel %vm842_vm2, %v2740_v11, 0.0 }
 0x185   :  { %2368 = vpow2.f32 %v917_v2  ;;  %943 = vadd.xlane.f32.xlu1 %v942_v12  ;;  %v60_v2 = vld [vmem:[%s3271_s2 + $0x8] sm:$0x3] }
 0x186   :  { %2370 = vpow2.f32 %v915_v3 }
 0x187   :  { %v2744_v4 = vpop.eup %2364 }
 0x188   :  { %v866_v5 = vpop.xlane.xlu1 %865  ;;  %v863_v6 = vpop.xlane.xlu0 %862  ;;  %v945_v25 = vsel %vm842_vm2, %v2744_v4, 0.0 }
 0x189   :  { %v898_v26 = vsub.f32 %v2681_v39, %v866_v5  ;;  %v897_v9 = vsub.f32 %v2684_v40, %v863_v6  ;;  %946 = vadd.xlane.f32.xlu0 %v945_v25  ;;  %v2820_v5 = vsel %vm1039_vm3, %v60_v2, 0 }
 0x18b   :  { %v2750_v10 = vpop.eup %2366  ;;  %v921_v13 = vmul.f32 1.442695, %v898_v26  ;;  %v919_v14 = vmul.f32 1.442695, %v897_v9 }
 0x18c   :  { %v948_v15 = vsel %vm842_vm2, %v2750_v10, 0.0 }
 0x18d   :  { %2372 = vpow2.f32 %v921_v13  ;;  %949 = vadd.xlane.f32.xlu1 %v948_v15  ;;  %v62_v13 = vld [vmem:[%s3271_s2 + $0xc] sm:$0x3]  ;;  %v63_v15 = vld [vmem:[%s3271_s2 + $0xe] sm:$0x3] }
 0x18e   :  { %2374 = vpow2.f32 %v919_v14  ;;  %v2840_v14 = vsel %vm1039_vm3, %v62_v13, 0 }
 0x18f   :  { %v2754_v16 = vpop.eup %2368 }
 0x190   :  { %v2756_v17 = vpop.eup %2370  ;;  %v872_v18 = vpop.xlane.xlu1 %871  ;;  %v954_v39 = vsel %vm842_vm2, %v2754_v16, 0.0 }
 0x191   :  { %v869_v19 = vpop.xlane.xlu0 %868  ;;  %v900_v40 = vsub.f32 %v2691_v54, %v872_v18  ;;  %955 = vadd.xlane.f32.xlu1 %v954_v39  ;;  %v951_v21 = vsel %vm842_vm2, %v2756_v17, 0.0 }
 0x192   :  { %v899_v20 = vsub.f32 %v2694_v55, %v869_v19  ;;  %952 = vadd.xlane.f32.xlu0 %v951_v21  ;;  %v2848_v19 = vsel %vm1039_vm3, %v63_v15, 0  ;;  %v64_v21 = vld [vmem:[%s3271_s2 + $0x10] sm:$0x3] }
 0x193   :  { %v925_v22 = vmul.f32 1.442695, %v900_v40 }
 0x194   :  { %v923_v27 = vmul.f32 1.442695, %v899_v20 }
 0x195   :  { %2376 = vpow2.f32 %v925_v22  ;;  %v2860_v22 = vsel %vm1039_vm3, %v64_v21, 0 }
 0x196   :  { %2378 = vpow2.f32 %v923_v27  ;;  %v65_v27 = vld [vmem:[%s3271_s2 + $0x12] sm:$0x3] }
 0x197   :  { %v2764_v28 = vpop.eup %2372 }
 0x198   :  { %v2766_v29 = vpop.eup %2374  ;;  %v878_v30 = vpop.xlane.xlu1 %877  ;;  %v960_v54 = vsel %vm842_vm2, %v2764_v28, 0.0 }
 0x199   :  { %v875_v31 = vpop.xlane.xlu0 %874  ;;  %v902_v55 = vsub.f32 %v2701_v7, %v878_v30  ;;  %961 = vadd.xlane.f32.xlu1 %v960_v54  ;;  %v957_v33 = vsel %vm842_vm2, %v2766_v29, 0.0  ;;  %v57_v7 = vld [vmem:[%s3271_s2 + $0x2] sm:$0x3]  ;;  %v2866_v30 = vsel %vm1039_vm3, %v65_v27, 0 }
 0x19a   :  { %v901_v32 = vsub.f32 %v2704_v8, %v875_v31  ;;  %958 = vadd.xlane.f32.xlu0 %v957_v33  ;;  %v1087_v38 = vsel %vm1039_vm3, %v57_v7, 0  ;;  %v66_v31 = vld [vmem:[%s3271_s2 + $0x14] sm:$0x3]  ;;  %v68_v33 = vld [vmem:[%s3271_s2 + $0x18] sm:$0x3]  ;;  %v2896_v7 = vsel %vm1039_vm3, %v70_v37, 0 }
 0x19b   :  { %v929_v35 = vmul.f32 1.442695, %v902_v55  ;;  %2269 = vmatpush3.bf16.msra.mxu1 %v1087_v38  ;;  %v2872_v54 = vsel %vm1039_vm3, %v66_v31, 0  ;;  %v67_v55 = vld [vmem:[%s3271_s2 + $0x16] sm:$0x3]  ;;  %v2884_v34 = vsel %vm1039_vm3, %v68_v33, 0 }
 0x19c   :  { %v927_v36 = vmul.f32 1.442695, %v901_v32  ;;  %2280 = vmatprep.subr.bf16.mxu1 %v2426_v0  ;;  %v2878_v32 = vsel %vm1039_vm3, %v67_v55, 0  ;;  %v71_v38 = vld [vmem:[%s3271_s2 + $0x1e] sm:$0x3] }
 0x19d   :  { %2380 = vpow2.f32 %v929_v35  ;;  %v69_v35 = vld [vmem:[%s3271_s2 + $0x1a] sm:$0x3] }
 0x19e   :  { %2382 = vpow2.f32 %v927_v36  ;;  %v2890_v36 = vsel %vm1039_vm3, %v69_v35, 0 }
 0x19f   :  { %v2782_v8 = vpop.eup %2376 }
 0x1a0   :  { %v2785_v43 = vpop.eup %2378  ;;  %v884_v44 = vpop.xlane.xlu1 %883  ;;  %v966_v46 = vsel %vm842_vm2, %v2782_v8, 0.0 }
 0x1a1   :  { %v881_v45 = vpop.xlane.xlu0 %880  ;;  %v904_v47 = vsub.f32 %v2711_v23, %v884_v44  ;;  %967 = vadd.xlane.f32.xlu1 %v966_v46  ;;  %v963_v49 = vsel %vm842_vm2, %v2785_v43, 0.0  ;;  %v59_v23 = vld [vmem:[%s3271_s2 + $0x6] sm:$0x3]  ;;  %v2902_v44 = vsel %vm1039_vm3, %v71_v38, 0 }
 0x1a2   :  { %v903_v48 = vsub.f32 %v2714_v24, %v881_v45  ;;  %964 = vadd.xlane.f32.xlu0 %v963_v49  ;;  %v2806_v56 = vsel %vm1039_vm3, %v59_v23, 0 }
 0x1a3   :  { %v933_v52 = vmul.f32 1.442695, %v904_v47 }
 0x1a4   :  { %v931_v51 = vmul.f32 1.442695, %v903_v48 }
 0x1a5   :  { %2384 = vpow2.f32 %v933_v52 }
 0x1a6   :  { %2386 = vpow2.f32 %v931_v51 }
 0x1a7   :  { %v2803_v24 = vpop.eup %2380 }
 0x1a8   :  { %v2808_v57 = vpop.eup %2382  ;;  %v890_v59 = vpop.xlane.xlu1 %889  ;;  %v972_v60 = vsel %vm842_vm2, %v2803_v24, 0.0 }
 0x1a9   :  { %v887_v62 = vpop.xlane.xlu0 %886  ;;  %v906_v63 = vsub.f32 %v2721_v41, %v890_v59  ;;  %973 = vadd.xlane.f32.xlu1 %v972_v60  ;;  %v969_v1 = vsel %vm842_vm2, %v2808_v57, 0.0  ;;  %v61_v41 = vld [vmem:[%s3271_s2 + $0xa] sm:$0x3] }
 0x1aa   :  { %v905_v61 = vsub.f32 %v2724_v42, %v887_v62  ;;  %970 = vadd.xlane.f32.xlu0 %v969_v1  ;;  %v2828_v6 = vsel %vm1039_vm3, %v61_v41, 0 }
 0x1ab   :  { %v937_v3 = vmul.f32 1.442695, %v906_v63 }
 0x1ac   :  { %v935_v12 = vmul.f32 1.442695, %v905_v61 }
 0x1ad   :  { %2388 = vpow2.f32 %v937_v3 }
 0x1ae   :  { %2390 = vpow2.f32 %v935_v12 }
 0x1af   :  { %v2825_v42 = vpop.eup %2384 }
 0x1b0   :  { %v2830_v25 = vpop.eup %2386  ;;  %v978_v26 = vsel %vm842_vm2, %v2825_v42, 0.0 }
 0x1b1   :  { %979 = vadd.xlane.f32.xlu1 %v978_v26  ;;  %v975_v9 = vsel %vm842_vm2, %v2830_v25, 0.0 }
 0x1b2   :  { %976 = vadd.xlane.f32.xlu0 %v975_v9 }
 0x1b7   :  { %v2845_v18 = vpop.eup %2388 }
 0x1b8   :  { %v2850_v39 = vpop.eup %2390  ;;  %v984_v40 = vsel %vm842_vm2, %v2845_v18, 0.0 }
 0x1b9   :  { %985 = vadd.xlane.f32.xlu1 %v984_v40  ;;  %v981_v20 = vsel %vm842_vm2, %v2850_v39, 0.0 }
 0x1ba   :  { %982 = vadd.xlane.f32.xlu0 %v981_v20 }
 0x20e   :  { %v941_v45 = vpop.xlane.xlu0 %940 }
 0x20f   :  { %2392 = vrcp.f32 %v941_v45 }
 0x212   :  { %v944_v46 = vpop.xlane.xlu1 %943 }
 0x213   :  { %2394 = vrcp.f32 %v944_v46 }
 0x216   :  { %v947_v47 = vpop.xlane.xlu0 %946 }
 0x217   :  { %2396 = vrcp.f32 %v947_v47 }
 0x219   :  { %v2393_v48 = vpop.eup %2392 }
 0x21a   :  { %v1003_v49 = vmul.f32 %v2393_v48, %v2734_v58  ;;  %v950_v50 = vpop.xlane.xlu1 %949 }
 0x21b   :  { %2398 = vrcp.f32 %v950_v50 }
 0x21c   :  { %v1019_v52 = vpack.c.bf16 %v1003_v49, %v1003_v49 }
 0x21d   :  { %v2395_v51 = vpop.eup %2394 }
 0x21e   :  { %v1004_v23 = vmul.f32 %v2395_v51, %v2740_v11  ;;  %v956_v59 = vpop.xlane.xlu1 %955  ;;  %2265 = vmatmul.mubr.msk.bf16.vlgmr.msra.gmra.mrb[32].mxu0 %vm1035_vm4, %v1019_v52 }
 0x21f   :  { %2400 = vrcp.f32 %v956_v59  ;;  %v953_v62 = vpop.xlane.xlu0 %952  ;;  %2275 = vmatpush3.bf16.msra.mxu0 %v2798_v53  ;;  %2276 = vmatprep.mubr.msk.bf16.mxu0 %vm2427_vm1, %v2426_v0 }
 0x220   :  { %2402 = vrcp.f32 %v953_v62  ;;  %v1020_v60 = vpack.c.bf16 %v1004_v23, %v1004_v23  ;;  %2286 = vmatprep.subr.bf16.mxu0 %v2426_v0 }
 0x221   :  { %v2397_v58 = vpop.eup %2396 }
 0x222   :  { %v1005_v63 = vmul.f32 %v2397_v58, %v2744_v4  ;;  %2271 = vmatmul.mubr.msk.bf16.vlgmr.msra.gmra.mrb[32].mxu1 %vm1035_vm4, %v1020_v60 }
 0x223   :  { %2281 = vmatpush3.bf16.msra.mxu1 %v2806_v56  ;;  %2282 = vmatprep.mubr.msk.bf16.mxu1 %vm2427_vm1, %v2426_v0 }
 0x224   :  { %v1021_v11 = vpack.c.bf16 %v1005_v63, %v1005_v63  ;;  %2292 = vmatprep.subr.bf16.mxu1 %v2426_v0 }
 0x225   :  { %v2399_v53 = vpop.eup %2398 }
 0x226   :  { %v1006_v61 = vmul.f32 %v2399_v53, %v2750_v10  ;;  %v962_v1 = vpop.xlane.xlu1 %961  ;;  %2277 = vmatmul.mubr.msk.bf16.vlgmr.msra.gmra.mrb[36].mxu0 %vm1035_vm4, %v1021_v11 }
 0x227   :  { %2404 = vrcp.f32 %v962_v1  ;;  %v959_v2 = vpop.xlane.xlu0 %958  ;;  %2287 = vmatpush3.bf16.msra.mxu0 %v2820_v5  ;;  %2288 = vmatprep.mubr.msk.bf16.mxu0 %vm2427_vm1, %v2426_v0 }
 0x228   :  { %2406 = vrcp.f32 %v959_v2  ;;  %v1022_v4 = vpack.c.bf16 %v1006_v61, %v1006_v61  ;;  %2298 = vmatprep.subr.bf16.mxu0 %v2426_v0 }
 0x229   :  { %v2401_v56 = vpop.eup %2400 }
 0x22a   :  { %v2403_v3 = vpop.eup %2402  ;;  %2283 = vmatmul.mubr.msk.bf16.vlgmr.msra.gmra.mrb[36].mxu1 %vm1035_vm4, %v1022_v4  ;;  %v1008_v12 = vmul.f32 %v2401_v56, %v2754_v16 }
 0x22b   :  { %v1007_v10 = vmul.f32 %v2403_v3, %v2756_v17  ;;  %2293 = vmatpush3.bf16.msra.mxu1 %v2828_v6  ;;  %2294 = vmatprep.mubr.msk.bf16.mxu1 %vm2427_vm1, %v2426_v0 }
 0x22c   :  { %2304 = vmatprep.subr.bf16.mxu1 %v2426_v0  ;;  %v1024_v9 = vpack.c.bf16 %v1008_v12, %v1008_v12 }
 0x22d   :  { %v1023_v5 = vpack.c.bf16 %v1007_v10, %v1007_v10 }
 0x22e   :  { %v968_v41 = vpop.xlane.xlu1 %967 }
 0x22f   :  { %2408 = vrcp.f32 %v968_v41  ;;  %2289 = vmatmul.mubr.msk.bf16.vlgmr.msra.gmra.mrb[40].mxu0 %vm1035_vm4, %v1023_v5  ;;  %v965_v26 = vpop.xlane.xlu0 %964 }
 0x230   :  { %2410 = vrcp.f32 %v965_v26  ;;  %2299 = vmatpush3.bf16.msra.mxu0 %v2840_v14  ;;  %2300 = vmatprep.mubr.msk.bf16.mxu0 %vm2427_vm1, %v2426_v0 }
 0x231   :  { %v2405_v17 = vpop.eup %2404  ;;  %2310 = vmatprep.subr.bf16.mxu0 %v2426_v0 }
 0x232   :  { %v2407_v6 = vpop.eup %2406  ;;  %2295 = vmatmul.mubr.msk.bf16.vlgmr.msra.gmra.mrb[40].mxu1 %vm1035_vm4, %v1024_v9  ;;  %v1010_v13 = vmul.f32 %v2405_v17, %v2764_v28 }
 0x233   :  { %v1009_v16 = vmul.f32 %v2407_v6, %v2766_v29  ;;  %2305 = vmatpush3.bf16.msra.mxu1 %v2848_v19  ;;  %2306 = vmatprep.mubr.msk.bf16.mxu1 %vm2427_vm1, %v2426_v0 }
 0x234   :  { %2316 = vmatprep.subr.bf16.mxu1 %v2426_v0  ;;  %v1026_v20 = vpack.c.bf16 %v1010_v13, %v1010_v13 }
 0x235   :  { %v1025_v14 = vpack.c.bf16 %v1009_v16, %v1009_v16 }
 0x236   :  { %v974_v15 = vpop.xlane.xlu1 %973 }
 0x237   :  { %2412 = vrcp.f32 %v974_v15  ;;  %2301 = vmatmul.mubr.msk.bf16.vlgmr.msra.gmra.mrb[44].mxu0 %vm1035_vm4, %v1025_v14  ;;  %v971_v40 = vpop.xlane.xlu0 %970 }
 0x238   :  { %2414 = vrcp.f32 %v971_v40  ;;  %2311 = vmatpush3.bf16.msra.mxu0 %v2860_v22  ;;  %2312 = vmatprep.mubr.msk.bf16.mxu0 %vm2427_vm1, %v2426_v0 }
 0x239   :  { %v2409_v29 = vpop.eup %2408  ;;  %2322 = vmatprep.subr.bf16.mxu0 %v2426_v0 }
 0x23a   :  { %v2411_v19 = vpop.eup %2410  ;;  %2307 = vmatmul.mubr.msk.bf16.vlgmr.msra.gmra.mrb[44].mxu1 %vm1035_vm4, %v1026_v20  ;;  %v1012_v21 = vmul.f32 %v2409_v29, %v2782_v8 }
 0x23b   :  { %v1011_v28 = vmul.f32 %v2411_v19, %v2785_v43  ;;  %2317 = vmatpush3.bf16.msra.mxu1 %v2866_v30  ;;  %2318 = vmatprep.mubr.msk.bf16.mxu1 %vm2427_vm1, %v2426_v0 }
 0x23c   :  { %2328 = vmatprep.subr.bf16.mxu1 %v2426_v0  ;;  %v1028_v55 = vpack.c.bf16 %v1012_v21, %v1012_v21 }
 0x23d   :  { %v1027_v22 = vpack.c.bf16 %v1011_v28, %v1011_v28 }
 0x23e   :  { %v980_v27 = vpop.xlane.xlu1 %979 }
 0x23f   :  { %2416 = vrcp.f32 %v980_v27  ;;  %2313 = vmatmul.mubr.msk.bf16.vlgmr.msra.gmra.mrb[48].mxu0 %vm1035_vm4, %v1027_v22  ;;  %v977_v31 = vpop.xlane.xlu0 %976 }
 0x240   :  { %2418 = vrcp.f32 %v977_v31  ;;  %2323 = vmatpush3.bf16.msra.mxu0 %v2872_v54  ;;  %2324 = vmatprep.mubr.msk.bf16.mxu0 %vm2427_vm1, %v2426_v0 }
 0x241   :  { %v2413_v43 = vpop.eup %2412  ;;  %2334 = vmatprep.subr.bf16.mxu0 %v2426_v0 }
 0x242   :  { %v2415_v30 = vpop.eup %2414  ;;  %2319 = vmatmul.mubr.msk.bf16.vlgmr.msra.gmra.mrb[48].mxu1 %vm1035_vm4, %v1028_v55  ;;  %v1014_v33 = vmul.f32 %v2413_v43, %v2803_v24 }
 0x243   :  { %v1013_v8 = vmul.f32 %v2415_v30, %v2808_v57  ;;  %2329 = vmatpush3.bf16.msra.mxu1 %v2878_v32  ;;  %2330 = vmatprep.mubr.msk.bf16.mxu1 %vm2427_vm1, %v2426_v0 }
 0x244   :  { %2340 = vmatprep.subr.bf16.mxu1 %v2426_v0  ;;  %v1030_v38 = vpack.c.bf16 %v1014_v33, %v1014_v33 }
 0x245   :  { %v1029_v54 = vpack.c.bf16 %v1013_v8, %v1013_v8 }
 0x246   :  { %v986_v35 = vpop.xlane.xlu1 %985 }
 0x247   :  { %2420 = vrcp.f32 %v986_v35  ;;  %2325 = vmatmul.mubr.msk.bf16.vlgmr.msra.gmra.mrb[52].mxu0 %vm1035_vm4, %v1029_v54  ;;  %v983_v37 = vpop.xlane.xlu0 %982 }
 0x248   :  { %2422 = vrcp.f32 %v983_v37  ;;  %2335 = vmatpush3.bf16.msra.mxu0 %v2884_v34  ;;  %2336 = vmatprep.mubr.msk.bf16.mxu0 %vm2427_vm1, %v2426_v0 }
 0x249   :  { %v2417_v57 = vpop.eup %2416  ;;  %2346 = vmatprep.subr.bf16.mxu0 %v2426_v0 }
 0x24a   :  { %v2419_v32 = vpop.eup %2418  ;;  %2331 = vmatmul.mubr.msk.bf16.vlgmr.msra.gmra.mrb[52].mxu1 %vm1035_vm4, %v1030_v38  ;;  %v1016_v45 = vmul.f32 %v2417_v57, %v2825_v42 }
 0x24b   :  { %v1015_v24 = vmul.f32 %v2419_v32, %v2830_v25  ;;  %2341 = vmatpush3.bf16.msra.mxu1 %v2890_v36  ;;  %2342 = vmatprep.mubr.msk.bf16.mxu1 %vm2427_vm1, %v2426_v0 }
 0x24c   :  { %2352 = vmatprep.subr.bf16.mxu1 %v2426_v0  ;;  %v1032_v46 = vpack.c.bf16 %v1016_v45, %v1016_v45 }
 0x24d   :  { %v1031_v34 = vpack.c.bf16 %v1015_v24, %v1015_v24 }
 0x24f   :  { %2337 = vmatmul.mubr.msk.bf16.vlgmr.msra.gmra.mrb[56].mxu0 %vm1035_vm4, %v1031_v34 }
 0x250   :  { %2347 = vmatpush3.bf16.msra.mxu0 %v2896_v7  ;;  %2348 = vmatprep.mubr.msk.bf16.mxu0 %vm2427_vm1, %v2426_v0 }
 0x251   :  { %v2421_v47 = vpop.eup %2420 }
 0x252   :  { %v2423_v25 = vpop.eup %2422  ;;  %2343 = vmatmul.mubr.msk.bf16.vlgmr.msra.gmra.mrb[56].mxu1 %vm1035_vm4, %v1032_v46  ;;  %v1018_v42 = vmul.f32 %v2421_v47, %v2845_v18 }
 0x253   :  { %v1017_v36 = vmul.f32 %v2423_v25, %v2850_v39  ;;  %2353 = vmatpush3.bf16.msra.mxu1 %v2902_v44  ;;  %2354 = vmatprep.mubr.msk.bf16.mxu1 %vm2427_vm1, %v2426_v0 }
 0x254   :  { %v1034_v7 = vpack.c.bf16 %v1018_v42, %v1018_v42 }
 0x255   :  { %v1033_v48 = vpack.c.bf16 %v1017_v36, %v1017_v36 }
 0x257   :  { %2349 = vmatmul.mubr.msk.bf16.vlgmr.msra.gmra.mrb[60].mxu0 %vm1035_vm4, %v1033_v48 }
 0x25a   :  { %2355 = vmatmul.mubr.msk.bf16.vlgmr.msra.gmra.mrb[60].mxu1 %vm1035_vm4, %v1034_v7 }
 0x2f1   :  { %v2990_v49 = vpop.f32.mrb[32].mxu0 }
 0x2f2   :  { %v2266_v50 = vpop.f32.mrb[33].mxu0  ;;  %v1774_v39 = vsel %vm1773_vm5, %v2990_v49, 0.0 }
 0x2f3   :  { %1775 = vadd.xlane.f32.xlu0 %v1774_v39  ;;  %v1080_v44 = vpop.f32.mrb[34].mxu0 }
 0x2f4   :  { %v2267_v52 = vpop.f32.mrb[35].mxu0 }
 0x2f5   :  { %v2994_v51 = vpop.f32.mrb[32].mxu1 }
 0x2f6   :  { %v2272_v0 = vpop.f32.mrb[33].mxu1  ;;  %v1777_v18 = vsel %vm1773_vm5, %v2994_v51, 0.0 }
 0x2f7   :  { %1778 = vadd.xlane.f32.xlu1 %v1777_v18  ;;  %v1126_v23 = vpop.f32.mrb[34].mxu1 }
 0x2f8   :  { %v2273_v59 = vpop.f32.mrb[35].mxu1 }
 0x2f9   :  { %v2998_v62 = vpop.f32.mrb[36].mxu0 }
 0x2fa   :  { %v2278_v60 = vpop.f32.mrb[37].mxu0  ;;  %v1780_v58 = vsel %vm1773_vm5, %v2998_v62, 0.0 }
 0x2fb   :  { %1781 = vadd.xlane.f32.xlu0 %v1780_v58  ;;  %v1172_v63 = vpop.f32.mrb[38].mxu0 }
 0x2fc   :  { %v2279_v11 = vpop.f32.mrb[39].mxu0 }
 0x2fd   :  { %v3002_v53 = vpop.f32.mrb[36].mxu1 }
 0x2fe   :  { %v2284_v61 = vpop.f32.mrb[37].mxu1  ;;  %v1783_v1 = vsel %vm1773_vm5, %v3002_v53, 0.0 }
 0x2ff   :  { %1784 = vadd.xlane.f32.xlu1 %v1783_v1  ;;  %v1218_v2 = vpop.f32.mrb[38].mxu1 }
 0x300   :  { %v2285_v4 = vpop.f32.mrb[39].mxu1 }
 0x302   :  { %v3006_v56 = vpop.f32.mrb[40].mxu0 }
 0x303   :  { %v2290_v3 = vpop.f32.mrb[41].mxu0  ;;  %v1786_v10 = vsel %vm1773_vm5, %v3006_v56, 0.0 }
 0x304   :  { %1787 = vadd.xlane.f32.xlu0 %v1786_v10  ;;  %v1264_v12 = vpop.f32.mrb[42].mxu0 }
 0x305   :  { %v2291_v5 = vpop.f32.mrb[43].mxu0  ;;  %v3010_v41 = vpop.f32.mrb[40].mxu1 }
 0x306   :  { %v2296_v26 = vpop.f32.mrb[41].mxu1  ;;  %v1789_v9 = vsel %vm1773_vm5, %v3010_v41, 0.0 }
 0x307   :  { %1790 = vadd.xlane.f32.xlu1 %v1789_v9  ;;  %v1310_v17 = vpop.f32.mrb[42].mxu1 }
 0x308   :  { %v2297_v6 = vpop.f32.mrb[43].mxu1 }
 0x30a   :  { %v3014_v16 = vpop.f32.mrb[44].mxu0 }
 0x30b   :  { %v2302_v13 = vpop.f32.mrb[45].mxu0  ;;  %v1792_v14 = vsel %vm1773_vm5, %v3014_v16, 0.0 }
 0x30c   :  { %1793 = vadd.xlane.f32.xlu0 %v1792_v14  ;;  %v1356_v15 = vpop.f32.mrb[46].mxu0 }
 0x30d   :  { %v2303_v40 = vpop.f32.mrb[47].mxu0  ;;  %v3018_v20 = vpop.f32.mrb[44].mxu1 }
 0x30e   :  { %v2308_v29 = vpop.f32.mrb[45].mxu1  ;;  %v1795_v19 = vsel %vm1773_vm5, %v3018_v20, 0.0 }
 0x30f   :  { %1796 = vadd.xlane.f32.xlu1 %v1795_v19  ;;  %v1402_v28 = vpop.f32.mrb[46].mxu1 }
 0x310   :  { %v2309_v21 = vpop.f32.mrb[47].mxu1 }
 0x312   :  { %v3022_v22 = vpop.f32.mrb[48].mxu0 }
 0x313   :  { %v2314_v27 = vpop.f32.mrb[49].mxu0  ;;  %v1798_v31 = vsel %vm1773_vm5, %v3022_v22, 0.0 }
 0x314   :  { %1799 = vadd.xlane.f32.xlu0 %v1798_v31  ;;  %v1448_v55 = vpop.f32.mrb[50].mxu0 }
 0x315   :  { %v2315_v43 = vpop.f32.mrb[51].mxu0  ;;  %v3026_v30 = vpop.f32.mrb[48].mxu1 }
 0x316   :  { %v2320_v8 = vpop.f32.mrb[49].mxu1  ;;  %v1801_v33 = vsel %vm1773_vm5, %v3026_v30, 0.0 }
 0x317   :  { %1802 = vadd.xlane.f32.xlu1 %v1801_v33  ;;  %v1494_v54 = vpop.f32.mrb[50].mxu1 }
 0x318   :  { %v2321_v35 = vpop.f32.mrb[51].mxu1 }
 0x31a   :  { %v3030_v37 = vpop.f32.mrb[52].mxu0 }
 0x31b   :  { %v2326_v38 = vpop.f32.mrb[53].mxu0  ;;  %v1804_v57 = vsel %vm1773_vm5, %v3030_v37, 0.0 }
 0x31c   :  { %1805 = vadd.xlane.f32.xlu0 %v1804_v57  ;;  %v1540_v32 = vpop.f32.mrb[54].mxu0 }
 0x31d   :  { %v2327_v24 = vpop.f32.mrb[55].mxu0  ;;  %v3034_v45 = vpop.f32.mrb[52].mxu1 }
 0x31e   :  { %v2332_v34 = vpop.f32.mrb[53].mxu1  ;;  %v1807_v46 = vsel %vm1773_vm5, %v3034_v45, 0.0 }
 0x31f   :  { %1808 = vadd.xlane.f32.xlu1 %v1807_v46  ;;  %v1586_v47 = vpop.f32.mrb[54].mxu1 }
 0x320   :  { %v2333_v25 = vpop.f32.mrb[55].mxu1 }
 0x322   :  { %v3038_v36 = vpop.f32.mrb[56].mxu0 }
 0x323   :  { %v2338_v42 = vpop.f32.mrb[57].mxu0  ;;  %v1810_v48 = vsel %vm1773_vm5, %v3038_v36, 0.0 }
 0x324   :  { %1811 = vadd.xlane.f32.xlu0 %v1810_v48  ;;  %v1632_v7 = vpop.f32.mrb[58].mxu0 }
 0x325   :  { %v2339_v50 = vpop.f32.mrb[59].mxu0  ;;  %v3042_v39 = vpop.f32.mrb[56].mxu1 }
 0x326   :  { %v2344_v44 = vpop.f32.mrb[57].mxu1  ;;  %v1813_v52 = vsel %vm1773_vm5, %v3042_v39, 0.0 }
 0x327   :  { %1814 = vadd.xlane.f32.xlu1 %v1813_v52  ;;  %v1678_v0 = vpop.f32.mrb[58].mxu1 }
 0x328   :  { %v2345_v18 = vpop.f32.mrb[59].mxu1 }
 0x32a   :  { %v3046_v23 = vpop.f32.mrb[60].mxu0 }
 0x32b   :  { %v2350_v59 = vpop.f32.mrb[61].mxu0  ;;  %v1816_v60 = vsel %vm1773_vm5, %v3046_v23, 0.0 }
 0x32c   :  { %1817 = vadd.xlane.f32.xlu0 %v1816_v60  ;;  %v1724_v58 = vpop.f32.mrb[62].mxu0 }
 0x32d   :  { %v2351_v63 = vpop.f32.mrb[63].mxu0  ;;  %v3050_v11 = vpop.f32.mrb[60].mxu1 }
 0x32e   :  { %v2356_v61 = vpop.f32.mrb[61].mxu1  ;;  %v1819_v1 = vsel %vm1773_vm5, %v3050_v11, 0.0 }
 0x32f   :  { %1820 = vadd.xlane.f32.xlu1 %v1819_v1  ;;  %v1770_v2 = vpop.f32.mrb[62].mxu1 }
 0x330   :  { %v2357_v4 = vpop.f32.mrb[63].mxu1 }
 0x380   :  { %v1776_v3 = vpop.xlane.xlu0 %1775 }
 0x381   :  { %v1823_v9 = vsel %vm1822_vm6, %v1776_v3, 0.0 }
 0x384   :  { %v1779_v10 = vpop.xlane.xlu1 %1778 }
 0x385   :  { %v1824_v5 = vsel %vm1822_vm6, %v1779_v10, 0.0 }
 0x386   :  { %v1825_v6 = vadd.f32 %v1824_v5, %v1823_v9 }
 0x388   :  { %v1782_v12 = vpop.xlane.xlu0 %1781 }
 0x389   :  { %v1826_v17 = vsel %vm1822_vm6, %v1782_v12, 0.0 }
 0x38a   :  { %v1827_v15 = vadd.f32 %v1826_v17, %v1825_v6 }
 0x38c   :  { %v1785_v26 = vpop.xlane.xlu1 %1784 }
 0x38d   :  { %v1828_v14 = vsel %vm1822_vm6, %v1785_v26, 0.0 }
 0x38e   :  { %v1829_v19 = vadd.f32 %v1828_v14, %v1827_v15 }
 0x391   :  { %v1788_v13 = vpop.xlane.xlu0 %1787 }
 0x392   :  { %v1830_v29 = vsel %vm1822_vm6, %v1788_v13, 0.0 }
 0x393   :  { %v1831_v27 = vadd.f32 %v1830_v29, %v1829_v19 }
 0x394   :  { %v1791_v40 = vpop.xlane.xlu1 %1790 }
 0x395   :  { %v1832_v21 = vsel %vm1822_vm6, %v1791_v40, 0.0 }
 0x396   :  { %v1833_v43 = vadd.f32 %v1832_v21, %v1831_v27 }
 0x399   :  { %v1794_v28 = vpop.xlane.xlu0 %1793 }
 0x39a   :  { %v1834_v55 = vsel %vm1822_vm6, %v1794_v28, 0.0 }
 0x39b   :  { %v1835_v54 = vadd.f32 %v1834_v55, %v1833_v43 }
 0x39c   :  { %v1797_v31 = vpop.xlane.xlu1 %1796 }
 0x39d   :  { %v1836_v33 = vsel %vm1822_vm6, %v1797_v31, 0.0 }
 0x39e   :  { %v1837_v57 = vadd.f32 %v1836_v33, %v1835_v54 }
 0x3a1   :  { %v1800_v8 = vpop.xlane.xlu0 %1799 }
 0x3a2   :  { %v1838_v38 = vsel %vm1822_vm6, %v1800_v8, 0.0 }
 0x3a3   :  { %v1839_v34 = vadd.f32 %v1838_v38, %v1837_v57 }
 0x3a4   :  { %v1803_v35 = vpop.xlane.xlu1 %1802 }
 0x3a5   :  { %v1840_v24 = vsel %vm1822_vm6, %v1803_v35, 0.0 }
 0x3a6   :  { %v1841_v25 = vadd.f32 %v1840_v24, %v1839_v34 }
 0x3a9   :  { %v1806_v32 = vpop.xlane.xlu0 %1805 }
 0x3aa   :  { %v1842_v47 = vsel %vm1822_vm6, %v1806_v32, 0.0 }
 0x3ab   :  { %v1843_v7 = vadd.f32 %v1842_v47, %v1841_v25 }
 0x3ac   :  { %v1809_v46 = vpop.xlane.xlu1 %1808 }
 0x3ad   :  { %v1844_v48 = vsel %vm1822_vm6, %v1809_v46, 0.0 }
 0x3ae   :  { %v1845_v52 = vadd.f32 %v1844_v48, %v1843_v7 }
 0x3b1   :  { %v1812_v42 = vpop.xlane.xlu0 %1811 }
 0x3b2   :  { %v1846_v44 = vsel %vm1822_vm6, %v1812_v42, 0.0 }
 0x3b3   :  { %v1847_v18 = vadd.f32 %v1846_v44, %v1845_v52 }
 0x3b4   :  { %v1815_v50 = vpop.xlane.xlu1 %1814 }
 0x3b5   :  { %v1848_v0 = vsel %vm1822_vm6, %v1815_v50, 0.0 }
 0x3b6   :  { %v1849_v60 = vadd.f32 %v1848_v0, %v1847_v18 }
 0x3b9   :  { %v1818_v59 = vpop.xlane.xlu0 %1817 }
 0x3ba   :  { %v1850_v58 = vsel %vm1822_vm6, %v1818_v59, 0.0 }
 0x3bb   :  { %v1851_v63 = vadd.f32 %v1850_v58, %v1849_v60 }
 0x3bc   :  { %v1821_v61 = vpop.xlane.xlu1 %1820 }
 0x3bd   :  { %v1852_v1 = vsel %vm1822_vm6, %v1821_v61, 0.0 }
 0x3be   :  { %v1853_v2 = vadd.f32 %v1852_v1, %v1851_v63 }
 0x3c0   :  { %v1855_v4 = vmul.f32 0.001953125, %v1853_v2 }
 0x3c2   :  { %v3071_v3 = vsub.f32 %v2994_v51, %v1855_v4  ;;  %v3074_v10 = vsub.f32 %v2990_v49, %v1855_v4  ;;  %v3077_v12 = vsub.f32 %v3002_v53, %v1855_v4  ;;  %v3080_v5 = vsub.f32 %v2998_v62, %v1855_v4 }
 0x3c3   :  { %v3087_v17 = vsub.f32 %v3010_v41, %v1855_v4  ;;  %v3090_v51 = vsub.f32 %v3006_v56, %v1855_v4  ;;  %v3099_v13 = vsub.f32 %v3018_v20, %v1855_v4  ;;  %v3102_v41 = vsub.f32 %v3014_v16, %v1855_v4 }
 0x3c4   :  { %v1873_v26 = vmul.f32 %v3071_v3, %v3071_v3  ;;  %v1872_v9 = vmul.f32 %v3074_v10, %v3074_v10  ;;  %v1875_v62 = vmul.f32 %v3077_v12, %v3077_v12  ;;  %v1874_v6 = vmul.f32 %v3080_v5, %v3080_v5 }
 0x3c5   :  { %v1877_v15 = vmul.f32 %v3087_v17, %v3087_v17  ;;  %v1876_v40 = vmul.f32 %v3090_v51, %v3090_v51  ;;  %v1879_v29 = vmul.f32 %v3099_v13, %v3099_v13  ;;  %v1878_v20 = vmul.f32 %v3102_v41, %v3102_v41 }
 0x3c6   :  { %v1891_v49 = vsel %vm1773_vm5, %v1873_v26, 0.0  ;;  %v1888_v53 = vsel %vm1773_vm5, %v1872_v9, 0.0  ;;  %v1897_v56 = vsel %vm1773_vm5, %v1875_v62, 0.0  ;;  %v1894_v14 = vsel %vm1773_vm5, %v1874_v6, 0.0 }
 0x3c7   :  { %1892 = vadd.xlane.f32.xlu1 %v1891_v49  ;;  %1889 = vadd.xlane.f32.xlu0 %v1888_v53  ;;  %v1903_v16 = vsel %vm1773_vm5, %v1877_v15, 0.0  ;;  %v1900_v19 = vsel %vm1773_vm5, %v1876_v40, 0.0  ;;  %v3117_v28 = vsub.f32 %v3026_v30, %v1855_v4  ;;  %v3120_v21 = vsub.f32 %v3022_v22, %v1855_v4 }
 0x3c8   :  { %v1909_v27 = vsel %vm1773_vm5, %v1879_v29, 0.0  ;;  %v1906_v31 = vsel %vm1773_vm5, %v1878_v20, 0.0  ;;  %v3129_v8 = vsub.f32 %v3034_v45, %v1855_v4  ;;  %v3132_v30 = vsub.f32 %v3030_v37, %v1855_v4 }
 0x3c9   :  { %v1881_v55 = vmul.f32 %v3117_v28, %v3117_v28  ;;  %v1880_v43 = vmul.f32 %v3120_v21, %v3120_v21  ;;  %v3135_v22 = vsub.f32 %v3042_v39, %v1855_v4  ;;  %v3138_v33 = vsub.f32 %v3038_v36, %v1855_v4 }
 0x3ca   :  { %v1883_v38 = vmul.f32 %v3129_v8, %v3129_v8  ;;  %v1882_v45 = vmul.f32 %v3132_v30, %v3132_v30  ;;  %v3147_v37 = vsub.f32 %v3050_v11, %v1855_v4  ;;  %v3150_v39 = vsub.f32 %v3046_v23, %v1855_v4 }
 0x3cb   :  { %1898 = vadd.xlane.f32.xlu1 %v1897_v56  ;;  %1895 = vadd.xlane.f32.xlu0 %v1894_v14  ;;  %v1915_v54 = vsel %vm1773_vm5, %v1881_v55, 0.0  ;;  %v1912_v35 = vsel %vm1773_vm5, %v1880_v43, 0.0  ;;  %v1885_v32 = vmul.f32 %v3135_v22, %v3135_v22  ;;  %v1884_v24 = vmul.f32 %v3138_v33, %v3138_v33 }
 0x3cc   :  { %v1921_v36 = vsel %vm1773_vm5, %v1883_v38, 0.0  ;;  %v1918_v57 = vsel %vm1773_vm5, %v1882_v45, 0.0  ;;  %v1887_v23 = vmul.f32 %v3147_v37, %v3147_v37  ;;  %v1886_v46 = vmul.f32 %v3150_v39, %v3150_v39 }
 0x3cd   :  { %v1927_v34 = vsel %vm1773_vm5, %v1885_v32, 0.0  ;;  %v1924_v11 = vsel %vm1773_vm5, %v1884_v24, 0.0 }
 0x3ce   :  { %v1933_v47 = vsel %vm1773_vm5, %v1887_v23, 0.0  ;;  %v1930_v25 = vsel %vm1773_vm5, %v1886_v46, 0.0 }
 0x3cf   :  { %1904 = vadd.xlane.f32.xlu1 %v1903_v16  ;;  %1901 = vadd.xlane.f32.xlu0 %v1900_v19 }
 0x3d3   :  { %1910 = vadd.xlane.f32.xlu1 %v1909_v27  ;;  %1907 = vadd.xlane.f32.xlu0 %v1906_v31 }
 0x3d7   :  { %1916 = vadd.xlane.f32.xlu1 %v1915_v54  ;;  %1913 = vadd.xlane.f32.xlu0 %v1912_v35 }
 0x3db   :  { %1922 = vadd.xlane.f32.xlu1 %v1921_v36  ;;  %1919 = vadd.xlane.f32.xlu0 %v1918_v57 }
 0x3df   :  { %1928 = vadd.xlane.f32.xlu1 %v1927_v34  ;;  %1925 = vadd.xlane.f32.xlu0 %v1924_v11 }
 0x3e3   :  { %1934 = vadd.xlane.f32.xlu1 %v1933_v47  ;;  %1931 = vadd.xlane.f32.xlu0 %v1930_v25 }
 0x454   :  { %v1893_v42 = vpop.xlane.xlu1 %1892  ;;  %v1890_v48 = vpop.xlane.xlu0 %1889 }
 0x455   :  { %v1937_v7 = vsel %vm1822_vm6, %v1893_v42, 0.0  ;;  %v1936_v50 = vsel %vm1822_vm6, %v1890_v48, 0.0 }
 0x456   :  { %v1938_v44 = vadd.f32 %v1937_v7, %v1936_v50 }
 0x458   :  { %v1899_v52 = vpop.xlane.xlu1 %1898  ;;  %v1896_v0 = vpop.xlane.xlu0 %1895 }
 0x459   :  { %v1939_v18 = vsel %vm1822_vm6, %v1896_v0, 0.0  ;;  %v1941_v60 = vsel %vm1822_vm6, %v1899_v52, 0.0  ;;  %v2100_v0 = vld [vmem:[%s3272_s4] ss:$0 sm:$0xff] }
 0x45a   :  { %v1940_v59 = vadd.f32 %v1939_v18, %v1938_v44 }
 0x45c   :  { %v1905_v58 = vpop.xlane.xlu1 %1904  ;;  %v1942_v63 = vadd.f32 %v1941_v60, %v1940_v59  ;;  %v1902_v61 = vpop.xlane.xlu0 %1901 }
 0x45d   :  { %v1943_v1 = vsel %vm1822_vm6, %v1902_v61, 0.0  ;;  %v1945_v4 = vsel %vm1822_vm6, %v1905_v58, 0.0 }
 0x45e   :  { %v1944_v2 = vadd.f32 %v1943_v1, %v1942_v63 }
 0x460   :  { %v1911_v26 = vpop.xlane.xlu1 %1910  ;;  %v1946_v9 = vadd.f32 %v1945_v4, %v1944_v2  ;;  %v1908_v49 = vpop.xlane.xlu0 %1907 }
 0x461   :  { %v1947_v53 = vsel %vm1822_vm6, %v1908_v49, 0.0  ;;  %v1949_v6 = vsel %vm1822_vm6, %v1911_v26, 0.0 }
 0x462   :  { %v1948_v62 = vadd.f32 %v1947_v53, %v1946_v9 }
 0x464   :  { %v1917_v56 = vpop.xlane.xlu1 %1916  ;;  %v1950_v14 = vadd.f32 %v1949_v6, %v1948_v62  ;;  %v1914_v15 = vpop.xlane.xlu0 %1913 }
 0x465   :  { %v1951_v40 = vsel %vm1822_vm6, %v1914_v15, 0.0  ;;  %v1953_v20 = vsel %vm1822_vm6, %v1917_v56, 0.0 }
 0x466   :  { %v1952_v29 = vadd.f32 %v1951_v40, %v1950_v14 }
 0x468   :  { %v1923_v16 = vpop.xlane.xlu1 %1922  ;;  %v1954_v19 = vadd.f32 %v1953_v20, %v1952_v29  ;;  %v1920_v27 = vpop.xlane.xlu0 %1919 }
 0x469   :  { %v1955_v31 = vsel %vm1822_vm6, %v1920_v27, 0.0  ;;  %v1957_v43 = vsel %vm1822_vm6, %v1923_v16, 0.0 }
 0x46a   :  { %v1956_v55 = vadd.f32 %v1955_v31, %v1954_v19 }
 0x46c   :  { %v1929_v54 = vpop.xlane.xlu1 %1928  ;;  %v1958_v35 = vadd.f32 %v1957_v43, %v1956_v55  ;;  %v1926_v38 = vpop.xlane.xlu0 %1925 }
 0x46d   :  { %v1959_v45 = vsel %vm1822_vm6, %v1926_v38, 0.0  ;;  %v1961_v57 = vsel %vm1822_vm6, %v1929_v54, 0.0 }
 0x46e   :  { %v1960_v36 = vadd.f32 %v1959_v45, %v1958_v35 }
 0x470   :  { %v1935_v32 = vpop.xlane.xlu1 %1934  ;;  %v1962_v24 = vadd.f32 %v1961_v57, %v1960_v36  ;;  %v1932_v34 = vpop.xlane.xlu0 %1931 }
 0x471   :  { %v1963_v11 = vsel %vm1822_vm6, %v1932_v34, 0.0  ;;  %v1965_v46 = vsel %vm1822_vm6, %v1935_v32, 0.0 }
 0x472   :  { %v1964_v23 = vadd.f32 %v1963_v11, %v1962_v24 }
 0x474   :  { %v1966_v47 = vadd.f32 %v1965_v46, %v1964_v23 }
 0x476   :  { %v1967_v25 = vmul.f32 0.001953125, %v1966_v47 }
 0x478   :  { %v1968_v42 = vadd.f32 1e-05, %v1967_v25 }
 0x47a   :  { %2424 = vrsqrt.f32 %v1968_v42 }
 0x484   :  { %v2425_v48 = vpop.eup %2424 }
 0x485   :  { %v1970_v7 = vmul.f32 %v2425_v48, %v3074_v10  ;;  %v1971_v50 = vmul.f32 %v2425_v48, %v3071_v3  ;;  %v1972_v44 = vmul.f32 %v2425_v48, %v3080_v5  ;;  %v1973_v52 = vmul.f32 %v2425_v48, %v3077_v12 }
 0x486   :  { %v1974_v18 = vmul.f32 %v2425_v48, %v3090_v51  ;;  %v1975_v59 = vmul.f32 %v2425_v48, %v3087_v17  ;;  %v1976_v60 = vmul.f32 %v2425_v48, %v3102_v41  ;;  %v1977_v58 = vmul.f32 %v2425_v48, %v3099_v13 }
 0x487   :  { %v1978_v10 = vmul.f32 %v2425_v48, %v3120_v21  ;;  %v1979_v3 = vmul.f32 %v2425_v48, %v3117_v28  ;;  %v1980_v5 = vmul.f32 %v2425_v48, %v3132_v30  ;;  %v1981_v12 = vmul.f32 %v2425_v48, %v3129_v8  ;;  %v2101_v28 = vld [vmem:[%s3273_s5] ss:$0 sm:$0xff] }
 0x488   :  { %v1982_v63 = vmul.f32 %v2425_v48, %v3138_v33  ;;  %v1983_v61 = vmul.f32 %v2425_v48, %v3135_v22  ;;  %v1984_v51 = vmul.f32 %v2425_v48, %v3150_v39  ;;  %v1985_v17 = vmul.f32 %v2425_v48, %v3147_v37 }
 0x489   :  { %v1993_v1 = vmul.f32 %v2100_v0, %v1970_v7  ;;  %v1994_v41 = vmul.f32 %v2100_v0, %v1971_v50  ;;  %v1995_v2 = vmul.f32 %v2100_v0, %v1972_v44  ;;  %v1996_v13 = vmul.f32 %v2100_v0, %v1973_v52 }
 0x48a   :  { %v1997_v21 = vmul.f32 %v2100_v0, %v1974_v18  ;;  %v1998_v30 = vmul.f32 %v2100_v0, %v1975_v59  ;;  %v1999_v4 = vmul.f32 %v2100_v0, %v1976_v60  ;;  %v2000_v8 = vmul.f32 %v2100_v0, %v1977_v58 }
 0x48b   :  { %v2001_v26 = vmul.f32 %v2100_v0, %v1978_v10  ;;  %v2002_v33 = vmul.f32 %v2100_v0, %v1979_v3  ;;  %v2003_v9 = vmul.f32 %v2100_v0, %v1980_v5  ;;  %v2004_v22 = vmul.f32 %v2100_v0, %v1981_v12 }
 0x48c   :  { %v2005_v49 = vmul.f32 %v2100_v0, %v1982_v63  ;;  %v2006_v39 = vmul.f32 %v2100_v0, %v1983_v61  ;;  %v2007_v53 = vmul.f32 %v2100_v0, %v1984_v51  ;;  %v2008_v37 = vmul.f32 %v2100_v0, %v1985_v17 }
 0x48d   :  { %v2016_v62 = vadd.f32 %v2101_v28, %v1993_v1  ;;  %v2017_v6 = vadd.f32 %v2101_v28, %v1994_v41  ;;  %v2018_v56 = vadd.f32 %v2101_v28, %v1995_v2  ;;  %v2019_v14 = vadd.f32 %v2101_v28, %v1996_v13 }
 0x48e   :  { %v2020_v15 = vadd.f32 %v2101_v28, %v1997_v21  ;;  %v2021_v40 = vadd.f32 %v2101_v28, %v1998_v30  ;;  %v2022_v29 = vadd.f32 %v2101_v28, %v1999_v4  ;;  %v2023_v20 = vadd.f32 %v2101_v28, %v2000_v8 }
 0x48f   :  { %v2024_v16 = vadd.f32 %v2101_v28, %v2001_v26  ;;  %v2025_v19 = vadd.f32 %v2101_v28, %v2002_v33  ;;  %v2026_v27 = vadd.f32 %v2101_v28, %v2003_v9  ;;  %v2027_v31 = vadd.f32 %v2101_v28, %v2004_v22 }
 0x490   :  { %v2028_v55 = vadd.f32 %v2101_v28, %v2005_v49  ;;  %v2029_v43 = vadd.f32 %v2101_v28, %v2006_v39  ;;  %v2030_v54 = vadd.f32 %v2101_v28, %v2007_v53  ;;  %v2031_v35 = vadd.f32 %v2101_v28, %v2008_v37 }
 0x491   :  { %v2032_v38 = vmax.f32 %v2016_v62, 0.0  ;;  %v2033_v45 = vmax.f32 %v2017_v6, 0.0  ;;  %v2034_v36 = vmax.f32 %v2018_v56, 0.0  ;;  %v2035_v57 = vmax.f32 %v2019_v14, 0.0 }
 0x492   :  { %v2036_v32 = vmax.f32 %v2020_v15, 0.0  ;;  %v2037_v24 = vmax.f32 %v2021_v40, 0.0  ;;  %v2038_v34 = vmax.f32 %v2022_v29, 0.0  ;;  %v2039_v11 = vmax.f32 %v2023_v20, 0.0 }
 0x493   :  { %v2040_v23 = vmax.f32 %v2024_v16, 0.0  ;;  %v2041_v46 = vmax.f32 %v2025_v19, 0.0  ;;  %v2042_v47 = vmax.f32 %v2026_v27, 0.0  ;;  %v2043_v25 = vmax.f32 %v2027_v31, 0.0  ;;  %2048 = vst.msk [vmem:[%s3274_s6] sm:$0xf] %vm1773_vm5, %v2032_v38 }
 0x494   :  { %2049 = vst.msk [vmem:[%s3274_s6 + $0x4] sm:$0xf] %vm1773_vm5, %v2033_v45  ;;  %2050 = vst.msk [vmem:[%s3274_s6 + $0x8] sm:$0xf] %vm1773_vm5, %v2034_v36  ;;  %v2044_v42 = vmax.f32 %v2028_v55, 0.0  ;;  %v2045_v48 = vmax.f32 %v2029_v43, 0.0 }
 0x495   :  { %2051 = vst.msk [vmem:[%s3274_s6 + $0xc] sm:$0xf] %vm1773_vm5, %v2035_v57  ;;  %v2046_v7 = vmax.f32 %v2030_v54, 0.0  ;;  %v2047_v50 = vmax.f32 %v2031_v35, 0.0  ;;  %2052 = vst.msk [vmem:[%s3274_s6 + $0x10] sm:$0xf] %vm1773_vm5, %v2036_v32 }
 0x496   :  { %2053 = vst.msk [vmem:[%s3274_s6 + $0x14] sm:$0xf] %vm1773_vm5, %v2037_v24  ;;  %2054 = vst.msk [vmem:[%s3274_s6 + $0x18] sm:$0xf] %vm1773_vm5, %v2038_v34 }
 0x497   :  { %2055 = vst.msk [vmem:[%s3274_s6 + $0x1c] sm:$0xf] %vm1773_vm5, %v2039_v11  ;;  %2056 = vst.msk [vmem:[%s3274_s6 + $0x20] sm:$0xf] %vm1773_vm5, %v2040_v23 }
 0x498   :  { %2057 = vst.msk [vmem:[%s3274_s6 + $0x24] sm:$0xf] %vm1773_vm5, %v2041_v46  ;;  %2058 = vst.msk [vmem:[%s3274_s6 + $0x28] sm:$0xf] %vm1773_vm5, %v2042_v47 }
 0x499   :  { %2059 = vst.msk [vmem:[%s3274_s6 + $0x2c] sm:$0xf] %vm1773_vm5, %v2043_v25  ;;  %2060 = vst.msk [vmem:[%s3274_s6 + $0x30] sm:$0xf] %vm1773_vm5, %v2044_v42 }
 0x49a   :  { %2061 = vst.msk [vmem:[%s3274_s6 + $0x34] sm:$0xf] %vm1773_vm5, %v2045_v48  ;;  %2062 = vst.msk [vmem:[%s3274_s6 + $0x38] sm:$0xf] %vm1773_vm5, %v2046_v7 }
 0x49b   :  { %2063 = vst.msk [vmem:[%s3274_s6 + $0x3c] sm:$0xf] %vm1773_vm5, %v2047_v50 }

// kernel: monkey_acar_qkv_forward.15
= control target key start
LH: loop header
LB: loop body
LE: loop exit
PB: predicated region body
PF: predicated region fallthrough
CT: control target
= control target key end

     0   :  { %v307_v0 = vmov 0.0   ;;  %vm308_vm0 = vmmov 0   ;;  %vm44_vm1 = vcmask 523264   ;;  %vm190_vm2 = vcmask 1041409   ;;  %s469_s1 = inlined_call_operand.vmem [shape: bf16[64,32], index: 1, kind: input, shape index: {}]   ;;  %s470_s0 = inlined_call_operand.vmem [shape: f32[8,32,64], index: 0, kind: input, shape index: {}]   ;;  %s471_s2 = inlined_call_operand.vmem [shape: f32[8,32], index: 2, kind: output, shape index: {}]  }
   0x1   :  { %289 = vmatprep.subr.bf16.mxu0 %v307_v0  ;;  %v303_v1 = vld [vmem:[%s469_s1] sm:$0xff]   ;;  %297 = vmatprep.mubr.msk.bf16.mxu0 %vm308_vm0, %v307_v0  ;;  %v304_v2 = vld [vmem:[%s469_s1 + $0x8] sm:$0xff]   ;;  %v305_v3 = vld [vmem:[%s469_s1 + $0x10] sm:$0xff]   ;;  %vm192_vm3 = vcmask 1042434   ;;  %vm194_vm4 = vcmask 1043459   ;;  %vm196_vm5 = vcmask 1044484  }
   0x2   :  { %290 = vmatpush3.bf16.msra.mxu0 %v303_v1  ;;  %v12_v4 = vld [vmem:[%s470_s0] sm:$0xff]  ;;  %v13_v5 = vld [vmem:[%s470_s0 + $0x8] sm:$0xff]  ;;  %v14_v6 = vld [vmem:[%s470_s0 + $0x10] sm:$0xff]  ;;  %vm198_vm6 = vcmask 1045509   ;;  %vm200_vm7 = vcmask 1046534   ;;  %vm202_vm8 = vcmask 1047559  }
   0x3   :  { %291 = vmatprep.subr.bf16.mxu0 %v307_v0  ;;  %v15_v7 = vld [vmem:[%s470_s0 + $0x18] sm:$0xff]  ;;  %v16_v8 = vld [vmem:[%s470_s0 + $0x20] sm:$0xff]  ;;  %v17_v9 = vld [vmem:[%s470_s0 + $0x28] sm:$0xff]  ;;  %v45_v10 = vsel %vm44_vm1, %v12_v4, 0.0  ;;  %v46_v11 = vsel %vm44_vm1, %v13_v5, 0.0  ;;  %v48_v12 = vsel %vm44_vm1, %v14_v6, 0.0 }
   0x4   :  { %v18_v13 = vld [vmem:[%s470_s0 + $0x30] sm:$0xff]  ;;  %v19_v14 = vld [vmem:[%s470_s0 + $0x38] sm:$0xff]  ;;  %v20_v15 = vld [vmem:[%s470_s0 + $0x40] sm:$0xff]  ;;  %v47_v16 = vadd.f32 %v46_v11, %v45_v10  ;;  %v50_v17 = vsel %vm44_vm1, %v15_v7, 0.0  ;;  %v58_v18 = vsel %vm44_vm1, %v16_v8, 0.0  ;;  %v59_v19 = vsel %vm44_vm1, %v17_v9, 0.0 }
   0x5   :  { %v21_v20 = vld [vmem:[%s470_s0 + $0x48] sm:$0xff]  ;;  %v22_v21 = vld [vmem:[%s470_s0 + $0x50] sm:$0xff]  ;;  %v23_v22 = vld [vmem:[%s470_s0 + $0x58] sm:$0xff]  ;;  %v60_v23 = vadd.f32 %v59_v19, %v58_v18  ;;  %v61_v24 = vsel %vm44_vm1, %v18_v13, 0.0  ;;  %v63_v25 = vsel %vm44_vm1, %v19_v14, 0.0  ;;  %v71_v26 = vsel %vm44_vm1, %v20_v15, 0.0 }
   0x6   :  { %292 = vmatpush3.bf16.msra.mxu0 %v304_v2  ;;  %v306_v27 = vld [vmem:[%s469_s1 + $0x18] sm:$0xff]   ;;  %v24_v28 = vld [vmem:[%s470_s0 + $0x60] sm:$0xff]  ;;  %v25_v29 = vld [vmem:[%s470_s0 + $0x68] sm:$0xff]  ;;  %v49_v31 = vadd.f32 %v48_v12, %v47_v16  ;;  %v72_v32 = vsel %vm44_vm1, %v21_v20, 0.0  ;;  %v74_v33 = vsel %vm44_vm1, %v22_v21, 0.0  ;;  %v76_v34 = vsel %vm44_vm1, %v23_v22, 0.0 }
   0x7   :  { %293 = vmatprep.subr.bf16.mxu0 %v307_v0  ;;  %v26_v30 = vld [vmem:[%s470_s0 + $0x70] sm:$0xff]  ;;  %v27_v35 = vld [vmem:[%s470_s0 + $0x78] sm:$0xff]  ;;  %v28_v36 = vld [vmem:[%s470_s0 + $0x80] sm:$0xff]  ;;  %v62_v38 = vadd.f32 %v61_v24, %v60_v23  ;;  %v73_v39 = vadd.f32 %v72_v32, %v71_v26  ;;  %v84_v40 = vsel %vm44_vm1, %v24_v28, 0.0  ;;  %v85_v41 = vsel %vm44_vm1, %v25_v29, 0.0 }
   0x8   :  { %v29_v37 = vld [vmem:[%s470_s0 + $0x88] sm:$0xff]  ;;  %v30_v42 = vld [vmem:[%s470_s0 + $0x90] sm:$0xff]  ;;  %v31_v43 = vld [vmem:[%s470_s0 + $0x98] sm:$0xff]  ;;  %v51_v45 = vadd.f32 %v50_v17, %v49_v31  ;;  %v86_v46 = vadd.f32 %v85_v41, %v84_v40  ;;  %v87_v47 = vsel %vm44_vm1, %v26_v30, 0.0  ;;  %v89_v48 = vsel %vm44_vm1, %v27_v35, 0.0 }
   0x9   :  { %v32_v44 = vld [vmem:[%s470_s0 + $0xa0] sm:$0xff]  ;;  %v33_v49 = vld [vmem:[%s470_s0 + $0xa8] sm:$0xff]  ;;  %v64_v50 = vadd.f32 %v63_v25, %v62_v38  ;;  %v75_v51 = vadd.f32 %v74_v33, %v73_v39  ;;  %v97_v52 = vsel %vm44_vm1, %v28_v36, 0.0  ;;  %v98_v53 = vsel %vm44_vm1, %v29_v37, 0.0  ;;  %v34_v54 = vld [vmem:[%s470_s0 + $0xb0] sm:$0xff] }
   0xa   :  { %294 = vmatpush3.bf16.msra.mxu0 %v305_v3  ;;  %v52_v55 = vrot.slane %v51_v45, 4  ;;  %v88_v56 = vadd.f32 %v87_v47, %v86_v46  ;;  %v99_v57 = vadd.f32 %v98_v53, %v97_v52  ;;  %v100_v58 = vsel %vm44_vm1, %v30_v42, 0.0  ;;  %v35_v59 = vld [vmem:[%s470_s0 + $0xb8] sm:$0xff]  ;;  %v37_v5 = vld [vmem:[%s470_s0 + $0xc8] sm:$0xff]  ;;  %v38_v14 = vld [vmem:[%s470_s0 + $0xd0] sm:$0xff] }
   0xb   :  { %295 = vmatprep.subr.bf16.mxu0 %v307_v0  ;;  %v65_v60 = vrot.slane %v64_v50, 4  ;;  %v77_v61 = vadd.f32 %v76_v34, %v75_v51  ;;  %v102_v62 = vsel %vm44_vm1, %v31_v43, 0.0  ;;  %v110_v63 = vsel %vm44_vm1, %v32_v44, 0.0  ;;  %v36_v0 = vld [vmem:[%s470_s0 + $0xc0] sm:$0xff]  ;;  %v39_v23 = vld [vmem:[%s470_s0 + $0xd8] sm:$0xff]  ;;  %v41_v33 = vld [vmem:[%s470_s0 + $0xe8] sm:$0xff] }
   0xc   :  { %v53_v1 = vadd.f32 %v52_v55, %v51_v45  ;;  %v90_v2 = vadd.f32 %v89_v48, %v88_v56  ;;  %v101_v3 = vadd.f32 %v100_v58, %v99_v57  ;;  %v111_v4 = vsel %vm44_vm1, %v33_v49, 0.0  ;;  %v40_v32 = vld [vmem:[%s470_s0 + $0xe0] sm:$0xff]  ;;  %v42_v42 = vld [vmem:[%s470_s0 + $0xf0] sm:$0xff]  ;;  %v43_v43 = vld [vmem:[%s470_s0 + $0xf8] sm:$0xff] }
   0xd   :  { %v66_v6 = vadd.f32 %v65_v60, %v64_v50  ;;  %v78_v7 = vrot.slane %v77_v61, 4  ;;  %v112_v8 = vadd.f32 %v111_v4, %v110_v63  ;;  %v113_v9 = vsel %vm44_vm1, %v34_v54, 0.0 }
   0xe   :  { %296 = vmatpush3.bf16.msra.mxu0 %v306_v27  ;;  %v54_v10 = vrot.slane %v53_v1, 2  ;;  %v91_v11 = vrot.slane %v90_v2, 4  ;;  %v103_v12 = vadd.f32 %v102_v62, %v101_v3  ;;  %v115_v13 = vsel %vm44_vm1, %v35_v59, 0.0 }
   0xf   :  { %v67_v15 = vrot.slane %v66_v6, 2  ;;  %v79_v16 = vadd.f32 %v78_v7, %v77_v61  ;;  %v114_v17 = vadd.f32 %v113_v9, %v112_v8  ;;  %v123_v18 = vsel %vm44_vm1, %v36_v0, 0.0 }
  0x10   :  { %v55_v19 = vadd.f32 %v54_v10, %v53_v1  ;;  %v92_v20 = vadd.f32 %v91_v11, %v90_v2  ;;  %v104_v21 = vrot.slane %v103_v12, 4  ;;  %v124_v22 = vsel %vm44_vm1, %v37_v5, 0.0 }
  0x11   :  { %v68_v24 = vadd.f32 %v67_v15, %v66_v6  ;;  %v80_v25 = vrot.slane %v79_v16, 2  ;;  %v116_v26 = vadd.f32 %v115_v13, %v114_v17  ;;  %v125_v27 = vadd.f32 %v124_v22, %v123_v18 }
  0x12   :  { %v56_v28 = vrot.slane %v55_v19, 1  ;;  %v93_v29 = vrot.slane %v92_v20, 2  ;;  %v105_v30 = vadd.f32 %v104_v21, %v103_v12  ;;  %v126_v31 = vsel %vm44_vm1, %v38_v14, 0.0 }
  0x13   :  { %v69_v34 = vrot.slane %v68_v24, 1  ;;  %v81_v35 = vadd.f32 %v80_v25, %v79_v16  ;;  %v117_v36 = vrot.slane %v116_v26, 4  ;;  %v127_v37 = vadd.f32 %v126_v31, %v125_v27 }
  0x14   :  { %v57_v38 = vadd.f32 %v56_v28, %v55_v19  ;;  %v94_v39 = vadd.f32 %v93_v29, %v92_v20  ;;  %v106_v40 = vrot.slane %v105_v30, 2  ;;  %v128_v41 = vsel %vm44_vm1, %v39_v23, 0.0 }
  0x15   :  { %v70_v44 = vadd.f32 %v69_v34, %v68_v24  ;;  %v82_v45 = vrot.slane %v81_v35, 1  ;;  %v118_v46 = vadd.f32 %v117_v36, %v116_v26  ;;  %v129_v47 = vadd.f32 %v128_v41, %v127_v37 }
  0x16   :  { %v95_v48 = vrot.slane %v94_v39, 1  ;;  %v107_v49 = vadd.f32 %v106_v40, %v105_v30  ;;  %v136_v50 = vsel %vm44_vm1, %v40_v32, 0.0  ;;  %v137_v51 = vsel %vm44_vm1, %v41_v33, 0.0 }
  0x17   :  { %v83_v52 = vadd.f32 %v82_v45, %v81_v35  ;;  %v119_v53 = vrot.slane %v118_v46, 2  ;;  %v130_v54 = vrot.slane %v129_v47, 4  ;;  %v138_v55 = vadd.f32 %v137_v51, %v136_v50 }
  0x18   :  { %v96_v56 = vadd.f32 %v95_v48, %v94_v39  ;;  %v108_v57 = vrot.slane %v107_v49, 1  ;;  %v139_v58 = vsel %vm44_vm1, %v42_v42, 0.0  ;;  %v141_v59 = vsel %vm44_vm1, %v43_v43, 0.0 }
  0x19   :  { %v120_v60 = vadd.f32 %v119_v53, %v118_v46  ;;  %v131_v61 = vadd.f32 %v130_v54, %v129_v47  ;;  %v140_v62 = vadd.f32 %v139_v58, %v138_v55  ;;  %v150_v63 = vmul.f32 0.03125, %v57_v38 }
  0x1a   :  { %v109_v0 = vadd.f32 %v108_v57, %v107_v49  ;;  %v151_v1 = vmul.f32 0.03125, %v70_v44  ;;  %v152_v2 = vmul.f32 0.03125, %v83_v52  ;;  %v153_v3 = vmul.f32 0.03125, %v96_v56 }
  0x1b   :  { %v121_v4 = vrot.slane %v120_v60, 1  ;;  %v132_v5 = vrot.slane %v131_v61, 2  ;;  %v142_v6 = vadd.f32 %v141_v59, %v140_v62  ;;  %v158_v7 = vpack.c.bf16 %v150_v63, %v150_v63 }
  0x1c   :  { %v154_v8 = vmul.f32 0.03125, %v109_v0  ;;  %v159_v9 = vpack.c.bf16 %v151_v1, %v151_v1  ;;  %v160_v10 = vpack.c.bf16 %v152_v2, %v152_v2  ;;  %v161_v11 = vpack.c.bf16 %v153_v3, %v153_v3 }
  0x1d   :  { %v122_v12 = vadd.f32 %v121_v4, %v120_v60  ;;  %v133_v13 = vadd.f32 %v132_v5, %v131_v61  ;;  %v143_v14 = vrot.slane %v142_v6, 4  ;;  %v182_v15 = vunpack.c.l.b16 %v158_v7 }
  0x1e   :  { %v162_v16 = vpack.c.bf16 %v154_v8, %v154_v8  ;;  %v183_v17 = vunpack.c.l.b16 %v159_v9  ;;  %v184_v18 = vunpack.c.l.b16 %v160_v10  ;;  %v185_v22 = vunpack.c.l.b16 %v161_v11 }
  0x1f   :  { %v134_v19 = vrot.slane %v133_v13, 1  ;;  %v144_v20 = vadd.f32 %v143_v14, %v142_v6  ;;  %v155_v21 = vmul.f32 0.03125, %v122_v12  ;;  %vm273_vm9 = vcmask 261120  }
  0x20   :  { %v191_v23 = vsel %vm190_vm2, %v183_v17, %v182_v15  ;;  %v186_v28 = vunpack.c.l.b16 %v162_v16 }
  0x21   :  { %v135_v24 = vadd.f32 %v134_v19, %v133_v13  ;;  %v145_v25 = vrot.slane %v144_v20, 2  ;;  %v163_v26 = vpack.c.bf16 %v155_v21, %v155_v21  ;;  %v193_v27 = vsel %vm192_vm3, %v184_v18, %v191_v23 }
  0x22   :  { %v195_v31 = vsel %vm194_vm4, %v185_v22, %v193_v27 }
  0x23   :  { %v146_v29 = vadd.f32 %v145_v25, %v144_v20  ;;  %v156_v30 = vmul.f32 0.03125, %v135_v24  ;;  %v187_v34 = vunpack.c.l.b16 %v163_v26  ;;  %v197_v35 = vsel %vm196_vm5, %v186_v28, %v195_v31 }
  0x25   :  { %v147_v32 = vrot.slane %v146_v29, 1  ;;  %v164_v33 = vpack.c.bf16 %v156_v30, %v156_v30  ;;  %v199_v39 = vsel %vm198_vm6, %v187_v34, %v197_v35 }
  0x27   :  { %v148_v36 = vadd.f32 %v147_v32, %v146_v29  ;;  %v188_v37 = vunpack.c.l.b16 %v164_v33 }
  0x29   :  { %v157_v38 = vmul.f32 0.03125, %v148_v36  ;;  %v201_v41 = vsel %vm200_vm7, %v188_v37, %v199_v39 }
  0x2b   :  { %v165_v40 = vpack.c.bf16 %v157_v38, %v157_v38 }
  0x2d   :  { %v189_v42 = vunpack.c.l.b16 %v165_v40 }
  0x2f   :  { %v203_v43 = vsel %vm202_vm8, %v189_v42, %v201_v41 }
  0x30   :  { %v204_v44 = vpack.c.b16 %v203_v43, %v203_v43 }
  0x32   :  { %298 = vmatmul.mubr.msk.bf16.vlgmr.msra.gmra.mrb[0].mxu0 %vm44_vm1, %v204_v44 }
 0x105   :  { %v266_v45 = vpop.f32.mrb[0].mxu0 }
 0x106   :  { %v272_v46 = vmax.f32 %v266_v45, 0.0  ;;  %v299_v47 = vpop.f32.mrb[1].mxu0 }
 0x107   :  { %v269_v48 = vpop.f32.mrb[2].mxu0 }
 0x108   :  { %274 = vst.msk [vmem:[%s471_s2] sm:$0xff] %vm273_vm9, %v272_v46  ;;  %v300_v49 = vpop.f32.mrb[3].mxu0 }

</bundles_post_ra>
